<compile_context>
chip_gen: v6e
topology: v6e:2x2x1
jax: 0.10.0
libtpu: 0.0.40
codegen_flags: <defaults>
</compile_context>

<pallas_src>
import functools

import jax
import jax.numpy as jnp
from jax.experimental import pallas as pl
from jax.experimental.pallas import tpu as pltpu

_EPS = 1e-5
_LANE = 128


def _round_up(x, m):
    return (x + m - 1) // m * m


# --------------------------------------------------------------------------- #
# kernel
# --------------------------------------------------------------------------- #
def _make_residual_kernel(has_downsample):
    """Builds the kernel body; `has_downsample` is a static Python flag."""

    def kernel(*refs):
        if has_downsample:
            (x_ref, w1_ref, b1_ref, w2_ref, b2_ref, wd_ref, bd_ref,
             out_ref, xpad, mid) = refs
        else:
            (x_ref, w1_ref, b1_ref, w2_ref, b2_ref,
             out_ref, xpad, mid) = refs

        H, W, Cin = x_ref.shape            # batch dim squeezed by BlockSpec
        Cp = out_ref.shape[-1]             # lane-padded output channels
        Cmid = mid.shape[-1]               # true conv1 output channels (Cout)
        HW = H * W
        f32, bf16 = jnp.float32, jnp.bfloat16

        def zero_halo(buf, c):
            # zero only the 1-wide border of a (H+2, W+2, c) buffer
            buf[0:1, :, :] = jnp.zeros((1, W + 2, c), f32)
            buf[H + 1:H + 2, :, :] = jnp.zeros((1, W + 2, c), f32)
            buf[1:H + 1, 0:1, :] = jnp.zeros((H, 1, c), f32)
            buf[1:H + 1, W + 1:W + 2, :] = jnp.zeros((H, 1, c), f32)

        def conv3x3(buf, c, w_ref, shift_ref):
            # 3x3 conv (pad 1) as nine MXU dots chained into ONE expression:
            # accumulation stays in vregs (MRB on v7x) -- no VMEM accumulator.
            # BN scale is pre-folded into w_ref; shift_ref is the folded bias.
            acc = shift_ref[...]                               # (1, Cp) broadcasts
            for t in range(9):
                di, dj = t // 3, t % 3
                tap = buf[di:di + H, dj:dj + W, :].reshape(HW, c).astype(bf16)
                acc = acc + jnp.dot(tap, w_ref[t], preferred_element_type=f32)
            return acc                                         # (HW, Cp) f32

        # ---- stage zero-padded input in VMEM (halo-only zeroing) ----------- #
        zero_halo(xpad, Cin)
        xpad[1:H + 1, 1:W + 1, :] = x_ref[...]

        # ---- conv1 + folded bn1 + relu ------------------------------------- #
        out1 = jnp.maximum(conv3x3(xpad, Cin, w1_ref, b1_ref), 0.0)

        # ---- stage conv1 activation for conv2: true Cmid channels only ----- #
        zero_halo(mid, Cmid)
        mid[1:H + 1, 1:W + 1, :] = out1[:, 0:Cmid].reshape(H, W, Cmid)

        # ---- identity / 1x1-conv downsample, fully in-register ------------- #
        if has_downsample:
            xi = x_ref[...].reshape(HW, Cin).astype(bf16)
            idt = (jnp.dot(xi, wd_ref[...], preferred_element_type=f32)
                   + bd_ref[...])
        else:
            # Cin == Cout here. Stage the exact f32 identity through out_ref's
            # first Cin lanes; padded lanes are never zero-filled because the
            # wrapper slices them off (they carry don't-care values only).
            if Cp > Cin:
                out_ref[:, :, 0:Cin] = x_ref[...]
                idt = out_ref[...].reshape(HW, Cp)
            else:
                idt = x_ref[...].reshape(HW, Cp)

        # ---- conv2 + folded bn2, residual add, final relu ------------------- #
        out2 = conv3x3(mid, Cmid, w2_ref, b2_ref)
        out = jnp.maximum(out2 + idt, 0.0)
        out_ref[...] = out.reshape(H, W, Cp).astype(out_ref.dtype)

    return kernel


# --------------------------------------------------------------------------- #
# wrapper
# --------------------------------------------------------------------------- #
def _fold_bn(gamma, beta, mean, var, conv_bias):
    """Eval-mode BN -> per-out-channel (scale, shift); shift absorbs conv bias."""
    scale = gamma * jax.lax.rsqrt(var + _EPS)
    shift = beta + (conv_bias - mean) * scale
    return scale, shift


def _pad_row(v, cp):
    return jnp.pad(v, (0, cp - v.shape[0])).reshape(1, cp).astype(jnp.float32)


def _pack_w3x3(w_oihw, scale, cp):
    """OIHW 3x3 weights with BN scale folded in -> (9, Cin, cp) bf16, tap-major."""
    cout, cin = w_oihw.shape[0], w_oihw.shape[1]
    w = w_oihw * scale[:, None, None, None]                  # fold BN scale
    w = jnp.transpose(w, (2, 3, 1, 0))                       # (3, 3, Cin, Cout)
    w = jnp.pad(w, ((0, 0), (0, 0), (0, 0), (0, cp - cout)))
    return w.reshape(9, cin, cp).astype(jnp.bfloat16)


def _full_spec(a):
    return pl.BlockSpec(a.shape, lambda n, _nd=a.ndim: (0,) * _nd)


@functools.partial(jax.jit, static_argnames=("stride",))
def residual_block_forward(x_nchw, p, stride=1):
    """NCHW in / NCHW out forward pass of Residual_Block (eval mode)."""
    assert stride == 1, "TODO(synk): stride > 1 not implemented in-kernel"
    N, Cin, H, W = x_nchw.shape
    Cout = p["w1"].shape[0]
    Cp = _round_up(max(Cout, _LANE), _LANE)                  # lane-dense out channels
    Cmid = Cout                                              # conv2 contraction channels
    has_downsample = "wd" in p

    x = jnp.transpose(x_nchw, (0, 2, 3, 1))                  # NCHW -> NHWC

    s1, sh1 = _fold_bn(p["g1"], p["be1"], p["m1"], p["v1"], p["b1"])
    s2, sh2 = _fold_bn(p["g2"], p["be2"], p["m2"], p["v2"], p["b2"])
    w1 = _pack_w3x3(p["w1"], s1, Cp)                         # (9, Cin,  Cp) bf16
    w2 = _pack_w3x3(p["w2"], s2, Cp)                         # (9, Cmid, Cp) bf16
    b1 = _pad_row(sh1, Cp)
    b2 = _pad_row(sh2, Cp)

    inputs = [x, w1, b1, w2, b2]
    in_specs = [pl.BlockSpec((None, H, W, Cin), lambda n: (n, 0, 0, 0)),
                _full_spec(w1), _full_spec(b1), _full_spec(w2), _full_spec(b2)]
    wd_bytes = 0
    if has_downsample:
        sd, shd = _fold_bn(p["gd"], p["bed"], p["md"], p["vd"], p["bd"])
        wd = (p["wd"][:, :, 0, 0] * sd[:, None]).T           # (Cin, Cout), scale folded
        wd = jnp.pad(wd, ((0, 0), (0, Cp - Cout))).astype(jnp.bfloat16)
        bd = _pad_row(shd, Cp)
        inputs += [wd, bd]
        in_specs += [_full_spec(wd), _full_spec(bd)]
        wd_bytes = wd.size * 2

    scratch = [pltpu.VMEM((H + 2, W + 2, Cin), jnp.float32),    # padded input
               pltpu.VMEM((H + 2, W + 2, Cmid), jnp.float32)]   # padded conv1 act

    # VMEM budget: double-buffered in/out blocks + params + single-copy scratch,
    # with headroom, capped to fit comfortably inside v7x's 64 MiB VMEM.
    blk_bytes = 2 * H * W * (Cin + Cp) * 4
    w_bytes = 2 * ((w1.size + w2.size) * 2 + wd_bytes + 3 * Cp * 4)
    scr_bytes = (H + 2) * (W + 2) * (Cin + Cmid) * 4            # not double-buffered
    vmem_limit = int(min(blk_bytes + w_bytes + scr_bytes + (16 << 20), 40 << 20))

    flops = 2 * N * H * W * 9 * (Cin + Cmid) * Cp
    if has_downsample:
        flops += 2 * N * H * W * Cin * Cp
    bytes_accessed = int(N * H * W * Cin * 4 + (w1.size + w2.size) * 2
                         + wd_bytes + N * H * W * Cp * 4)

    out_nhwc = pl.pallas_call(
        _make_residual_kernel(has_downsample),
        out_shape=jax.ShapeDtypeStruct((N, H, W, Cp), jnp.float32),
        grid=(N,),
        in_specs=in_specs,
        out_specs=pl.BlockSpec((None, H, W, Cp), lambda n: (n, 0, 0, 0)),
        scratch_shapes=scratch,
        compiler_params=pltpu.CompilerParams(
            dimension_semantics=("parallel",),
            vmem_limit_bytes=vmem_limit),
        cost_estimate=pl.CostEstimate(flops=flops, transcendentals=0,
                                      bytes_accessed=bytes_accessed),
    )(*inputs)

    out = out_nhwc[:, :, :, :Cout]                           # drop lane padding
    return jnp.transpose(out, (0, 3, 1, 2))                  # NHWC -> NCHW


# --------------------------------------------------------------------------- #
# pure-JAX reference + params
# --------------------------------------------------------------------------- #
def reference_forward(x, p):
    hi = jax.lax.Precision.HIGHEST

    def conv(x, w, b, pad):
        y = jax.lax.conv_general_dilated(
            x, w, window_strides=(1, 1), padding=[(pad, pad), (pad, pad)],
            dimension_numbers=("NCHW", "OIHW", "NCHW"), precision=hi)
        return y + b[None, :, None, None]

    def bn(x, g, be, m, v):
        return (g[None, :, None, None] * (x - m[None, :, None, None])
                * jax.lax.rsqrt(v[None, :, None, None] + _EPS)
                + be[None, :, None, None])

    out = jax.nn.relu(bn(conv(x, p["w1"], p["b1"], 1),
                         p["g1"], p["be1"], p["m1"], p["v1"]))
    out = bn(conv(out, p["w2"], p["b2"], 1),
             p["g2"], p["be2"], p["m2"], p["v2"])
    if "wd" in p:
        idt = bn(conv(x, p["wd"], p["bd"], 0),
                 p["gd"], p["bed"], p["md"], p["vd"])
    else:
        idt = x
    return jax.nn.relu(out + idt)


def init_params(key, cin, cout, stride=1):
    has_ds = (stride != 1) or (cin != cout)
    ks = jax.random.split(key, 18)
    n = lambda k, s, scale=1.0: scale * jax.random.normal(k, s, jnp.float32)
    u = lambda k, s: jax.random.uniform(k, s, jnp.float32, 0.5, 1.5)
    p = dict(
        w1=n(ks[0], (cout, cin, 3, 3), 1.0 / (9 * cin) ** 0.5),
        b1=n(ks[1], (cout,), 0.1),
        g1=1.0 + n(ks[2], (cout,), 0.1), be1=n(ks[3], (cout,), 0.1),
        m1=n(ks[4], (cout,), 0.1), v1=u(ks[5], (cout,)),
        w2=n(ks[6], (cout, cout, 3, 3), 1.0 / (9 * cout) ** 0.5),
        b2=n(ks[7], (cout,), 0.1),
        g2=1.0 + n(ks[8], (cout,), 0.1), be2=n(ks[9], (cout,), 0.1),
        m2=n(ks[10], (cout,), 0.1), v2=u(ks[11], (cout,)),
    )
    if has_ds:
        p.update(
            wd=n(ks[12], (cout, cin, 1, 1), 1.0 / cin ** 0.5),
            bd=n(ks[13], (cout,), 0.1),
            gd=1.0 + n(ks[14], (cout,), 0.1), bed=n(ks[15], (cout,), 0.1),
            md=n(ks[16], (cout,), 0.1), vd=u(ks[17], (cout,)),
        )
    return p


if __name__ == "__main__":
    key = jax.random.PRNGKey(0)
    N, H, W = 2, 16, 16
    # (4, 8): Cin != Cout -> 1x1-conv downsample branch
    # (8, 8): Cin == Cout, stride 1 -> pure identity branch
    for cin, cout in [(4, 8), (8, 8)]:
        key, kx, kp = jax.random.split(key, 3)
        x = jax.random.normal(kx, (N, cin, H, W), jnp.float32)
        params = init_params(kp, cin, cout)

        out = jax.block_until_ready(residual_block_forward(x, params))
        assert out.shape == (N, cout, H, W), out.shape

        ref = reference_forward(x, params)
        err = float(jnp.max(jnp.abs(out - ref)))
        # bf16 MXU operands (BN scale folded into weights) with f32 accumulation
        assert err < 1e-1, f"cin={cin} cout={cout}: max abs err {err}"
    print("KERNEL_OK")
</pallas_src>

<mosaic_0001>
module attributes {stable_mosaic.version = 11 : i64} {
  func.func @kernel(%arg0: i32, %arg1: memref<1x16x16x4xf32, #tpu.memory_space<vmem>>, %arg2: memref<9x4x128xbf16, #tpu.memory_space<vmem>>, %arg3: memref<1x128xf32, #tpu.memory_space<vmem>>, %arg4: memref<9x8x128xbf16, #tpu.memory_space<vmem>>, %arg5: memref<1x128xf32, #tpu.memory_space<vmem>>, %arg6: memref<4x128xbf16, #tpu.memory_space<vmem>>, %arg7: memref<1x128xf32, #tpu.memory_space<vmem>>, %arg8: memref<1x16x16x128xf32, #tpu.memory_space<vmem>>, %arg9: memref<18x18x4xf32, #tpu.memory_space<vmem>>, %arg10: memref<18x18x8xf32, #tpu.memory_space<vmem>>) attributes {dimension_semantics = [#tpu.dimension_semantics<parallel>], iteration_bounds = array<i64: 2>, scalar_prefetch = 0 : i64, scratch_operands = 2 : i64, tpu.core_type = #tpu.core_type<tc>, window_params = [{transform_indices = @transform_0, window_bounds = array<i64: 1, 16, 16, 4>}, {pipeline_mode = #tpu.pipeline_mode<synchronous>, transform_indices = @transform_1, window_bounds = array<i64: 9, 4, 128>}, {pipeline_mode = #tpu.pipeline_mode<synchronous>, transform_indices = @transform_2, window_bounds = array<i64: 1, 128>}, {pipeline_mode = #tpu.pipeline_mode<synchronous>, transform_indices = @transform_3, window_bounds = array<i64: 9, 8, 128>}, {pipeline_mode = #tpu.pipeline_mode<synchronous>, transform_indices = @transform_4, window_bounds = array<i64: 1, 128>}, {pipeline_mode = #tpu.pipeline_mode<synchronous>, transform_indices = @transform_5, window_bounds = array<i64: 4, 128>}, {pipeline_mode = #tpu.pipeline_mode<synchronous>, transform_indices = @transform_6, window_bounds = array<i64: 1, 128>}, {transform_indices = @transform_7, window_bounds = array<i64: 1, 16, 16, 128>}]} {
    %cst = arith.constant 0.000000e+00 : f32
    %0 = vector.broadcast %cst : f32 to vector<1x18x4xf32>
    %c0 = arith.constant 0 : index
    %c0_0 = arith.constant 0 : index
    %c0_1 = arith.constant 0 : index
    %1 = vector.load %arg9[%c0, %c0_0, %c0_1] : memref<18x18x4xf32, #tpu.memory_space<vmem>>, vector<1x18x4xf32>
    tpu.vector_store %arg9[%c0, %c0_0, %c0_1], %0 {strides = array<i32>} : memref<18x18x4xf32, #tpu.memory_space<vmem>>, vector<1x18x4xf32>,
    %cst_2 = arith.constant 0.000000e+00 : f32
    %2 = vector.broadcast %cst_2 : f32 to vector<1x18x4xf32>
    %c17 = arith.constant 17 : index
    %c0_3 = arith.constant 0 : index
    %c0_4 = arith.constant 0 : index
    %3 = vector.load %arg9[%c17, %c0_3, %c0_4] : memref<18x18x4xf32, #tpu.memory_space<vmem>>, vector<1x18x4xf32>
    tpu.vector_store %arg9[%c17, %c0_3, %c0_4], %2 {strides = array<i32>} : memref<18x18x4xf32, #tpu.memory_space<vmem>>, vector<1x18x4xf32>,
    %cst_5 = arith.constant 0.000000e+00 : f32
    %4 = vector.broadcast %cst_5 : f32 to vector<16x1x4xf32>
    %c1 = arith.constant 1 : index
    %c0_6 = arith.constant 0 : index
    %c0_7 = arith.constant 0 : index
    %5 = vector.load %arg9[%c1, %c0_6, %c0_7] : memref<18x18x4xf32, #tpu.memory_space<vmem>>, vector<16x1x4xf32>
    tpu.vector_store %arg9[%c1, %c0_6, %c0_7], %4 {strides = array<i32>} : memref<18x18x4xf32, #tpu.memory_space<vmem>>, vector<16x1x4xf32>,
    %cst_8 = arith.constant 0.000000e+00 : f32
    %6 = vector.broadcast %cst_8 : f32 to vector<16x1x4xf32>
    %c1_9 = arith.constant 1 : index
    %c17_10 = arith.constant 17 : index
    %c0_11 = arith.constant 0 : index
    %7 = vector.load %arg9[%c1_9, %c17_10, %c0_11] : memref<18x18x4xf32, #tpu.memory_space<vmem>>, vector<16x1x4xf32>
    tpu.vector_store %arg9[%c1_9, %c17_10, %c0_11], %6 {strides = array<i32>} : memref<18x18x4xf32, #tpu.memory_space<vmem>>, vector<16x1x4xf32>,
    %c0_12 = arith.constant 0 : index
    %c0_13 = arith.constant 0 : index
    %c0_14 = arith.constant 0 : index
    %c0_15 = arith.constant 0 : index
    %8 = vector.load %arg1[%c0_12, %c0_13, %c0_14, %c0_15] : memref<1x16x16x4xf32, #tpu.memory_space<vmem>>, vector<1x16x16x4xf32>
    %9 = vector.shape_cast %8 : vector<1x16x16x4xf32> to vector<16x16x4xf32>
    %c1_16 = arith.constant 1 : index
    %c1_17 = arith.constant 1 : index
    %c0_18 = arith.constant 0 : index
    %10 = vector.load %arg9[%c1_16, %c1_17, %c0_18] : memref<18x18x4xf32, #tpu.memory_space<vmem>>, vector<16x16x4xf32>
    tpu.vector_store %arg9[%c1_16, %c1_17, %c0_18], %9 {strides = array<i32>} : memref<18x18x4xf32, #tpu.memory_space<vmem>>, vector<16x16x4xf32>,
    %c0_19 = arith.constant 0 : index
    %c0_20 = arith.constant 0 : index
    %11 = vector.load %arg3[%c0_19, %c0_20] : memref<1x128xf32, #tpu.memory_space<vmem>>, vector<1x128xf32>
    %c0_21 = arith.constant 0 : index
    %c0_22 = arith.constant 0 : index
    %c0_23 = arith.constant 0 : index
    %12 = vector.load %arg9[%c0_21, %c0_22, %c0_23] : memref<18x18x4xf32, #tpu.memory_space<vmem>>, vector<16x16x4xf32>
    %13 = vector.shape_cast %12 : vector<16x16x4xf32> to vector<256x4xf32>
    %14 = arith.truncf %13 : vector<256x4xf32> to vector<256x4xbf16>
    %c0_24 = arith.constant 0 : index
    %c0_25 = arith.constant 0 : index
    %c0_26 = arith.constant 0 : index
    %15 = vector.load %arg2[%c0_24, %c0_25, %c0_26] : memref<9x4x128xbf16, #tpu.memory_space<vmem>>, vector<1x4x128xbf16>
    %16 = vector.shape_cast %15 : vector<1x4x128xbf16> to vector<4x128xbf16>
    %cst_27 = arith.constant dense<0.000000e+00> : vector<256x128xf32>
    %17 = tpu.matmul %14, %16, %cst_27 {dimension_numbers = #tpu.dot_dimension_numbers<[1], [0], [0], [1], [0, 0, 1, 1], [], []>} : vector<256x4xbf16>, vector<4x128xbf16>, vector<256x128xf32> -> vector<256x128xf32>
    %18 = vector.broadcast %11 : vector<1x128xf32> to vector<256x128xf32>
    %19 = arith.addf %18, %17 : vector<256x128xf32>
    %c0_28 = arith.constant 0 : index
    %c1_29 = arith.constant 1 : index
    %c0_30 = arith.constant 0 : index
    %20 = vector.load %arg9[%c0_28, %c1_29, %c0_30] : memref<18x18x4xf32, #tpu.memory_space<vmem>>, vector<16x16x4xf32>
    %21 = vector.shape_cast %20 : vector<16x16x4xf32> to vector<256x4xf32>
    %22 = arith.truncf %21 : vector<256x4xf32> to vector<256x4xbf16>
    %c1_31 = arith.constant 1 : index
    %c0_32 = arith.constant 0 : index
    %c0_33 = arith.constant 0 : index
    %23 = vector.load %arg2[%c1_31, %c0_32, %c0_33] : memref<9x4x128xbf16, #tpu.memory_space<vmem>>, vector<1x4x128xbf16>
    %24 = vector.shape_cast %23 : vector<1x4x128xbf16> to vector<4x128xbf16>
    %cst_34 = arith.constant dense<0.000000e+00> : vector<256x128xf32>
    %25 = tpu.matmul %22, %24, %cst_34 {dimension_numbers = #tpu.dot_dimension_numbers<[1], [0], [0], [1], [0, 0, 1, 1], [], []>} : vector<256x4xbf16>, vector<4x128xbf16>, vector<256x128xf32> -> vector<256x128xf32>
    %26 = arith.addf %19, %25 : vector<256x128xf32>
    %c0_35 = arith.constant 0 : index
    %c2 = arith.constant 2 : index
    %c0_36 = arith.constant 0 : index
    %27 = vector.load %arg9[%c0_35, %c2, %c0_36] : memref<18x18x4xf32, #tpu.memory_space<vmem>>, vector<16x16x4xf32>
    %28 = vector.shape_cast %27 : vector<16x16x4xf32> to vector<256x4xf32>
    %29 = arith.truncf %28 : vector<256x4xf32> to vector<256x4xbf16>
    %c2_37 = arith.constant 2 : index
    %c0_38 = arith.constant 0 : index
    %c0_39 = arith.constant 0 : index
    %30 = vector.load %arg2[%c2_37, %c0_38, %c0_39] : memref<9x4x128xbf16, #tpu.memory_space<vmem>>, vector<1x4x128xbf16>
    %31 = vector.shape_cast %30 : vector<1x4x128xbf16> to vector<4x128xbf16>
    %cst_40 = arith.constant dense<0.000000e+00> : vector<256x128xf32>
    %32 = tpu.matmul %29, %31, %cst_40 {dimension_numbers = #tpu.dot_dimension_numbers<[1], [0], [0], [1], [0, 0, 1, 1], [], []>} : vector<256x4xbf16>, vector<4x128xbf16>, vector<256x128xf32> -> vector<256x128xf32>
    %33 = arith.addf %26, %32 : vector<256x128xf32>
    %c1_41 = arith.constant 1 : index
    %c0_42 = arith.constant 0 : index
    %c0_43 = arith.constant 0 : index
    %34 = vector.load %arg9[%c1_41, %c0_42, %c0_43] : memref<18x18x4xf32, #tpu.memory_space<vmem>>, vector<16x16x4xf32>
    %35 = vector.shape_cast %34 : vector<16x16x4xf32> to vector<256x4xf32>
    %36 = arith.truncf %35 : vector<256x4xf32> to vector<256x4xbf16>
    %c3 = arith.constant 3 : index
    %c0_44 = arith.constant 0 : index
    %c0_45 = arith.constant 0 : index
    %37 = vector.load %arg2[%c3, %c0_44, %c0_45] : memref<9x4x128xbf16, #tpu.memory_space<vmem>>, vector<1x4x128xbf16>
    %38 = vector.shape_cast %37 : vector<1x4x128xbf16> to vector<4x128xbf16>
    %cst_46 = arith.constant dense<0.000000e+00> : vector<256x128xf32>
    %39 = tpu.matmul %36, %38, %cst_46 {dimension_numbers = #tpu.dot_dimension_numbers<[1], [0], [0], [1], [0, 0, 1, 1], [], []>} : vector<256x4xbf16>, vector<4x128xbf16>, vector<256x128xf32> -> vector<256x128xf32>
    %40 = arith.addf %33, %39 : vector<256x128xf32>
    %c1_47 = arith.constant 1 : index
    %c1_48 = arith.constant 1 : index
    %c0_49 = arith.constant 0 : index
    %41 = vector.load %arg9[%c1_47, %c1_48, %c0_49] : memref<18x18x4xf32, #tpu.memory_space<vmem>>, vector<16x16x4xf32>
    %42 = vector.shape_cast %41 : vector<16x16x4xf32> to vector<256x4xf32>
    %43 = arith.truncf %42 : vector<256x4xf32> to vector<256x4xbf16>
    %c4 = arith.constant 4 : index
    %c0_50 = arith.constant 0 : index
    %c0_51 = arith.constant 0 : index
    %44 = vector.load %arg2[%c4, %c0_50, %c0_51] : memref<9x4x128xbf16, #tpu.memory_space<vmem>>, vector<1x4x128xbf16>
    %45 = vector.shape_cast %44 : vector<1x4x128xbf16> to vector<4x128xbf16>
    %cst_52 = arith.constant dense<0.000000e+00> : vector<256x128xf32>
    %46 = tpu.matmul %43, %45, %cst_52 {dimension_numbers = #tpu.dot_dimension_numbers<[1], [0], [0], [1], [0, 0, 1, 1], [], []>} : vector<256x4xbf16>, vector<4x128xbf16>, vector<256x128xf32> -> vector<256x128xf32>
    %47 = arith.addf %40, %46 : vector<256x128xf32>
    %c1_53 = arith.constant 1 : index
    %c2_54 = arith.constant 2 : index
    %c0_55 = arith.constant 0 : index
    %48 = vector.load %arg9[%c1_53, %c2_54, %c0_55] : memref<18x18x4xf32, #tpu.memory_space<vmem>>, vector<16x16x4xf32>
    %49 = vector.shape_cast %48 : vector<16x16x4xf32> to vector<256x4xf32>
    %50 = arith.truncf %49 : vector<256x4xf32> to vector<256x4xbf16>
    %c5 = arith.constant 5 : index
    %c0_56 = arith.constant 0 : index
    %c0_57 = arith.constant 0 : index
    %51 = vector.load %arg2[%c5, %c0_56, %c0_57] : memref<9x4x128xbf16, #tpu.memory_space<vmem>>, vector<1x4x128xbf16>
    %52 = vector.shape_cast %51 : vector<1x4x128xbf16> to vector<4x128xbf16>
    %cst_58 = arith.constant dense<0.000000e+00> : vector<256x128xf32>
    %53 = tpu.matmul %50, %52, %cst_58 {dimension_numbers = #tpu.dot_dimension_numbers<[1], [0], [0], [1], [0, 0, 1, 1], [], []>} : vector<256x4xbf16>, vector<4x128xbf16>, vector<256x128xf32> -> vector<256x128xf32>
    %54 = arith.addf %47, %53 : vector<256x128xf32>
    %c2_59 = arith.constant 2 : index
    %c0_60 = arith.constant 0 : index
    %c0_61 = arith.constant 0 : index
    %55 = vector.load %arg9[%c2_59, %c0_60, %c0_61] : memref<18x18x4xf32, #tpu.memory_space<vmem>>, vector<16x16x4xf32>
    %56 = vector.shape_cast %55 : vector<16x16x4xf32> to vector<256x4xf32>
    %57 = arith.truncf %56 : vector<256x4xf32> to vector<256x4xbf16>
    %c6 = arith.constant 6 : index
    %c0_62 = arith.constant 0 : index
    %c0_63 = arith.constant 0 : index
    %58 = vector.load %arg2[%c6, %c0_62, %c0_63] : memref<9x4x128xbf16, #tpu.memory_space<vmem>>, vector<1x4x128xbf16>
    %59 = vector.shape_cast %58 : vector<1x4x128xbf16> to vector<4x128xbf16>
    %cst_64 = arith.constant dense<0.000000e+00> : vector<256x128xf32>
    %60 = tpu.matmul %57, %59, %cst_64 {dimension_numbers = #tpu.dot_dimension_numbers<[1], [0], [0], [1], [0, 0, 1, 1], [], []>} : vector<256x4xbf16>, vector<4x128xbf16>, vector<256x128xf32> -> vector<256x128xf32>
    %61 = arith.addf %54, %60 : vector<256x128xf32>
    %c2_65 = arith.constant 2 : index
    %c1_66 = arith.constant 1 : index
    %c0_67 = arith.constant 0 : index
    %62 = vector.load %arg9[%c2_65, %c1_66, %c0_67] : memref<18x18x4xf32, #tpu.memory_space<vmem>>, vector<16x16x4xf32>
    %63 = vector.shape_cast %62 : vector<16x16x4xf32> to vector<256x4xf32>
    %64 = arith.truncf %63 : vector<256x4xf32> to vector<256x4xbf16>
    %c7 = arith.constant 7 : index
    %c0_68 = arith.constant 0 : index
    %c0_69 = arith.constant 0 : index
    %65 = vector.load %arg2[%c7, %c0_68, %c0_69] : memref<9x4x128xbf16, #tpu.memory_space<vmem>>, vector<1x4x128xbf16>
    %66 = vector.shape_cast %65 : vector<1x4x128xbf16> to vector<4x128xbf16>
    %cst_70 = arith.constant dense<0.000000e+00> : vector<256x128xf32>
    %67 = tpu.matmul %64, %66, %cst_70 {dimension_numbers = #tpu.dot_dimension_numbers<[1], [0], [0], [1], [0, 0, 1, 1], [], []>} : vector<256x4xbf16>, vector<4x128xbf16>, vector<256x128xf32> -> vector<256x128xf32>
    %68 = arith.addf %61, %67 : vector<256x128xf32>
    %c2_71 = arith.constant 2 : index
    %c2_72 = arith.constant 2 : index
    %c0_73 = arith.constant 0 : index
    %69 = vector.load %arg9[%c2_71, %c2_72, %c0_73] : memref<18x18x4xf32, #tpu.memory_space<vmem>>, vector<16x16x4xf32>
    %70 = vector.shape_cast %69 : vector<16x16x4xf32> to vector<256x4xf32>
    %71 = arith.truncf %70 : vector<256x4xf32> to vector<256x4xbf16>
    %c8 = arith.constant 8 : index
    %c0_74 = arith.constant 0 : index
    %c0_75 = arith.constant 0 : index
    %72 = vector.load %arg2[%c8, %c0_74, %c0_75] : memref<9x4x128xbf16, #tpu.memory_space<vmem>>, vector<1x4x128xbf16>
    %73 = vector.shape_cast %72 : vector<1x4x128xbf16> to vector<4x128xbf16>
    %cst_76 = arith.constant dense<0.000000e+00> : vector<256x128xf32>
    %74 = tpu.matmul %71, %73, %cst_76 {dimension_numbers = #tpu.dot_dimension_numbers<[1], [0], [0], [1], [0, 0, 1, 1], [], []>} : vector<256x4xbf16>, vector<4x128xbf16>, vector<256x128xf32> -> vector<256x128xf32>
    %75 = arith.addf %68, %74 : vector<256x128xf32>
    %cst_77 = arith.constant 0.000000e+00 : f32
    %76 = vector.broadcast %cst_77 : f32 to vector<256x128xf32>
    %77 = arith.maximumf %75, %76 : vector<256x128xf32>
    %cst_78 = arith.constant 0.000000e+00 : f32
    %78 = vector.broadcast %cst_78 : f32 to vector<1x18x8xf32>
    %c0_79 = arith.constant 0 : index
    %c0_80 = arith.constant 0 : index
    %c0_81 = arith.constant 0 : index
    %79 = vector.load %arg10[%c0_79, %c0_80, %c0_81] : memref<18x18x8xf32, #tpu.memory_space<vmem>>, vector<1x18x8xf32>
    tpu.vector_store %arg10[%c0_79, %c0_80, %c0_81], %78 {strides = array<i32>} : memref<18x18x8xf32, #tpu.memory_space<vmem>>, vector<1x18x8xf32>,
    %cst_82 = arith.constant 0.000000e+00 : f32
    %80 = vector.broadcast %cst_82 : f32 to vector<1x18x8xf32>
    %c17_83 = arith.constant 17 : index
    %c0_84 = arith.constant 0 : index
    %c0_85 = arith.constant 0 : index
    %81 = vector.load %arg10[%c17_83, %c0_84, %c0_85] : memref<18x18x8xf32, #tpu.memory_space<vmem>>, vector<1x18x8xf32>
    tpu.vector_store %arg10[%c17_83, %c0_84, %c0_85], %80 {strides = array<i32>} : memref<18x18x8xf32, #tpu.memory_space<vmem>>, vector<1x18x8xf32>,
    %cst_86 = arith.constant 0.000000e+00 : f32
    %82 = vector.broadcast %cst_86 : f32 to vector<16x1x8xf32>
    %c1_87 = arith.constant 1 : index
    %c0_88 = arith.constant 0 : index
    %c0_89 = arith.constant 0 : index
    %83 = vector.load %arg10[%c1_87, %c0_88, %c0_89] : memref<18x18x8xf32, #tpu.memory_space<vmem>>, vector<16x1x8xf32>
    tpu.vector_store %arg10[%c1_87, %c0_88, %c0_89], %82 {strides = array<i32>} : memref<18x18x8xf32, #tpu.memory_space<vmem>>, vector<16x1x8xf32>,
    %cst_90 = arith.constant 0.000000e+00 : f32
    %84 = vector.broadcast %cst_90 : f32 to vector<16x1x8xf32>
    %c1_91 = arith.constant 1 : index
    %c17_92 = arith.constant 17 : index
    %c0_93 = arith.constant 0 : index
    %85 = vector.load %arg10[%c1_91, %c17_92, %c0_93] : memref<18x18x8xf32, #tpu.memory_space<vmem>>, vector<16x1x8xf32>
    tpu.vector_store %arg10[%c1_91, %c17_92, %c0_93], %84 {strides = array<i32>} : memref<18x18x8xf32, #tpu.memory_space<vmem>>, vector<16x1x8xf32>,
    %86 = vector.extract_strided_slice %77 {offsets = [0, 0], sizes = [256, 8], strides = [1, 1]} : vector<256x128xf32> to vector<256x8xf32>
    %87 = vector.shape_cast %86 : vector<256x8xf32> to vector<16x16x8xf32>
    %c1_94 = arith.constant 1 : index
    %c1_95 = arith.constant 1 : index
    %c0_96 = arith.constant 0 : index
    %88 = vector.load %arg10[%c1_94, %c1_95, %c0_96] : memref<18x18x8xf32, #tpu.memory_space<vmem>>, vector<16x16x8xf32>
    tpu.vector_store %arg10[%c1_94, %c1_95, %c0_96], %87 {strides = array<i32>} : memref<18x18x8xf32, #tpu.memory_space<vmem>>, vector<16x16x8xf32>,
    %c0_97 = arith.constant 0 : index
    %c0_98 = arith.constant 0 : index
    %c0_99 = arith.constant 0 : index
    %c0_100 = arith.constant 0 : index
    %89 = vector.load %arg1[%c0_97, %c0_98, %c0_99, %c0_100] : memref<1x16x16x4xf32, #tpu.memory_space<vmem>>, vector<1x16x16x4xf32>
    %90 = vector.shape_cast %89 : vector<1x16x16x4xf32> to vector<16x16x4xf32>
    %91 = vector.shape_cast %90 : vector<16x16x4xf32> to vector<256x4xf32>
    %92 = arith.truncf %91 : vector<256x4xf32> to vector<256x4xbf16>
    %c0_101 = arith.constant 0 : index
    %c0_102 = arith.constant 0 : index
    %93 = vector.load %arg6[%c0_101, %c0_102] : memref<4x128xbf16, #tpu.memory_space<vmem>>, vector<4x128xbf16>
    %cst_103 = arith.constant dense<0.000000e+00> : vector<256x128xf32>
    %94 = tpu.matmul %92, %93, %cst_103 {dimension_numbers = #tpu.dot_dimension_numbers<[1], [0], [0], [1], [0, 0, 1, 1], [], []>} : vector<256x4xbf16>, vector<4x128xbf16>, vector<256x128xf32> -> vector<256x128xf32>
    %c0_104 = arith.constant 0 : index
    %c0_105 = arith.constant 0 : index
    %95 = vector.load %arg7[%c0_104, %c0_105] : memref<1x128xf32, #tpu.memory_space<vmem>>, vector<1x128xf32>
    %96 = vector.broadcast %95 : vector<1x128xf32> to vector<256x128xf32>
    %97 = arith.addf %94, %96 : vector<256x128xf32>
    %c0_106 = arith.constant 0 : index
    %c0_107 = arith.constant 0 : index
    %98 = vector.load %arg5[%c0_106, %c0_107] : memref<1x128xf32, #tpu.memory_space<vmem>>, vector<1x128xf32>
    %c0_108 = arith.constant 0 : index
    %c0_109 = arith.constant 0 : index
    %c0_110 = arith.constant 0 : index
    %99 = vector.load %arg10[%c0_108, %c0_109, %c0_110] : memref<18x18x8xf32, #tpu.memory_space<vmem>>, vector<16x16x8xf32>
    %100 = vector.shape_cast %99 : vector<16x16x8xf32> to vector<256x8xf32>
    %101 = arith.truncf %100 : vector<256x8xf32> to vector<256x8xbf16>
    %c0_111 = arith.constant 0 : index
    %c0_112 = arith.constant 0 : index
    %c0_113 = arith.constant 0 : index
    %102 = vector.load %arg4[%c0_111, %c0_112, %c0_113] : memref<9x8x128xbf16, #tpu.memory_space<vmem>>, vector<1x8x128xbf16>
    %103 = vector.shape_cast %102 : vector<1x8x128xbf16> to vector<8x128xbf16>
    %cst_114 = arith.constant dense<0.000000e+00> : vector<256x128xf32>
    %104 = tpu.matmul %101, %103, %cst_114 {dimension_numbers = #tpu.dot_dimension_numbers<[1], [0], [0], [1], [0, 0, 1, 1], [], []>} : vector<256x8xbf16>, vector<8x128xbf16>, vector<256x128xf32> -> vector<256x128xf32>
    %105 = vector.broadcast %98 : vector<1x128xf32> to vector<256x128xf32>
    %106 = arith.addf %105, %104 : vector<256x128xf32>
    %c0_115 = arith.constant 0 : index
    %c1_116 = arith.constant 1 : index
    %c0_117 = arith.constant 0 : index
    %107 = vector.load %arg10[%c0_115, %c1_116, %c0_117] : memref<18x18x8xf32, #tpu.memory_space<vmem>>, vector<16x16x8xf32>
    %108 = vector.shape_cast %107 : vector<16x16x8xf32> to vector<256x8xf32>
    %109 = arith.truncf %108 : vector<256x8xf32> to vector<256x8xbf16>
    %c1_118 = arith.constant 1 : index
    %c0_119 = arith.constant 0 : index
    %c0_120 = arith.constant 0 : index
    %110 = vector.load %arg4[%c1_118, %c0_119, %c0_120] : memref<9x8x128xbf16, #tpu.memory_space<vmem>>, vector<1x8x128xbf16>
    %111 = vector.shape_cast %110 : vector<1x8x128xbf16> to vector<8x128xbf16>
    %cst_121 = arith.constant dense<0.000000e+00> : vector<256x128xf32>
    %112 = tpu.matmul %109, %111, %cst_121 {dimension_numbers = #tpu.dot_dimension_numbers<[1], [0], [0], [1], [0, 0, 1, 1], [], []>} : vector<256x8xbf16>, vector<8x128xbf16>, vector<256x128xf32> -> vector<256x128xf32>
    %113 = arith.addf %106, %112 : vector<256x128xf32>
    %c0_122 = arith.constant 0 : index
    %c2_123 = arith.constant 2 : index
    %c0_124 = arith.constant 0 : index
    %114 = vector.load %arg10[%c0_122, %c2_123, %c0_124] : memref<18x18x8xf32, #tpu.memory_space<vmem>>, vector<16x16x8xf32>
    %115 = vector.shape_cast %114 : vector<16x16x8xf32> to vector<256x8xf32>
    %116 = arith.truncf %115 : vector<256x8xf32> to vector<256x8xbf16>
    %c2_125 = arith.constant 2 : index
    %c0_126 = arith.constant 0 : index
    %c0_127 = arith.constant 0 : index
    %117 = vector.load %arg4[%c2_125, %c0_126, %c0_127] : memref<9x8x128xbf16, #tpu.memory_space<vmem>>, vector<1x8x128xbf16>
    %118 = vector.shape_cast %117 : vector<1x8x128xbf16> to vector<8x128xbf16>
    %cst_128 = arith.constant dense<0.000000e+00> : vector<256x128xf32>
    %119 = tpu.matmul %116, %118, %cst_128 {dimension_numbers = #tpu.dot_dimension_numbers<[1], [0], [0], [1], [0, 0, 1, 1], [], []>} : vector<256x8xbf16>, vector<8x128xbf16>, vector<256x128xf32> -> vector<256x128xf32>
    %120 = arith.addf %113, %119 : vector<256x128xf32>
    %c1_129 = arith.constant 1 : index
    %c0_130 = arith.constant 0 : index
    %c0_131 = arith.constant 0 : index
    %121 = vector.load %arg10[%c1_129, %c0_130, %c0_131] : memref<18x18x8xf32, #tpu.memory_space<vmem>>, vector<16x16x8xf32>
    %122 = vector.shape_cast %121 : vector<16x16x8xf32> to vector<256x8xf32>
    %123 = arith.truncf %122 : vector<256x8xf32> to vector<256x8xbf16>
    %c3_132 = arith.constant 3 : index
    %c0_133 = arith.constant 0 : index
    %c0_134 = arith.constant 0 : index
    %124 = vector.load %arg4[%c3_132, %c0_133, %c0_134] : memref<9x8x128xbf16, #tpu.memory_space<vmem>>, vector<1x8x128xbf16>
    %125 = vector.shape_cast %124 : vector<1x8x128xbf16> to vector<8x128xbf16>
    %cst_135 = arith.constant dense<0.000000e+00> : vector<256x128xf32>
    %126 = tpu.matmul %123, %125, %cst_135 {dimension_numbers = #tpu.dot_dimension_numbers<[1], [0], [0], [1], [0, 0, 1, 1], [], []>} : vector<256x8xbf16>, vector<8x128xbf16>, vector<256x128xf32> -> vector<256x128xf32>
    %127 = arith.addf %120, %126 : vector<256x128xf32>
    %c1_136 = arith.constant 1 : index
    %c1_137 = arith.constant 1 : index
    %c0_138 = arith.constant 0 : index
    %128 = vector.load %arg10[%c1_136, %c1_137, %c0_138] : memref<18x18x8xf32, #tpu.memory_space<vmem>>, vector<16x16x8xf32>
    %129 = vector.shape_cast %128 : vector<16x16x8xf32> to vector<256x8xf32>
    %130 = arith.truncf %129 : vector<256x8xf32> to vector<256x8xbf16>
    %c4_139 = arith.constant 4 : index
    %c0_140 = arith.constant 0 : index
    %c0_141 = arith.constant 0 : index
    %131 = vector.load %arg4[%c4_139, %c0_140, %c0_141] : memref<9x8x128xbf16, #tpu.memory_space<vmem>>, vector<1x8x128xbf16>
    %132 = vector.shape_cast %131 : vector<1x8x128xbf16> to vector<8x128xbf16>
    %cst_142 = arith.constant dense<0.000000e+00> : vector<256x128xf32>
    %133 = tpu.matmul %130, %132, %cst_142 {dimension_numbers = #tpu.dot_dimension_numbers<[1], [0], [0], [1], [0, 0, 1, 1], [], []>} : vector<256x8xbf16>, vector<8x128xbf16>, vector<256x128xf32> -> vector<256x128xf32>
    %134 = arith.addf %127, %133 : vector<256x128xf32>
    %c1_143 = arith.constant 1 : index
    %c2_144 = arith.constant 2 : index
    %c0_145 = arith.constant 0 : index
    %135 = vector.load %arg10[%c1_143, %c2_144, %c0_145] : memref<18x18x8xf32, #tpu.memory_space<vmem>>, vector<16x16x8xf32>
    %136 = vector.shape_cast %135 : vector<16x16x8xf32> to vector<256x8xf32>
    %137 = arith.truncf %136 : vector<256x8xf32> to vector<256x8xbf16>
    %c5_146 = arith.constant 5 : index
    %c0_147 = arith.constant 0 : index
    %c0_148 = arith.constant 0 : index
    %138 = vector.load %arg4[%c5_146, %c0_147, %c0_148] : memref<9x8x128xbf16, #tpu.memory_space<vmem>>, vector<1x8x128xbf16>
    %139 = vector.shape_cast %138 : vector<1x8x128xbf16> to vector<8x128xbf16>
    %cst_149 = arith.constant dense<0.000000e+00> : vector<256x128xf32>
    %140 = tpu.matmul %137, %139, %cst_149 {dimension_numbers = #tpu.dot_dimension_numbers<[1], [0], [0], [1], [0, 0, 1, 1], [], []>} : vector<256x8xbf16>, vector<8x128xbf16>, vector<256x128xf32> -> vector<256x128xf32>
    %141 = arith.addf %134, %140 : vector<256x128xf32>
    %c2_150 = arith.constant 2 : index
    %c0_151 = arith.constant 0 : index
    %c0_152 = arith.constant 0 : index
    %142 = vector.load %arg10[%c2_150, %c0_151, %c0_152] : memref<18x18x8xf32, #tpu.memory_space<vmem>>, vector<16x16x8xf32>
    %143 = vector.shape_cast %142 : vector<16x16x8xf32> to vector<256x8xf32>
    %144 = arith.truncf %143 : vector<256x8xf32> to vector<256x8xbf16>
    %c6_153 = arith.constant 6 : index
    %c0_154 = arith.constant 0 : index
    %c0_155 = arith.constant 0 : index
    %145 = vector.load %arg4[%c6_153, %c0_154, %c0_155] : memref<9x8x128xbf16, #tpu.memory_space<vmem>>, vector<1x8x128xbf16>
    %146 = vector.shape_cast %145 : vector<1x8x128xbf16> to vector<8x128xbf16>
    %cst_156 = arith.constant dense<0.000000e+00> : vector<256x128xf32>
    %147 = tpu.matmul %144, %146, %cst_156 {dimension_numbers = #tpu.dot_dimension_numbers<[1], [0], [0], [1], [0, 0, 1, 1], [], []>} : vector<256x8xbf16>, vector<8x128xbf16>, vector<256x128xf32> -> vector<256x128xf32>
    %148 = arith.addf %141, %147 : vector<256x128xf32>
    %c2_157 = arith.constant 2 : index
    %c1_158 = arith.constant 1 : index
    %c0_159 = arith.constant 0 : index
    %149 = vector.load %arg10[%c2_157, %c1_158, %c0_159] : memref<18x18x8xf32, #tpu.memory_space<vmem>>, vector<16x16x8xf32>
    %150 = vector.shape_cast %149 : vector<16x16x8xf32> to vector<256x8xf32>
    %151 = arith.truncf %150 : vector<256x8xf32> to vector<256x8xbf16>
    %c7_160 = arith.constant 7 : index
    %c0_161 = arith.constant 0 : index
    %c0_162 = arith.constant 0 : index
    %152 = vector.load %arg4[%c7_160, %c0_161, %c0_162] : memref<9x8x128xbf16, #tpu.memory_space<vmem>>, vector<1x8x128xbf16>
    %153 = vector.shape_cast %152 : vector<1x8x128xbf16> to vector<8x128xbf16>
    %cst_163 = arith.constant dense<0.000000e+00> : vector<256x128xf32>
    %154 = tpu.matmul %151, %153, %cst_163 {dimension_numbers = #tpu.dot_dimension_numbers<[1], [0], [0], [1], [0, 0, 1, 1], [], []>} : vector<256x8xbf16>, vector<8x128xbf16>, vector<256x128xf32> -> vector<256x128xf32>
    %155 = arith.addf %148, %154 : vector<256x128xf32>
    %c2_164 = arith.constant 2 : index
    %c2_165 = arith.constant 2 : index
    %c0_166 = arith.constant 0 : index
    %156 = vector.load %arg10[%c2_164, %c2_165, %c0_166] : memref<18x18x8xf32, #tpu.memory_space<vmem>>, vector<16x16x8xf32>
    %157 = vector.shape_cast %156 : vector<16x16x8xf32> to vector<256x8xf32>
    %158 = arith.truncf %157 : vector<256x8xf32> to vector<256x8xbf16>
    %c8_167 = arith.constant 8 : index
    %c0_168 = arith.constant 0 : index
    %c0_169 = arith.constant 0 : index
    %159 = vector.load %arg4[%c8_167, %c0_168, %c0_169] : memref<9x8x128xbf16, #tpu.memory_space<vmem>>, vector<1x8x128xbf16>
    %160 = vector.shape_cast %159 : vector<1x8x128xbf16> to vector<8x128xbf16>
    %cst_170 = arith.constant dense<0.000000e+00> : vector<256x128xf32>
    %161 = tpu.matmul %158, %160, %cst_170 {dimension_numbers = #tpu.dot_dimension_numbers<[1], [0], [0], [1], [0, 0, 1, 1], [], []>} : vector<256x8xbf16>, vector<8x128xbf16>, vector<256x128xf32> -> vector<256x128xf32>
    %162 = arith.addf %155, %161 : vector<256x128xf32>
    %163 = arith.addf %162, %97 : vector<256x128xf32>
    %cst_171 = arith.constant 0.000000e+00 : f32
    %164 = vector.broadcast %cst_171 : f32 to vector<256x128xf32>
    %165 = arith.maximumf %163, %164 : vector<256x128xf32>
    %166 = vector.shape_cast %165 : vector<256x128xf32> to vector<16x16x128xf32>
    %c0_172 = arith.constant 0 : index
    %c0_173 = arith.constant 0 : index
    %c0_174 = arith.constant 0 : index
    %c0_175 = arith.constant 0 : index
    %167 = vector.load %arg8[%c0_172, %c0_173, %c0_174, %c0_175] : memref<1x16x16x128xf32, #tpu.memory_space<vmem>>, vector<1x16x16x128xf32>
    %168 = vector.shape_cast %167 : vector<1x16x16x128xf32> to vector<16x16x128xf32>
    %169 = vector.shape_cast %166 : vector<16x16x128xf32> to vector<1x16x16x128xf32>
    tpu.vector_store %arg8[%c0_172, %c0_173, %c0_174, %c0_175], %169 {strides = array<i32>} : memref<1x16x16x128xf32, #tpu.memory_space<vmem>>, vector<1x16x16x128xf32>,
    return
  }
  func.func @transform_0(%arg0: i32) -> (i32, i32, i32, i32) {
    %c0_i32 = arith.constant 0 : i32
    %c0_i32_0 = arith.constant 0 : i32
    %c0_i32_1 = arith.constant 0 : i32
    %c0_i32_2 = arith.constant 0 : i32
    return %arg0, %c0_i32, %c0_i32_0, %c0_i32_1 : i32, i32, i32, i32
  }
  func.func @transform_1(%arg0: i32) -> (i32, i32, i32) {
    %c0_i32 = arith.constant 0 : i32
    %c0_i32_0 = arith.constant 0 : i32
    %c0_i32_1 = arith.constant 0 : i32
    %c0_i32_2 = arith.constant 0 : i32
    return %c0_i32, %c0_i32_0, %c0_i32_1 : i32, i32, i32
  }
  func.func @transform_2(%arg0: i32) -> (i32, i32) {
    %c0_i32 = arith.constant 0 : i32
    %c0_i32_0 = arith.constant 0 : i32
    %c0_i32_1 = arith.constant 0 : i32
    return %c0_i32, %c0_i32_0 : i32, i32
  }
  func.func @transform_3(%arg0: i32) -> (i32, i32, i32) {
    %c0_i32 = arith.constant 0 : i32
    %c0_i32_0 = arith.constant 0 : i32
    %c0_i32_1 = arith.constant 0 : i32
    %c0_i32_2 = arith.constant 0 : i32
    return %c0_i32, %c0_i32_0, %c0_i32_1 : i32, i32, i32
  }
  func.func @transform_4(%arg0: i32) -> (i32, i32) {
    %c0_i32 = arith.constant 0 : i32
    %c0_i32_0 = arith.constant 0 : i32
    %c0_i32_1 = arith.constant 0 : i32
    return %c0_i32, %c0_i32_0 : i32, i32
  }
  func.func @transform_5(%arg0: i32) -> (i32, i32) {
    %c0_i32 = arith.constant 0 : i32
    %c0_i32_0 = arith.constant 0 : i32
    %c0_i32_1 = arith.constant 0 : i32
    return %c0_i32, %c0_i32_0 : i32, i32
  }
  func.func @transform_6(%arg0: i32) -> (i32, i32) {
    %c0_i32 = arith.constant 0 : i32
    %c0_i32_0 = arith.constant 0 : i32
    %c0_i32_1 = arith.constant 0 : i32
    return %c0_i32, %c0_i32_0 : i32, i32
  }
  func.func @transform_7(%arg0: i32) -> (i32, i32, i32, i32) {
    %c0_i32 = arith.constant 0 : i32
    %c0_i32_0 = arith.constant 0 : i32
    %c0_i32_1 = arith.constant 0 : i32
    %c0_i32_2 = arith.constant 0 : i32
    return %arg0, %c0_i32, %c0_i32_0, %c0_i32_1 : i32, i32, i32, i32
  }
}

</mosaic_0001>

<bundles_post_ra>
// kernel: residual_block_forward.1
= control target key start
LH: loop header
LB: loop body
LE: loop exit
PB: predicated region body
PF: predicated region fallthrough
CT: control target
= control target key end

     0   :  { %s7606_s24 = smov 0   ;;  %s10025_s0 = inlined_call_operand.vmem [shape: f32[2,16,16,4], index: 0, kind: input, shape index: {}]   ;;  %s10026_s1 = inlined_call_operand.vmem [shape: bf16[9,4,128], index: 1, kind: input, shape index: {}]   ;;  %s10027_s2 = inlined_call_operand.vmem [shape: f32[1,128], index: 2, kind: input, shape index: {}]   ;;  %s10028_s3 = inlined_call_operand.vmem [shape: bf16[9,8,128], index: 3, kind: input, shape index: {}]   ;;  %s10029_s4 = inlined_call_operand.vmem [shape: f32[1,128], index: 4, kind: input, shape index: {}]   ;;  %s10030_s5 = inlined_call_operand.vmem [shape: bf16[4,128], index: 5, kind: input, shape index: {}]   ;;  %s10031_s6 = inlined_call_operand.vmem [shape: f32[1,128], index: 6, kind: input, shape index: {}]   ;;  %s10032_s7 = inlined_call_operand.vmem [shape: f32[2,16,16,128], index: 7, kind: output, shape index: {}]  }
   0x1 LB: > { %s6221_s25 = sadd.s32 4294967295, %s7563_s24   ;;  %p6225_p0 = scmp.ge.s32.totalorder %s7563_s24, 1  ;;  %s7563_s24 = sphi %s7606_s24, %s17_s24  }
   0x2   : > { %p237_p1 = scmp.lt.s32.totalorder %s7563_s24, 3 }
   0x4   : > { %p238_p2 = pnand %p6225_p0, %p237_p1 }
   0x6   : > { %241 = sbr.rel (%p238_p2) target bundleno = 1000 (0x3e8), region = 48 }
   0xb   : > { %v436_v0 = vld [vmem:[%s10026_s1] sm:$0x3]  ;;  %vm485_vm0 = vcmask 1041408   ;;  %vm280_vm1 = vcmask 31744   ;;  %p7617_p3 = scmp.lt.s32.totalorder %s6221_s25, 1  ;;  %v10033_v2 = vmov 0.0  }
   0xc   : > { %7528 = vmatprep.subr.msk.bf16.mxu0 %vm485_vm0, %v436_v0  ;;  %7529 = vmatprep.subr.msk.bf16.mxu1 %vm485_vm0, %v436_v0  ;;  %v487_v1 = vsel %vm485_vm0, %v436_v0, 0  ;;  %281 = vst.msk [vmem:[#allocation2] sm:$0xff] %vm280_vm1, %v10033_v2  ;;  %282 = vst.msk [vmem:[#allocation2 + $0x8] sm:$0xff] %vm280_vm1, %v10033_v2  ;;  %vm290_vm2 = vcmask 24576   ;;  %v7635_v3 = vld [vmem:[%s10026_s1 + $0x2] sm:$0x3] }
   0xd   : > { %286 = vst.msk [vmem:[#allocation2 + $0x198] sm:$0xff] %vm280_vm1, %v10033_v2  ;;  %287 = vst.msk [vmem:[#allocation2 + $0x1a0] sm:$0xff] %vm280_vm1, %v10033_v2  ;;  %v7640_v4 = vld [vmem:[%s10026_s1 + $0x4] sm:$0x3]  ;;  %6881 = vmatpush3.bf16.msra.mxu0 %v487_v1  ;;  %7527 = vmatpush3.bf16.msra.mxu1 %v487_v1  ;;  %s10342_s25 = smov (!%p7617_p3, %s6221_s25), 1  ;;  %vm283_vm3 = vcmask 25600  }
   0xe   : > { %291 = vst.msk [vmem:[#allocation2 + $0x18] sm:$0x1] %vm290_vm2, %v10033_v2  ;;  %292 = vst.msk [vmem:[#allocation2 + $0x30] sm:$0x1] %vm290_vm2, %v10033_v2  ;;  %7530 = vmatprep.subr.msk.bf16.mxu1 %vm485_vm0, %v7635_v3  ;;  %7531 = vmatprep.subr.msk.bf16.mxu0 %vm485_vm0, %v7640_v4  ;;  %s6555_s10 = sshll.u32 %s10342_s25, 8  ;;  %v1081_v38 = vsel %vm485_vm0, %v7640_v4, 0 }
   0xf   : > { %293 = vst.msk [vmem:[#allocation2 + $0x48] sm:$0x1] %vm290_vm2, %v10033_v2  ;;  %294 = vst.msk [vmem:[#allocation2 + $0x60] sm:$0x1] %vm290_vm2, %v10033_v2  ;;  %s7722_s13 = scalar_lea.vmem %s10025_s0, %s6555_s10  ;;  %v7772_v33 = vld [vmem:[%s10026_s1 + $0x8] sm:$0x3]  ;;  %s9818_s15 = scalar_lea.vmem %s10032_s7, %s6555_s10 }
  0x10   : > { %295 = vst.msk [vmem:[#allocation2 + $0x78] sm:$0x1] %vm290_vm2, %v10033_v2  ;;  %296 = vst.msk [vmem:[#allocation2 + $0x90] sm:$0x1] %vm290_vm2, %v10033_v2  ;;  %v323_v5 = vld [vmem:[%s7722_s13] sm:$0xff]  ;;  %v324_v6 = vld [vmem:[%s7722_s13 + $0x8] sm:$0xff] }
  0x11   : > { %297 = vst.msk [vmem:[#allocation2 + $0xa8] sm:$0x1] %vm290_vm2, %v10033_v2  ;;  %298 = vst.msk [vmem:[#allocation2 + $0xc0] sm:$0x1] %vm290_vm2, %v10033_v2  ;;  %v337_v7 = vld [vmem:[%s7722_s13 + $0x70] sm:$0xff]  ;;  %v338_v8 = vld [vmem:[%s7722_s13 + $0x78] sm:$0xff] }
  0x12   : > { %299 = vst.msk [vmem:[#allocation2 + $0xd8] sm:$0x1] %vm290_vm2, %v10033_v2  ;;  %300 = vst.msk [vmem:[#allocation2 + $0xf0] sm:$0x1] %vm290_vm2, %v10033_v2  ;;  %v339_v9 = vld [vmem:[%s7722_s13 + $0x80] sm:$0xff]  ;;  %v340_v10 = vld [vmem:[%s7722_s13 + $0x88] sm:$0xff] }
  0x13   : > { %301 = vst.msk [vmem:[#allocation2 + $0x108] sm:$0x1] %vm290_vm2, %v10033_v2  ;;  %302 = vst.msk [vmem:[#allocation2 + $0x120] sm:$0x1] %vm290_vm2, %v10033_v2  ;;  %v388_v11 = vld [vmem:[#allocation2] sm:$0xff]  ;;  %v389_v12 = vld [vmem:[#allocation2 + $0x8] sm:$0xff] }
  0x14   : > { %303 = vst.msk [vmem:[#allocation2 + $0x138] sm:$0x1] %vm290_vm2, %v10033_v2  ;;  %304 = vst.msk [vmem:[#allocation2 + $0x150] sm:$0x1] %vm290_vm2, %v10033_v2  ;;  %v325_v13 = vld [vmem:[%s7722_s13 + $0x10] sm:$0xff]  ;;  %v420_v14 = vpack.c.bf16 %v389_v12, %v388_v11  ;;  %v326_v15 = vld [vmem:[%s7722_s13 + $0x18] sm:$0xff] }
  0x15   : > { %305 = vst.msk [vmem:[#allocation2 + $0x168] sm:$0x1] %vm290_vm2, %v10033_v2  ;;  %306 = vst.msk [vmem:[#allocation2 + $0x180] sm:$0x1] %vm290_vm2, %v10033_v2  ;;  %v327_v16 = vld [vmem:[%s7722_s13 + $0x20] sm:$0xff]  ;;  %v328_v17 = vld [vmem:[%s7722_s13 + $0x28] sm:$0xff] }
  0x16   : > { %307 = vst.msk [vmem:[#allocation2 + $0x29] sm:$0x1] %vm290_vm2, %v10033_v2  ;;  %308 = vst.msk [vmem:[#allocation2 + $0x41] sm:$0x1] %vm290_vm2, %v10033_v2  ;;  %v341_v18 = vld [vmem:[%s7722_s13 + $0x90] sm:$0xff]  ;;  %v342_v19 = vld [vmem:[%s7722_s13 + $0x98] sm:$0xff]  ;;  %6882 = vmatprep.mubr.msk.bf16.mxu0 %vm280_vm1, %v420_v14 }
  0x17   : > { %309 = vst.msk [vmem:[#allocation2 + $0x59] sm:$0x1] %vm290_vm2, %v10033_v2  ;;  %310 = vst.msk [vmem:[#allocation2 + $0x71] sm:$0x1] %vm290_vm2, %v10033_v2  ;;  %v343_v20 = vld [vmem:[%s7722_s13 + $0xa0] sm:$0xff]  ;;  %v344_v21 = vld [vmem:[%s7722_s13 + $0xa8] sm:$0xff] }
  0x18   : > { %311 = vst.msk [vmem:[#allocation2 + $0x89] sm:$0x1] %vm290_vm2, %v10033_v2  ;;  %312 = vst.msk [vmem:[#allocation2 + $0xa1] sm:$0x1] %vm290_vm2, %v10033_v2  ;;  %v329_v22 = vld [vmem:[%s7722_s13 + $0x30] sm:$0xff]  ;;  %v330_v23 = vld [vmem:[%s7722_s13 + $0x38] sm:$0xff] }
  0x19   : > { %313 = vst.msk [vmem:[#allocation2 + $0xb9] sm:$0x1] %vm290_vm2, %v10033_v2  ;;  %314 = vst.msk [vmem:[#allocation2 + $0xd1] sm:$0x1] %vm290_vm2, %v10033_v2  ;;  %v331_v24 = vld [vmem:[%s7722_s13 + $0x40] sm:$0xff]  ;;  %v332_v25 = vld [vmem:[%s7722_s13 + $0x48] sm:$0xff] }
  0x1a   : > { %315 = vst.msk [vmem:[#allocation2 + $0xe9] sm:$0x1] %vm290_vm2, %v10033_v2  ;;  %316 = vst.msk [vmem:[#allocation2 + $0x101] sm:$0x1] %vm290_vm2, %v10033_v2  ;;  %v345_v26 = vld [vmem:[%s7722_s13 + $0xb0] sm:$0xff]  ;;  %v346_v27 = vld [vmem:[%s7722_s13 + $0xb8] sm:$0xff] }
  0x1b   : > { %317 = vst.msk [vmem:[#allocation2 + $0x119] sm:$0x1] %vm290_vm2, %v10033_v2  ;;  %318 = vst.msk [vmem:[#allocation2 + $0x131] sm:$0x1] %vm290_vm2, %v10033_v2  ;;  %v347_v28 = vld [vmem:[%s7722_s13 + $0xc0] sm:$0xff]  ;;  %v348_v29 = vld [vmem:[%s7722_s13 + $0xc8] sm:$0xff] }
  0x1c   : > { %319 = vst.msk [vmem:[#allocation2 + $0x149] sm:$0x1] %vm290_vm2, %v10033_v2  ;;  %320 = vst.msk [vmem:[#allocation2 + $0x161] sm:$0x1] %vm290_vm2, %v10033_v2  ;;  %v333_v42 = vld [vmem:[%s7722_s13 + $0x50] sm:$0xff]  ;;  %v334_v43 = vld [vmem:[%s7722_s13 + $0x58] sm:$0xff] }
  0x1d   : > { %321 = vst.msk [vmem:[#allocation2 + $0x179] sm:$0x1] %vm290_vm2, %v10033_v2  ;;  %322 = vst.msk [vmem:[#allocation2 + $0x191] sm:$0x1] %vm290_vm2, %v10033_v2  ;;  %v787_v44 = vsel %vm485_vm0, %v7635_v3, 0  ;;  %v335_v61 = vld [vmem:[%s7722_s13 + $0x60] sm:$0xff] }
  0x1e   : > { %284 = vst.msk [vmem:[#allocation2 + $0x10] sm:$0x3] %vm283_vm3, %v10033_v2  ;;  %288 = vst.msk [vmem:[#allocation2 + $0x1a8] sm:$0x3] %vm283_vm3, %v10033_v2  ;;  %v7793_v47 = vld [vmem:[%s10026_s1 + $0x6] sm:$0x3] }
  0x1f   : > { %355 = vst.msk [vmem:[#allocation2 + $0x19] sm:$0xff] %vm280_vm1, %v323_v5  ;;  %356 = vst.msk [vmem:[#allocation2 + $0x21] sm:$0xff] %vm280_vm1, %v324_v6  ;;  %v336_v62 = vld [vmem:[%s7722_s13 + $0x68] sm:$0xff]  ;;  %v349_v63 = vld [vmem:[%s7722_s13 + $0xd0] sm:$0xff]  ;;  %vm3514_vm4 = vcmask 1043456   ;;  %vm3073_vm5 = vcmask 64512  }
  0x20   : > { %369 = vst.msk [vmem:[#allocation2 + $0xc1] sm:$0xff] %vm280_vm1, %v337_v7  ;;  %370 = vst.msk [vmem:[#allocation2 + $0xc9] sm:$0xff] %vm280_vm1, %v338_v8  ;;  %v350_v1 = vld [vmem:[%s7722_s13 + $0xd8] sm:$0xff]  ;;  %v351_v3 = vld [vmem:[%s7722_s13 + $0xe0] sm:$0xff]  ;;  %vm3083_vm6 = vcmask 57344   ;;  %vm3076_vm7 = vcmask 58368  }
  0x21   : > { %371 = vst.msk [vmem:[#allocation2 + $0xd9] sm:$0xff] %vm280_vm1, %v339_v9  ;;  %372 = vst.msk [vmem:[#allocation2 + $0xe1] sm:$0xff] %vm280_vm1, %v340_v10  ;;  %v352_v4 = vld [vmem:[%s7722_s13 + $0xe8] sm:$0xff] }
  0x22   : > { %357 = vst.msk [vmem:[#allocation2 + $0x31] sm:$0xff] %vm280_vm1, %v325_v13  ;;  %358 = vst.msk [vmem:[#allocation2 + $0x39] sm:$0xff] %vm280_vm1, %v326_v15 }
  0x23   : > { %359 = vst.msk [vmem:[#allocation2 + $0x49] sm:$0xff] %vm280_vm1, %v327_v16  ;;  %360 = vst.msk [vmem:[#allocation2 + $0x51] sm:$0xff] %vm280_vm1, %v328_v17 }
  0x24   : > { %373 = vst.msk [vmem:[#allocation2 + $0xf1] sm:$0xff] %vm280_vm1, %v341_v18  ;;  %374 = vst.msk [vmem:[#allocation2 + $0xf9] sm:$0xff] %vm280_vm1, %v342_v19 }
  0x25   : > { %375 = vst.msk [vmem:[#allocation2 + $0x109] sm:$0xff] %vm280_vm1, %v343_v20  ;;  %376 = vst.msk [vmem:[#allocation2 + $0x111] sm:$0xff] %vm280_vm1, %v344_v21  ;;  %v982_v20 = vld [vmem:[#allocation2 + $0x2] sm:$0xff]  ;;  %v983_v21 = vld [vmem:[#allocation2 + $0xa] sm:$0xff] }
  0x26   : > { %361 = vst.msk [vmem:[#allocation2 + $0x61] sm:$0xff] %vm280_vm1, %v329_v22  ;;  %362 = vst.msk [vmem:[#allocation2 + $0x69] sm:$0xff] %vm280_vm1, %v330_v23  ;;  %v390_v30 = vld [vmem:[#allocation2 + $0x18] sm:$0xff]  ;;  %v391_v31 = vld [vmem:[#allocation2 + $0x20] sm:$0xff] }
  0x27   : > { %363 = vst.msk [vmem:[#allocation2 + $0x79] sm:$0xff] %vm280_vm1, %v331_v24  ;;  %364 = vst.msk [vmem:[#allocation2 + $0x81] sm:$0xff] %vm280_vm1, %v332_v25  ;;  %v404_v32 = vld [vmem:[#allocation2 + $0xc0] sm:$0xff]  ;;  %v7774_v34 = vpack.c.bf16 %v391_v31, %v390_v30  ;;  %v405_v35 = vld [vmem:[#allocation2 + $0xc8] sm:$0xff] }
  0x28   : > { %377 = vst.msk [vmem:[#allocation2 + $0x121] sm:$0xff] %vm280_vm1, %v345_v26  ;;  %378 = vst.msk [vmem:[#allocation2 + $0x129] sm:$0xff] %vm280_vm1, %v346_v27  ;;  %v406_v36 = vld [vmem:[#allocation2 + $0xd8] sm:$0xff]  ;;  %v407_v37 = vld [vmem:[#allocation2 + $0xe0] sm:$0xff]  ;;  %v7778_v39 = vpack.c.bf16 %v405_v35, %v404_v32  ;;  %v1014_v27 = vpack.c.bf16 %v983_v21, %v982_v20 }
  0x29   : > { %379 = vst.msk [vmem:[#allocation2 + $0x139] sm:$0xff] %vm280_vm1, %v347_v28  ;;  %380 = vst.msk [vmem:[#allocation2 + $0x141] sm:$0xff] %vm280_vm1, %v348_v29  ;;  %v7780_v40 = vpack.c.bf16 %v407_v37, %v406_v36  ;;  %v392_v41 = vld [vmem:[#allocation2 + $0x30] sm:$0xff]  ;;  %6883 = vmatmul.mubr.msk.bf16.vlgmr.msra.gmra.mxu0 %vm280_vm1, %v7774_v34  ;;  %v393_v45 = vld [vmem:[#allocation2 + $0x38] sm:$0xff] }
  0x2a   : > { %v394_v46 = vld [vmem:[#allocation2 + $0x48] sm:$0xff]  ;;  %365 = vst.msk [vmem:[#allocation2 + $0x91] sm:$0xff] %vm280_vm1, %v333_v42  ;;  %366 = vst.msk [vmem:[#allocation2 + $0x99] sm:$0xff] %vm280_vm1, %v334_v43  ;;  %6898 = vmatprep.mubr.msk.bf16.mxu1 %vm280_vm1, %v7778_v39  ;;  %6949 = vmatpush3.bf16.msra.mxu0 %v1081_v38  ;;  %v7797_v48 = vpack.c.bf16 %v393_v45, %v392_v41  ;;  %v395_v49 = vld [vmem:[#allocation2 + $0x50] sm:$0xff]  ;;  %v1669_v45 = vsel %vm485_vm0, %v7772_v33, 0 }
  0x2b   : > { %v408_v50 = vld [vmem:[#allocation2 + $0xf0] sm:$0xff]  ;;  %v409_v51 = vld [vmem:[#allocation2 + $0xf8] sm:$0xff]  ;;  %6899 = vmatmul.mubr.msk.bf16.vlgmr.msra.gmra.mxu1 %vm280_vm1, %v7780_v40  ;;  %7533 = vmatprep.subr.msk.bf16.mxu0 %vm485_vm0, %v7772_v33  ;;  %v7807_v57 = vpack.c.bf16 %v395_v49, %v394_v46  ;;  %367 = vst.msk [vmem:[#allocation2 + $0xa9] sm:$0xff] %vm280_vm1, %v335_v61  ;;  %368 = vst.msk [vmem:[#allocation2 + $0xb1] sm:$0xff] %vm280_vm1, %v336_v62 }
  0x2c   : > { %v7801_v52 = vpack.c.bf16 %v409_v51, %v408_v50  ;;  %6915 = vmatpush3.bf16.msra.mxu1 %v787_v44  ;;  %6886 = vmatprep.mubr.msk.bf16.mxu0 %vm280_vm1, %v7797_v48  ;;  %v410_v55 = vld [vmem:[#allocation2 + $0x108] sm:$0xff]  ;;  %v411_v56 = vld [vmem:[#allocation2 + $0x110] sm:$0xff]  ;;  %381 = vst.msk [vmem:[#allocation2 + $0x151] sm:$0xff] %vm280_vm1, %v349_v63  ;;  %382 = vst.msk [vmem:[#allocation2 + $0x159] sm:$0xff] %vm280_vm1, %v350_v1 }
  0x2d   : > { %v396_v53 = vld [vmem:[#allocation2 + $0x60] sm:$0xff]  ;;  %v397_v54 = vld [vmem:[#allocation2 + $0x68] sm:$0xff]  ;;  %7532 = vmatprep.subr.msk.bf16.mxu1 %vm485_vm0, %v7793_v47  ;;  %v7818_v0 = vpack.c.bf16 %v411_v56, %v410_v55  ;;  %383 = vst.msk [vmem:[#allocation2 + $0x169] sm:$0xff] %vm280_vm1, %v351_v3  ;;  %384 = vst.msk [vmem:[#allocation2 + $0x171] sm:$0xff] %vm280_vm1, %v352_v4 }
  0x2e   : > { %6902 = vmatprep.mubr.msk.bf16.mxu1 %vm280_vm1, %v7801_v52  ;;  %v7813_v60 = vpack.c.bf16 %v397_v54, %v396_v53  ;;  %v398_v6 = vld [vmem:[#allocation2 + $0x78] sm:$0xff]  ;;  %v399_v7 = vld [vmem:[#allocation2 + $0x80] sm:$0xff]  ;;  %v689_v26 = vld [vmem:[#allocation2 + $0x9] sm:$0xff]  ;;  %v1375_v53 = vsel %vm485_vm0, %v7793_v47, 0 }
  0x2f   : > { %v412_v58 = vld [vmem:[#allocation2 + $0x120] sm:$0xff]  ;;  %v413_v59 = vld [vmem:[#allocation2 + $0x128] sm:$0xff]  ;;  %v7839_v12 = vpack.c.bf16 %v399_v7, %v398_v6  ;;  %v986_v32 = vld [vmem:[#allocation2 + $0x32] sm:$0xff] }
  0x30   : > { %v7826_v5 = vpack.c.bf16 %v413_v59, %v412_v58  ;;  %v414_v10 = vld [vmem:[#allocation2 + $0x138] sm:$0xff]  ;;  %v415_v11 = vld [vmem:[#allocation2 + $0x140] sm:$0xff]  ;;  %v7878_v49 = vld [vmem:[%s10026_s1 + $0xc] sm:$0x3] }
  0x31   : > { %6887 = vmatmul.mubr.msk.bf16.gmra.mxu0 %vm280_vm1, %v7807_v57  ;;  %v400_v8 = vld [vmem:[#allocation2 + $0x90] sm:$0xff]  ;;  %v401_v9 = vld [vmem:[#allocation2 + $0x98] sm:$0xff]  ;;  %v7843_v15 = vpack.c.bf16 %v415_v11, %v414_v10  ;;  %v688_v25 = vld [vmem:[#allocation2 + $0x1] sm:$0xff] }
  0x32   : > { %6890 = vmatprep.mubr.msk.bf16.mxu0 %vm280_vm1, %v7813_v60  ;;  %v7841_v13 = vpack.c.bf16 %v401_v9, %v400_v8  ;;  %v402_v18 = vld [vmem:[#allocation2 + $0xa8] sm:$0xff]  ;;  %v403_v19 = vld [vmem:[#allocation2 + $0xb0] sm:$0xff]  ;;  %v720_v29 = vpack.c.bf16 %v689_v26, %v688_v25  ;;  %v984_v30 = vld [vmem:[#allocation2 + $0x1a] sm:$0xff] }
  0x33   : > { %6903 = vmatmul.mubr.msk.bf16.gmra.mxu1 %vm280_vm1, %v7818_v0  ;;  %v416_v14 = vld [vmem:[#allocation2 + $0x150] sm:$0xff]  ;;  %v417_v16 = vld [vmem:[#allocation2 + $0x158] sm:$0xff]  ;;  %v7855_v24 = vpack.c.bf16 %v403_v19, %v402_v18  ;;  %v985_v31 = vld [vmem:[#allocation2 + $0x22] sm:$0xff] }
  0x34   : > { %6906 = vmatprep.mubr.msk.bf16.mxu1 %vm280_vm1, %v7826_v5  ;;  %v7845_v17 = vpack.c.bf16 %v417_v16, %v416_v14  ;;  %v418_v22 = vld [vmem:[#allocation2 + $0x168] sm:$0xff]  ;;  %v419_v23 = vld [vmem:[#allocation2 + $0x170] sm:$0xff]  ;;  %v987_v35 = vld [vmem:[#allocation2 + $0x3a] sm:$0xff]  ;;  %v7865_v38 = vpack.c.bf16 %v985_v31, %v984_v30 }
  0x35   : > { %v7857_v28 = vpack.c.bf16 %v419_v23, %v418_v22  ;;  %v690_v36 = vld [vmem:[#allocation2 + $0x19] sm:$0xff]  ;;  %v691_v37 = vld [vmem:[#allocation2 + $0x21] sm:$0xff]  ;;  %v692_v41 = vld [vmem:[#allocation2 + $0x31] sm:$0xff]  ;;  %v7867_v43 = vpack.c.bf16 %v987_v35, %v986_v32 }
  0x36   : > { %v693_v42 = vld [vmem:[#allocation2 + $0x39] sm:$0xff]  ;;  %v7869_v44 = vpack.c.bf16 %v691_v37, %v690_v36  ;;  %v353_v50 = vld [vmem:[%s7722_s13 + $0xf0] sm:$0xff]  ;;  %v7893_v55 = vld [vmem:[%s10026_s1 + $0xa] sm:$0x3] }
  0x37   : > { %v7873_v46 = vpack.c.bf16 %v693_v42, %v692_v41  ;;  %v354_v51 = vld [vmem:[%s7722_s13 + $0xf8] sm:$0xff]  ;;  %385 = vst.msk [vmem:[#allocation2 + $0x181] sm:$0xff] %vm280_vm1, %v353_v50  ;;  %v988_v33 = vld [vmem:[#allocation2 + $0x4a] sm:$0xff]  ;;  %v990_v56 = vld [vmem:[#allocation2 + $0x62] sm:$0xff] }
  0x38   : > { %386 = vst.msk [vmem:[#allocation2 + $0x189] sm:$0xff] %vm280_vm1, %v354_v51  ;;  %v989_v54 = vld [vmem:[#allocation2 + $0x52] sm:$0xff]  ;;  %v991_v47 = vld [vmem:[#allocation2 + $0x6a] sm:$0xff]  ;;  %v696_v62 = vld [vmem:[#allocation2 + $0x61] sm:$0xff] }
  0x39   : > { %6891 = vmatmul.mubr.msk.bf16.gmra.mxu0 %vm280_vm1, %v7839_v12  ;;  %v694_v58 = vld [vmem:[#allocation2 + $0x49] sm:$0xff]  ;;  %v695_v59 = vld [vmem:[#allocation2 + $0x51] sm:$0xff]  ;;  %v7901_v61 = vpack.c.bf16 %v989_v54, %v988_v33  ;;  %v7905_v1 = vpack.c.bf16 %v991_v47, %v990_v56  ;;  %v992_v6 = vld [vmem:[#allocation2 + $0x7a] sm:$0xff] }
  0x3a   : > { %6894 = vmatprep.mubr.msk.bf16.mxu0 %vm280_vm1, %v7841_v13  ;;  %v697_v63 = vld [vmem:[#allocation2 + $0x69] sm:$0xff]  ;;  %v7907_v3 = vpack.c.bf16 %v695_v59, %v694_v58  ;;  %v994_v8 = vld [vmem:[#allocation2 + $0x92] sm:$0xff]  ;;  %v995_v9 = vld [vmem:[#allocation2 + $0x9a] sm:$0xff] }
  0x3b   : > { %6907 = vmatmul.mubr.msk.bf16.gmra.mxu1 %vm280_vm1, %v7843_v15  ;;  %v7909_v4 = vpack.c.bf16 %v697_v63, %v696_v62  ;;  %v993_v7 = vld [vmem:[#allocation2 + $0x82] sm:$0xff]  ;;  %v698_v10 = vld [vmem:[#allocation2 + $0x79] sm:$0xff]  ;;  %v700_v16 = vld [vmem:[#allocation2 + $0x91] sm:$0xff]  ;;  %v7921_v19 = vpack.c.bf16 %v995_v9, %v994_v8 }
  0x3c   : > { %6910 = vmatprep.mubr.msk.bf16.mxu1 %vm280_vm1, %v7845_v17  ;;  %v699_v11 = vld [vmem:[#allocation2 + $0x81] sm:$0xff]  ;;  %v7919_v14 = vpack.c.bf16 %v993_v7, %v992_v6  ;;  %v701_v18 = vld [vmem:[#allocation2 + $0x99] sm:$0xff]  ;;  %v996_v22 = vld [vmem:[#allocation2 + $0xaa] sm:$0xff] }
  0x3d   : > { %v7923_v20 = vpack.c.bf16 %v699_v11, %v698_v10  ;;  %v7925_v21 = vpack.c.bf16 %v701_v18, %v700_v16  ;;  %v997_v23 = vld [vmem:[#allocation2 + $0xb2] sm:$0xff]  ;;  %v998_v25 = vld [vmem:[#allocation2 + $0xc2] sm:$0xff]  ;;  %v999_v26 = vld [vmem:[#allocation2 + $0xca] sm:$0xff] }
  0x3e   : > { %v7935_v30 = vpack.c.bf16 %v997_v23, %v996_v22  ;;  %v704_v31 = vld [vmem:[#allocation2 + $0xc1] sm:$0xff]  ;;  %v705_v32 = vld [vmem:[#allocation2 + $0xc9] sm:$0xff]  ;;  %v7937_v35 = vpack.c.bf16 %v999_v26, %v998_v25  ;;  %v706_v51 = vld [vmem:[#allocation2 + $0xd9] sm:$0xff] }
  0x3f   : > { %v7941_v37 = vpack.c.bf16 %v705_v32, %v704_v31  ;;  %v1000_v41 = vld [vmem:[#allocation2 + $0xda] sm:$0xff]  ;;  %v1001_v42 = vld [vmem:[#allocation2 + $0xe2] sm:$0xff]  ;;  %v708_v54 = vld [vmem:[#allocation2 + $0xf1] sm:$0xff] }
  0x40   : > { %v1003_v50 = vld [vmem:[#allocation2 + $0xfa] sm:$0xff]  ;;  %v7951_v33 = vpack.c.bf16 %v1001_v42, %v1000_v41  ;;  %v1004_v62 = vld [vmem:[#allocation2 + $0x10a] sm:$0xff]  ;;  %v1005_v63 = vld [vmem:[#allocation2 + $0x112] sm:$0xff] }
  0x41   : > { %6895 = vmatmul.mubr.msk.bf16.gmra.mxu0 %vm280_vm1, %v7855_v24  ;;  %v709_v56 = vld [vmem:[#allocation2 + $0xf9] sm:$0xff]  ;;  %v1006_v6 = vld [vmem:[#allocation2 + $0x122] sm:$0xff]  ;;  %v1007_v7 = vld [vmem:[#allocation2 + $0x12a] sm:$0xff]  ;;  %v7967_v10 = vpack.c.bf16 %v1005_v63, %v1004_v62 }
  0x42   : > { %6950 = vmatprep.mubr.msk.bf16.mxu0 %vm280_vm1, %v1014_v27  ;;  %v702_v27 = vld [vmem:[#allocation2 + $0xa9] sm:$0xff]  ;;  %v7957_v59 = vpack.c.bf16 %v709_v56, %v708_v54  ;;  %v711_v9 = vld [vmem:[#allocation2 + $0x111] sm:$0xff]  ;;  %v712_v11 = vld [vmem:[#allocation2 + $0x121] sm:$0xff]  ;;  %v7969_v18 = vpack.c.bf16 %v1007_v7, %v1006_v6 }
  0x43   : > { %6911 = vmatmul.mubr.msk.bf16.gmra.mxu1 %vm280_vm1, %v7857_v28  ;;  %v710_v8 = vld [vmem:[#allocation2 + $0x109] sm:$0xff]  ;;  %v1008_v25 = vld [vmem:[#allocation2 + $0x13a] sm:$0xff]  ;;  %v716_v42 = vld [vmem:[#allocation2 + $0x151] sm:$0xff] }
  0x44   : > { %6916 = vmatprep.mubr.msk.bf16.mxu1 %vm280_vm1, %v720_v29  ;;  %v703_v29 = vld [vmem:[#allocation2 + $0xb1] sm:$0xff]  ;;  %v713_v16 = vld [vmem:[#allocation2 + $0x129] sm:$0xff]  ;;  %v7971_v22 = vpack.c.bf16 %v711_v9, %v710_v8  ;;  %v714_v31 = vld [vmem:[#allocation2 + $0x139] sm:$0xff]  ;;  %v2258_v8 = vsel %vm485_vm0, %v7878_v49, 0 }
  0x45   : > { %v7939_v36 = vpack.c.bf16 %v703_v29, %v702_v27  ;;  %v732_v23 = vpack.c.bf16 %v713_v16, %v712_v11  ;;  %v1009_v26 = vld [vmem:[#allocation2 + $0x142] sm:$0xff]  ;;  %v1010_v27 = vld [vmem:[#allocation2 + $0x152] sm:$0xff]  ;;  %v1011_v29 = vld [vmem:[#allocation2 + $0x15a] sm:$0xff]  ;;  %v1963_v11 = vsel %vm485_vm0, %v7893_v55, 0 }
  0x46   : > { %v715_v32 = vld [vmem:[#allocation2 + $0x141] sm:$0xff]  ;;  %v7980_v41 = vpack.c.bf16 %v1009_v26, %v1008_v25  ;;  %v1012_v54 = vld [vmem:[#allocation2 + $0x16a] sm:$0xff]  ;;  %v1013_v56 = vld [vmem:[#allocation2 + $0x172] sm:$0xff] }
  0x47   : > { %v718_v62 = vld [vmem:[#allocation2 + $0x169] sm:$0xff]  ;;  %v719_v63 = vld [vmem:[#allocation2 + $0x171] sm:$0xff]  ;;  %v7990_v6 = vpack.c.bf16 %v1013_v56, %v1012_v54 }
  0x48   : > { %v735_v7 = vpack.c.bf16 %v719_v63, %v718_v62  ;;  %v6366_v9 = vld [vmem:[%s10026_s1 + $0x10] sm:$0x3]  ;;  %v1307_v16 = vld [vmem:[#allocation2 + $0x188] sm:$0xff] }
  0x49   : > { %6951 = vmatmul.mubr.msk.bf16.vlgmr.msra.gmra.mxu0 %vm280_vm1, %v7865_v38  ;;  %v2846_v26 = vsel %vm485_vm0, %v6366_v9, 0 }
  0x4a   : > { %7017 = vmatpush3.bf16.msra.mxu0 %v1669_v45  ;;  %6954 = vmatprep.mubr.msk.bf16.mxu0 %vm280_vm1, %v7867_v43  ;;  %v1002_v45 = vld [vmem:[#allocation2 + $0xf2] sm:$0xff] }
  0x4b   : > { %6917 = vmatmul.mubr.msk.bf16.vlgmr.msra.gmra.mxu1 %vm280_vm1, %v7869_v44  ;;  %7535 = vmatprep.subr.msk.bf16.mxu0 %vm485_vm0, %v7878_v49  ;;  %v7953_v47 = vpack.c.bf16 %v1003_v50, %v1002_v45  ;;  %v717_v45 = vld [vmem:[#allocation2 + $0x159] sm:$0xff]  ;;  %v7982_v50 = vpack.c.bf16 %v1011_v29, %v1010_v27  ;;  %v1601_v49 = vld [vmem:[#allocation2 + $0x189] sm:$0xff] }
  0x4c   : > { %6983 = vmatpush3.bf16.msra.mxu1 %v1375_v53  ;;  %6920 = vmatprep.mubr.msk.bf16.mxu1 %vm280_vm1, %v7873_v46  ;;  %v707_v53 = vld [vmem:[#allocation2 + $0xe1] sm:$0xff] }
  0x4d   : > { %7534 = vmatprep.subr.msk.bf16.mxu1 %vm485_vm0, %v7893_v55  ;;  %v7955_v58 = vpack.c.bf16 %v707_v53, %v706_v51  ;;  %v733_v51 = vpack.c.bf16 %v715_v32, %v714_v31  ;;  %v734_v53 = vpack.c.bf16 %v717_v45, %v716_v42  ;;  %v1306_v55 = vld [vmem:[#allocation2 + $0x180] sm:$0xff] }
  0x4e   : > { %v1323_v25 = vpack.c.bf16 %v1307_v16, %v1306_v55  ;;  %v2190_v42 = vld [vmem:[#allocation2 + $0x1a0] sm:$0xff] }
  0x51   : > { %6955 = vmatmul.mubr.msk.bf16.gmra.mxu0 %vm280_vm1, %v7901_v61 }
  0x52   : > { %6958 = vmatprep.mubr.msk.bf16.mxu0 %vm280_vm1, %v7905_v1 }
  0x53   : > { %6921 = vmatmul.mubr.msk.bf16.gmra.mxu1 %vm280_vm1, %v7907_v3 }
  0x54   : > { %6924 = vmatprep.mubr.msk.bf16.mxu1 %vm280_vm1, %v7909_v4 }
  0x59   : > { %6959 = vmatmul.mubr.msk.bf16.gmra.mxu0 %vm280_vm1, %v7919_v14 }
  0x5a   : > { %6962 = vmatprep.mubr.msk.bf16.mxu0 %vm280_vm1, %v7921_v19 }
  0x5b   : > { %6925 = vmatmul.mubr.msk.bf16.gmra.mxu1 %vm280_vm1, %v7923_v20 }
  0x5c   : > { %6928 = vmatprep.mubr.msk.bf16.mxu1 %vm280_vm1, %v7925_v21 }
  0x61   : > { %6963 = vmatmul.mubr.msk.bf16.gmra.mxu0 %vm280_vm1, %v7935_v30 }
  0x62   : > { %6966 = vmatprep.mubr.msk.bf16.mxu0 %vm280_vm1, %v7937_v35 }
  0x63   : > { %6929 = vmatmul.mubr.msk.bf16.gmra.mxu1 %vm280_vm1, %v7939_v36 }
  0x64   : > { %6932 = vmatprep.mubr.msk.bf16.mxu1 %vm280_vm1, %v7941_v37 }
  0x69   : > { %6967 = vmatmul.mubr.msk.bf16.gmra.mxu0 %vm280_vm1, %v7951_v33 }
  0x6a   : > { %6970 = vmatprep.mubr.msk.bf16.mxu0 %vm280_vm1, %v7953_v47 }
  0x6b   : > { %6933 = vmatmul.mubr.msk.bf16.gmra.mxu1 %vm280_vm1, %v7955_v58 }
  0x6c   : > { %6936 = vmatprep.mubr.msk.bf16.mxu1 %vm280_vm1, %v7957_v59 }
  0x71   : > { %6971 = vmatmul.mubr.msk.bf16.gmra.mxu0 %vm280_vm1, %v7967_v10 }
  0x72   : > { %6974 = vmatprep.mubr.msk.bf16.mxu0 %vm280_vm1, %v7969_v18 }
  0x73   : > { %6937 = vmatmul.mubr.msk.bf16.gmra.mxu1 %vm280_vm1, %v7971_v22 }
  0x74   : > { %6940 = vmatprep.mubr.msk.bf16.mxu1 %vm280_vm1, %v732_v23 }
  0x79   : > { %6975 = vmatmul.mubr.msk.bf16.gmra.mxu0 %vm280_vm1, %v7980_v41 }
  0x7a   : > { %6978 = vmatprep.mubr.msk.bf16.mxu0 %vm280_vm1, %v7982_v50 }
  0x7b   : > { %6941 = vmatmul.mubr.msk.bf16.gmra.mxu1 %vm280_vm1, %v733_v51 }
  0x7c   : > { %6944 = vmatprep.mubr.msk.bf16.mxu1 %vm280_vm1, %v734_v53 }
  0x81   : > { %6979 = vmatmul.mubr.msk.bf16.gmra.mxu0 %vm280_vm1, %v7990_v6 }
  0x82   : > { %7018 = vmatprep.mubr.msk.bf16.mxu0 %vm280_vm1, %v7869_v44  ;;  %v1600_v44 = vld [vmem:[#allocation2 + $0x181] sm:$0xff] }
  0x83   : > { %6945 = vmatmul.mubr.msk.bf16.gmra.mxu1 %vm280_vm1, %v735_v7 }
  0x84   : > { %6984 = vmatprep.mubr.msk.bf16.mxu1 %vm280_vm1, %v7774_v34  ;;  %v6349_v34 = vld [vmem:[%s10026_s1 + $0xe] sm:$0x3] }
  0x85   : > { %v2552_v27 = vsel %vm485_vm0, %v6349_v34, 0 }
  0x89   : > { %7019 = vmatmul.mubr.msk.bf16.vlgmr.msra.gmra.mxu0 %vm280_vm1, %v7873_v46 }
  0x8a   : > { %7085 = vmatpush3.bf16.msra.mxu0 %v2258_v8  ;;  %7022 = vmatprep.mubr.msk.bf16.mxu0 %vm280_vm1, %v7907_v3 }
  0x8b   : > { %6985 = vmatmul.mubr.msk.bf16.vlgmr.msra.gmra.mxu1 %vm280_vm1, %v7797_v48  ;;  %7537 = vmatprep.subr.msk.bf16.mxu0 %vm485_vm0, %v6366_v9 }
  0x8c   : > { %7051 = vmatpush3.bf16.msra.mxu1 %v1963_v11  ;;  %6988 = vmatprep.mubr.msk.bf16.mxu1 %vm280_vm1, %v7807_v57 }
  0x8d   : > { %7536 = vmatprep.subr.msk.bf16.mxu1 %vm485_vm0, %v6349_v34 }
  0x91   : > { %7023 = vmatmul.mubr.msk.bf16.gmra.mxu0 %vm280_vm1, %v7909_v4 }
  0x92   : > { %7026 = vmatprep.mubr.msk.bf16.mxu0 %vm280_vm1, %v7923_v20 }
  0x93   : > { %6989 = vmatmul.mubr.msk.bf16.gmra.mxu1 %vm280_vm1, %v7813_v60 }
  0x94   : > { %6992 = vmatprep.mubr.msk.bf16.mxu1 %vm280_vm1, %v7839_v12 }
  0x99   : > { %7027 = vmatmul.mubr.msk.bf16.gmra.mxu0 %vm280_vm1, %v7925_v21 }
  0x9a   : > { %7030 = vmatprep.mubr.msk.bf16.mxu0 %vm280_vm1, %v7939_v36 }
  0x9b   : > { %6993 = vmatmul.mubr.msk.bf16.gmra.mxu1 %vm280_vm1, %v7841_v13 }
  0x9c   : > { %6996 = vmatprep.mubr.msk.bf16.mxu1 %vm280_vm1, %v7855_v24 }
  0xa1   : > { %7031 = vmatmul.mubr.msk.bf16.gmra.mxu0 %vm280_vm1, %v7941_v37 }
  0xa2   : > { %7034 = vmatprep.mubr.msk.bf16.mxu0 %vm280_vm1, %v7955_v58 }
  0xa3   : > { %6997 = vmatmul.mubr.msk.bf16.gmra.mxu1 %vm280_vm1, %v7778_v39 }
  0xa4   : > { %7000 = vmatprep.mubr.msk.bf16.mxu1 %vm280_vm1, %v7780_v40 }
  0xa9   : > { %7035 = vmatmul.mubr.msk.bf16.gmra.mxu0 %vm280_vm1, %v7957_v59 }
  0xaa   : > { %7038 = vmatprep.mubr.msk.bf16.mxu0 %vm280_vm1, %v7971_v22 }
  0xab   : > { %7001 = vmatmul.mubr.msk.bf16.gmra.mxu1 %vm280_vm1, %v7801_v52 }
  0xac   : > { %7004 = vmatprep.mubr.msk.bf16.mxu1 %vm280_vm1, %v7818_v0 }
  0xb1   : > { %7039 = vmatmul.mubr.msk.bf16.gmra.mxu0 %vm280_vm1, %v732_v23  ;;  %v8063_v23 = vpack.c.bf16 %v1601_v49, %v1600_v44 }
  0xb2   : > { %7042 = vmatprep.mubr.msk.bf16.mxu0 %vm280_vm1, %v733_v51  ;;  %v1894_v51 = vld [vmem:[#allocation2 + $0x182] sm:$0xff] }
  0xb3   : > { %7005 = vmatmul.mubr.msk.bf16.gmra.mxu1 %vm280_vm1, %v7826_v5 }
  0xb4   : > { %7008 = vmatprep.mubr.msk.bf16.mxu1 %vm280_vm1, %v7843_v15 }
  0xb9   : > { %7043 = vmatmul.mubr.msk.bf16.gmra.mxu0 %vm280_vm1, %v734_v53  ;;  %v1895_v53 = vld [vmem:[#allocation2 + $0x18a] sm:$0xff] }
  0xba   : > { %7046 = vmatprep.mubr.msk.bf16.mxu0 %vm280_vm1, %v735_v7  ;;  %v8167_v7 = vpack.c.bf16 %v1895_v53, %v1894_v51 }
  0xbb   : > { %7009 = vmatmul.mubr.msk.bf16.gmra.mxu1 %vm280_vm1, %v7845_v17 }
  0xbc   : > { %7012 = vmatprep.mubr.msk.bf16.mxu1 %vm280_vm1, %v7857_v28 }
  0xc1   : > { %7047 = vmatmul.mubr.msk.bf16.gmra.mxu0 %vm280_vm1, %v8063_v23 }
  0xc2   : > { %7086 = vmatprep.mubr.msk.bf16.mxu0 %vm280_vm1, %v7797_v48 }
  0xc3   : > { %7013 = vmatmul.mubr.msk.bf16.gmra.mxu1 %vm280_vm1, %v1323_v25 }
  0xc4   : > { %7052 = vmatprep.mubr.msk.bf16.mxu1 %vm280_vm1, %v7865_v38 }
  0xc9   : > { %7087 = vmatmul.mubr.msk.bf16.vlgmr.msra.gmra.mxu0 %vm280_vm1, %v7807_v57 }
  0xca   : > { %7153 = vmatpush3.bf16.msra.mxu0 %v2846_v26  ;;  %7090 = vmatprep.mubr.msk.bf16.mxu0 %vm280_vm1, %v7813_v60 }
  0xcb   : > { %7053 = vmatmul.mubr.msk.bf16.vlgmr.msra.gmra.mxu1 %vm280_vm1, %v7867_v43 }
  0xcc   : > { %7119 = vmatpush3.bf16.msra.mxu1 %v2552_v27  ;;  %7056 = vmatprep.mubr.msk.bf16.mxu1 %vm280_vm1, %v7901_v61 }
  0xd1   : > { %7091 = vmatmul.mubr.msk.bf16.gmra.mxu0 %vm280_vm1, %v7839_v12 }
  0xd2   : > { %7094 = vmatprep.mubr.msk.bf16.mxu0 %vm280_vm1, %v7841_v13 }
  0xd3   : > { %7057 = vmatmul.mubr.msk.bf16.gmra.mxu1 %vm280_vm1, %v7905_v1 }
  0xd4   : > { %7060 = vmatprep.mubr.msk.bf16.mxu1 %vm280_vm1, %v7919_v14 }
  0xd9   : > { %7095 = vmatmul.mubr.msk.bf16.gmra.mxu0 %vm280_vm1, %v7855_v24 }
  0xda   : > { %7098 = vmatprep.mubr.msk.bf16.mxu0 %vm280_vm1, %v7778_v39 }
  0xdb   : > { %7061 = vmatmul.mubr.msk.bf16.gmra.mxu1 %vm280_vm1, %v7921_v19 }
  0xdc   : > { %7064 = vmatprep.mubr.msk.bf16.mxu1 %vm280_vm1, %v7935_v30 }
  0xe1   : > { %7099 = vmatmul.mubr.msk.bf16.gmra.mxu0 %vm280_vm1, %v7780_v40 }
  0xe2   : > { %7102 = vmatprep.mubr.msk.bf16.mxu0 %vm280_vm1, %v7801_v52 }
  0xe3   : > { %7065 = vmatmul.mubr.msk.bf16.gmra.mxu1 %vm280_vm1, %v7937_v35 }
  0xe4   : > { %7068 = vmatprep.mubr.msk.bf16.mxu1 %vm280_vm1, %v7951_v33 }
  0xe9   : > { %v6884_v48 = vpop.f32.mrf.mxu0  ;;  %7103 = vmatmul.mubr.msk.bf16.gmra.mxu0 %vm280_vm1, %v7818_v0 }
  0xea   : > { %7106 = vmatprep.mubr.msk.bf16.mxu0 %vm280_vm1, %v7826_v5 }
  0xeb   : > { %v8110_v39 = vpop.f32.mrf.mxu1  ;;  %7069 = vmatmul.mubr.msk.bf16.gmra.mxu1 %vm280_vm1, %v7953_v47  ;;  %v523_v40 = vpop.f32.mrf.mxu0 }
  0xec   : > { %7072 = vmatprep.mubr.msk.bf16.mxu1 %vm280_vm1, %v7967_v10 }
  0xed   : > { %v8116_v52 = vpop.f32.mrf.mxu1  ;;  %v6885_v57 = vpop.f32.mrf.mxu0 }
  0xef   : > { %v8118_v60 = vpop.f32.mrf.mxu1  ;;  %v526_v12 = vpop.f32.mrf.mxu0 }
  0xf1   : > { %v8120_v13 = vpop.f32.mrf.mxu1  ;;  %v8122_v0 = vpop.f32.mrf.mxu0  ;;  %7107 = vmatmul.mubr.msk.bf16.gmra.mxu0 %vm280_vm1, %v7843_v15 }
  0xf2   : > { %7110 = vmatprep.mubr.msk.bf16.mxu0 %vm280_vm1, %v7845_v17 }
  0xf3   : > { %v8128_v5 = vpop.f32.mrf.mxu1  ;;  %7073 = vmatmul.mubr.msk.bf16.gmra.mxu1 %vm280_vm1, %v7969_v18  ;;  %v8132_v24 = vpop.f32.mrf.mxu0  ;;  %v2189_v18 = vld [vmem:[#allocation2 + $0x198] sm:$0xff] }
  0xf4   : > { %7076 = vmatprep.mubr.msk.bf16.mxu1 %vm280_vm1, %v7980_v41 }
  0xf5   : > { %v8136_v38 = vpop.f32.mrf.mxu1  ;;  %v8138_v29 = vpop.f32.mrf.mxu0 }
  0xf7   : > { %v8140_v31 = vpop.f32.mrf.mxu1  ;;  %v8142_v15 = vpop.f32.mrf.mxu0 }
  0xf9   : > { %v8144_v32 = vpop.f32.mrf.mxu1  ;;  %v8146_v17 = vpop.f32.mrf.mxu0  ;;  %7111 = vmatmul.mubr.msk.bf16.gmra.mxu0 %vm280_vm1, %v7857_v28  ;;  %v2206_v28 = vpack.c.bf16 %v2190_v42, %v2189_v18 }
  0xfa   : > { %7114 = vmatprep.mubr.msk.bf16.mxu0 %vm280_vm1, %v1323_v25 }
  0xfb   : > { %v8151_v41 = vpop.f32.mrf.mxu1  ;;  %7077 = vmatmul.mubr.msk.bf16.gmra.mxu1 %vm280_vm1, %v7982_v50  ;;  %v8155_v45 = vpop.f32.mrf.mxu0 }
  0xfc   : > { %7080 = vmatprep.mubr.msk.bf16.mxu1 %vm280_vm1, %v7990_v6 }
  0xfd   : > { %v8159_v54 = vpop.f32.mrf.mxu1  ;;  %v8161_v56 = vpop.f32.mrf.mxu0 }
  0xff   : > { %v8163_v62 = vpop.f32.mrf.mxu1  ;;  %v8165_v63 = vpop.f32.mrf.mxu0 }
 0x101   : > { %v8169_v8 = vpop.f32.mrf.mxu1  ;;  %v8171_v50 = vpop.f32.mrf.mxu0  ;;  %7115 = vmatmul.mubr.msk.bf16.gmra.mxu0 %vm280_vm1, %v2206_v28 }
 0x102   : > { %7154 = vmatprep.mubr.msk.bf16.mxu0 %vm280_vm1, %v7867_v43  ;;  %v8195_v43 = vld [vmem:[%s10027_s2] ss:$0 sm:$0xff] }
 0x103   : > { %v8176_v6 = vpop.f32.mrf.mxu1  ;;  %7081 = vmatmul.mubr.msk.bf16.gmra.mxu1 %vm280_vm1, %v8167_v7  ;;  %v8180_v9 = vpop.f32.mrf.mxu0  ;;  %v656_v27 = vadd.f32 %v8195_v43, %v523_v40  ;;  %v657_v2 = vadd.f32 %v8195_v43, %v526_v12 }
 0x104   : > { %7120 = vmatprep.mubr.msk.bf16.mxu1 %vm280_vm1, %v7873_v46  ;;  %v658_v46 = vadd.f32 %v6884_v48, %v8195_v43 }
 0x105   : > { %v8184_v11 = vpop.f32.mrf.mxu1  ;;  %v8186_v34 = vpop.f32.mrf.mxu0 }
 0x107   : > { %v8188_v44 = vpop.f32.mrf.mxu1  ;;  %v8190_v49 = vpop.f32.mrf.mxu0 }
 0x108   : > { %10036 = vst [vmem:[#allocation4_spill] sm:$0xff] %v8188_v44 }
 0x109   : > { %v8197_v55 = vpop.f32.mrf.mxu1  ;;  %v6952_v16 = vpop.f32.mrf.mxu0  ;;  %7155 = vmatmul.mubr.msk.bf16.vlgmr.msra.gmra.mxu0 %vm280_vm1, %v7901_v61  ;;  %v659_v61 = vadd.f32 %v6885_v57, %v8195_v43 }
 0x10a   : > { %10037 = vst [vmem:[#allocation5_spill] sm:$0xff] %v8197_v55  ;;  %7158 = vmatprep.mubr.msk.bf16.mxu0 %vm280_vm1, %v7905_v1 }
 0x10b   : > { %v6918_v25 = vpop.f32.mrf.mxu1  ;;  %7121 = vmatmul.mubr.msk.bf16.vlgmr.msra.gmra.mxu1 %vm280_vm1, %v7907_v3  ;;  %v1117_v26 = vpop.f32.mrf.mxu0 }
 0x10c   : > { %v952_v18 = vadd.f32 %v6918_v25, %v658_v46  ;;  %7124 = vmatprep.mubr.msk.bf16.mxu1 %vm280_vm1, %v7909_v4  ;;  %v662_v4 = vadd.f32 %v8122_v0, %v8195_v43  ;;  %v660_v25 = vadd.f32 %v8195_v43, %v8132_v24 }
 0x10d   : > { %v823_v42 = vpop.f32.mrf.mxu1  ;;  %v6953_v51 = vpop.f32.mrf.mxu0 }
 0x10e   : > { %v950_v53 = vadd.f32 %v823_v42, %v656_v27  ;;  %v8210_v48 = vadd.f32 %v6952_v16, %v952_v18  ;;  %v661_v18 = vadd.f32 %v8195_v43, %v8142_v15 }
 0x10f   : > { %v6919_v28 = vpop.f32.mrf.mxu1  ;;  %v1120_v1 = vpop.f32.mrf.mxu0 }
 0x110   : > { %v953_v55 = vadd.f32 %v6919_v28, %v659_v61  ;;  %v8213_v3 = vadd.f32 %v1117_v26, %v950_v53  ;;  %v666_v61 = vadd.f32 %v8146_v17, %v8195_v43 }
 0x111   : > { %v826_v44 = vpop.f32.mrf.mxu1  ;;  %v6956_v40 = vpop.f32.mrf.mxu0  ;;  %7159 = vmatmul.mubr.msk.bf16.gmra.mxu0 %vm280_vm1, %v7919_v14 }
 0x112   : > { %v951_v46 = vadd.f32 %v826_v44, %v657_v2  ;;  %7162 = vmatprep.mubr.msk.bf16.mxu0 %vm280_vm1, %v7921_v19  ;;  %v8221_v57 = vadd.f32 %v6953_v51, %v953_v55  ;;  %v663_v19 = vadd.f32 %v8138_v29, %v8195_v43 }
 0x113   : > { %v6922_v16 = vpop.f32.mrf.mxu1  ;;  %7125 = vmatmul.mubr.msk.bf16.gmra.mxu1 %vm280_vm1, %v7923_v20  ;;  %v1133_v12 = vpop.f32.mrf.mxu0 }
 0x114   : > { %v956_v26 = vadd.f32 %v6922_v16, %v662_v4  ;;  %7128 = vmatprep.mubr.msk.bf16.mxu1 %vm280_vm1, %v7925_v21  ;;  %v8229_v14 = vadd.f32 %v1120_v1, %v951_v46  ;;  %v664_v1 = vadd.f32 %v8195_v43, %v8155_v45  ;;  %v667_v46 = vadd.f32 %v8161_v56, %v8195_v43 }
 0x115   : > { %v839_v2 = vpop.f32.mrf.mxu1  ;;  %v6957_v0 = vpop.f32.mrf.mxu0  ;;  %v670_v56 = vadd.f32 %v8171_v50, %v8195_v43 }
 0x116   : > { %v954_v44 = vadd.f32 %v839_v2, %v660_v25  ;;  %v8233_v55 = vadd.f32 %v6956_v40, %v956_v26  ;;  %v665_v25 = vadd.f32 %v8195_v43, %v8165_v63  ;;  %v3465_v63 = vld [vmem:[%s10028_s3] sm:$0xf] }
 0x117   : > { %v6923_v27 = vpop.f32.mrf.mxu1  ;;  %v1136_v20 = vpop.f32.mrf.mxu0  ;;  %7539 = vmatprep.subr.msk.bf16.mxu0 %vm3514_vm4, %v3465_v63  ;;  %v3516_v50 = vsel %vm3514_vm4, %v3465_v63, 0 }
 0x118   : > { %v957_v24 = vadd.f32 %v6923_v27, %v663_v19  ;;  %v8237_v42 = vadd.f32 %v1133_v12, %v954_v44  ;;  %7221 = vmatpush3.bf16.msra.mxu0 %v3516_v50 }
 0x119   : > { %v842_v51 = vpop.f32.mrf.mxu1  ;;  %v6960_v21 = vpop.f32.mrf.mxu0  ;;  %7163 = vmatmul.mubr.msk.bf16.gmra.mxu0 %vm280_vm1, %v7935_v30 }
 0x11a   : > { %v955_v29 = vadd.f32 %v842_v51, %v661_v18  ;;  %7166 = vmatprep.mubr.msk.bf16.mxu0 %vm280_vm1, %v7937_v35  ;;  %v8245_v53 = vadd.f32 %v6957_v0, %v957_v24  ;;  %v3196_v35 = vld [vmem:[%s10030_s5] sm:$0x3]  ;;  %v2768_v24 = vld [vmem:[#allocation2 + $0x12a] sm:$0xff] }
 0x11b   : > { %v6926_v28 = vpop.f32.mrf.mxu1  ;;  %7129 = vmatmul.mubr.msk.bf16.gmra.mxu1 %vm280_vm1, %v7939_v36  ;;  %v1149_v15 = vpop.f32.mrf.mxu0  ;;  %7538 = vmatprep.subr.msk.bf16.mxu1 %vm485_vm0, %v3196_v35  ;;  %v3253_v45 = vsel %vm485_vm0, %v3196_v35, 0  ;;  %v669_v35 = vadd.f32 %v8195_v43, %v8190_v49 }
 0x11c   : > { %v960_v40 = vadd.f32 %v6926_v28, %v666_v61  ;;  %7132 = vmatprep.mubr.msk.bf16.mxu1 %vm280_vm1, %v7941_v37  ;;  %v8253_v30 = vadd.f32 %v1136_v20, %v955_v29  ;;  %7187 = vmatpush3.bf16.msra.mxu1 %v3253_v45  ;;  %v2474_v28 = vld [vmem:[#allocation2 + $0x129] sm:$0xff] }
 0x11d   : > { %v855_v17 = vpop.f32.mrf.mxu1  ;;  %v6961_v4 = vpop.f32.mrf.mxu0 }
 0x11e   : > { %v958_v36 = vadd.f32 %v855_v17, %v664_v1  ;;  %v8260_v16 = vadd.f32 %v6960_v21, %v960_v40 }
 0x11f   : > { %v6927_v12 = vpop.f32.mrf.mxu1  ;;  %v1152_v37 = vpop.f32.mrf.mxu0 }
 0x120   : > { %v961_v26 = vadd.f32 %v6927_v12, %v667_v46  ;;  %v8266_v2 = vadd.f32 %v1149_v15, %v958_v36  ;;  %v671_v15 = vadd.f32 %v8186_v34, %v8195_v43  ;;  %v674_v34 = vadd.f32 %v8110_v39, %v8195_v43  ;;  %v2475_v39 = vld [vmem:[#allocation2 + $0x139] sm:$0xff] }
 0x121   : > { %v858_v0 = vpop.f32.mrf.mxu1  ;;  %v6964_v19 = vpop.f32.mrf.mxu0  ;;  %7167 = vmatmul.mubr.msk.bf16.gmra.mxu0 %vm280_vm1, %v7951_v33  ;;  %v2767_v33 = vld [vmem:[#allocation2 + $0x122] sm:$0xff] }
 0x122   : > { %v959_v44 = vadd.f32 %v858_v0, %v665_v25  ;;  %7170 = vmatprep.mubr.msk.bf16.mxu0 %vm280_vm1, %v7953_v47  ;;  %v8274_v27 = vadd.f32 %v6961_v4, %v961_v26  ;;  %v668_v47 = vadd.f32 %v8195_v43, %v8180_v9  ;;  %v2789_v40 = vpack.c.bf16 %v2768_v24, %v2767_v33  ;;  %v2769_v25 = vld [vmem:[#allocation2 + $0x13a] sm:$0xff]  ;;  %v2770_v26 = vld [vmem:[#allocation2 + $0x142] sm:$0xff] }
 0x123   : > { %v6930_v20 = vpop.f32.mrf.mxu1  ;;  %7133 = vmatmul.mubr.msk.bf16.gmra.mxu1 %vm280_vm1, %v7955_v58  ;;  %v1165_v18 = vpop.f32.mrf.mxu0  ;;  %v2473_v58 = vld [vmem:[#allocation2 + $0x121] sm:$0xff]  ;;  %v2790_v50 = vpack.c.bf16 %v2770_v26, %v2769_v25  ;;  %v676_v25 = vadd.f32 %v8195_v43, %v8136_v38  ;;  %v677_v38 = vadd.f32 %v8195_v43, %v8144_v32 }
 0x124   : > { %v964_v51 = vadd.f32 %v6930_v20, %v670_v56  ;;  %7136 = vmatprep.mubr.msk.bf16.mxu1 %vm280_vm1, %v7957_v59  ;;  %v8287_v21 = vadd.f32 %v1152_v37, %v959_v44  ;;  %v2495_v46 = vpack.c.bf16 %v2474_v28, %v2473_v58  ;;  %v2771_v56 = vld [vmem:[#allocation2 + $0x152] sm:$0xff]  ;;  %v2772_v44 = vld [vmem:[#allocation2 + $0x15a] sm:$0xff] }
 0x125   : > { %v871_v61 = vpop.f32.mrf.mxu1  ;;  %v6965_v29 = vpop.f32.mrf.mxu0  ;;  %v2476_v20 = vld [vmem:[#allocation2 + $0x141] sm:$0xff] }
 0x126   : > { %v962_v1 = vadd.f32 %v871_v61, %v668_v47  ;;  %v8291_v17 = vadd.f32 %v6964_v19, %v964_v51  ;;  %v2477_v47 = vld [vmem:[#allocation2 + $0x151] sm:$0xff]  ;;  %v2478_v51 = vld [vmem:[#allocation2 + $0x159] sm:$0xff] }
 0x127   : > { %v6931_v4 = vpop.f32.mrf.mxu1  ;;  %v1168_v9 = vpop.f32.mrf.mxu0 }
 0x128   : > { %v965_v59 = vadd.f32 %v6931_v4, %v671_v15  ;;  %v8295_v36 = vadd.f32 %v1165_v18, %v962_v1  ;;  %v2496_v15 = vpack.c.bf16 %v2476_v20, %v2475_v39  ;;  %v673_v1 = vadd.f32 %v8195_v43, %v8120_v13 }
 0x129   : > { %v874_v45 = vpop.f32.mrf.mxu1  ;;  %v6968_v12 = vpop.f32.mrf.mxu0  ;;  %7171 = vmatmul.mubr.msk.bf16.gmra.mxu0 %vm280_vm1, %v7967_v10  ;;  %v672_v10 = vadd.f32 %v8195_v43, %v8116_v52  ;;  %v2497_v4 = vpack.c.bf16 %v2478_v51, %v2477_v47 }
 0x12a   : > { %v963_v37 = vadd.f32 %v874_v45, %v669_v35  ;;  %7174 = vmatprep.mubr.msk.bf16.mxu0 %vm280_vm1, %v2789_v40  ;;  %v8302_v0 = vadd.f32 %v6965_v29, %v965_v59  ;;  %v2791_v29 = vpack.c.bf16 %v2772_v44, %v2771_v56  ;;  %v2773_v45 = vld [vmem:[#allocation2 + $0x16a] sm:$0xff] }
 0x12b   : > { %v6934_v49 = vpop.f32.mrf.mxu1  ;;  %7137 = vmatmul.mubr.msk.bf16.gmra.mxu1 %vm280_vm1, %v7971_v22  ;;  %v1181_v19 = vpop.f32.mrf.mxu0  ;;  %v675_v22 = vadd.f32 %v8118_v60, %v8195_v43  ;;  %v678_v60 = vadd.f32 %v8128_v5, %v8195_v43  ;;  %v2480_v5 = vld [vmem:[#allocation2 + $0x171] sm:$0xff] }
 0x12c   : > { %v968_v63 = vadd.f32 %v6934_v49, %v674_v34  ;;  %7140 = vmatprep.mubr.msk.bf16.mxu1 %vm280_vm1, %v2495_v46  ;;  %v8309_v18 = vadd.f32 %v1168_v9, %v963_v37  ;;  %v2479_v49 = vld [vmem:[#allocation2 + $0x169] sm:$0xff] }
 0x12d   : > { %v887_v33 = vpop.f32.mrf.mxu1  ;;  %v6969_v24 = vpop.f32.mrf.mxu0 }
 0x12e   : > { %v966_v61 = vadd.f32 %v887_v33, %v672_v10  ;;  %v8313_v58 = vadd.f32 %v6968_v12, %v968_v63  ;;  %v2774_v12 = vld [vmem:[#allocation2 + $0x172] sm:$0xff]  ;;  %v679_v10 = vadd.f32 %v8140_v31, %v8195_v43  ;;  %v682_v31 = vadd.f32 %v8151_v41, %v8195_v43 }
 0x12f   : > { %v6935_v52 = vpop.f32.mrf.mxu1  ;;  %v8315_v28 = vpop.f32.mrf.mxu0  ;;  %v2792_v44 = vpack.c.bf16 %v2774_v12, %v2773_v45  ;;  %v2483_v41 = vld [vmem:[#allocation2 + $0x199] sm:$0xff]  ;;  %v3149_v12 = vld [vmem:[%s7722_s13 + $0x8] sm:$0xff] }
 0x130   : > { %v969_v40 = vadd.f32 %v6935_v52, %v675_v22  ;;  %v8319_v9 = vadd.f32 %v1181_v19, %v966_v61  ;;  %v2778_v52 = vld [vmem:[#allocation2 + $0x1a2] sm:$0xff] }
 0x131   : > { %v890_v35 = vpop.f32.mrf.mxu1  ;;  %v6972_v59 = vpop.f32.mrf.mxu0  ;;  %7175 = vmatmul.mubr.msk.bf16.gmra.mxu0 %vm280_vm1, %v2790_v50  ;;  %v3148_v45 = vld [vmem:[%s7722_s13] sm:$0xff] }
 0x132   : > { %v8324_v46 = vadd.f32 %v890_v35, %v673_v1  ;;  %7178 = vmatprep.mubr.msk.bf16.mxu0 %vm280_vm1, %v2791_v29  ;;  %v8327_v34 = vadd.f32 %v6969_v24, %v969_v40  ;;  %v2498_v24 = vpack.c.bf16 %v2480_v5, %v2479_v49  ;;  %v2777_v29 = vld [vmem:[#allocation2 + $0x19a] sm:$0xff]  ;;  %v680_v40 = vadd.f32 %v8195_v43, %v8159_v54 }
 0x133   : > { %v6938_v13 = vpop.f32.mrf.mxu1  ;;  %7141 = vmatmul.mubr.msk.bf16.gmra.mxu1 %vm280_vm1, %v2496_v15  ;;  %v1197_v37 = vpop.f32.mrf.mxu0  ;;  %v2484_v35 = vld [vmem:[#allocation2 + $0x1a1] sm:$0xff] }
 0x134   : > { %v972_v26 = vadd.f32 %v6938_v13, %v678_v60  ;;  %7144 = vmatprep.mubr.msk.bf16.mxu1 %vm280_vm1, %v2497_v4  ;;  %v2794_v60 = vpack.c.bf16 %v2778_v52, %v2777_v29  ;;  %v683_v13 = vadd.f32 %v8163_v62, %v8195_v43  ;;  %v2500_v54 = vpack.c.bf16 %v2484_v35, %v2483_v41  ;;  %v3152_v52 = vld [vmem:[%s7722_s13 + $0x20] sm:$0xff] }
 0x135   : > { %v903_v19 = vpop.f32.mrf.mxu1  ;;  %v6973_v56 = vpop.f32.mrf.mxu0  ;;  %v686_v62 = vadd.f32 %v8176_v6, %v8195_v43  ;;  %v3153_v6 = vld [vmem:[%s7722_s13 + $0x28] sm:$0xff] }
 0x136   : > { %v970_v63 = vadd.f32 %v903_v19, %v676_v25  ;;  %v8335_v39 = vadd.f32 %v6972_v59, %v972_v26 }
 0x137   : > { %v6939_v20 = vpop.f32.mrf.mxu1  ;;  %v8337_v33 = vpop.f32.mrf.mxu0 }
 0x138   : > { %10038 = vst [vmem:[#allocation6_spill] sm:$0xff] %v8337_v33  ;;  %v973_v50 = vadd.f32 %v6939_v20, %v679_v10  ;;  %v8341_v47 = vadd.f32 %v1197_v37, %v970_v63 }
 0x139   : > { %v906_v51 = vpop.f32.mrf.mxu1  ;;  %v6976_v22 = vpop.f32.mrf.mxu0  ;;  %7179 = vmatmul.mubr.msk.bf16.gmra.mxu0 %vm280_vm1, %v2792_v44 }
 0x13a   : > { %v8346_v61 = vadd.f32 %v906_v51, %v677_v38  ;;  %7182 = vmatprep.mubr.msk.bf16.mxu0 %vm280_vm1, %v8167_v7  ;;  %v8350_v32 = vadd.f32 %v6973_v56, %v973_v50  ;;  %v3180_v56 = vpack.c.bf16 %v3149_v12, %v3148_v45  ;;  %v684_v38 = vadd.f32 %v8195_v43, %v8184_v11  ;;  %v3150_v51 = vld [vmem:[%s7722_s13 + $0x10] sm:$0xff] }
 0x13b   : > { %v6942_v15 = vpop.f32.mrf.mxu1  ;;  %7145 = vmatmul.mubr.msk.bf16.gmra.mxu1 %vm280_vm1, %v2498_v24  ;;  %v1213_v1 = vpop.f32.mrf.mxu0  ;;  %v3182_v12 = vpack.c.bf16 %v3153_v6, %v3152_v52 }
 0x13c   : > { %10039 = vst [vmem:[#allocation7_spill] sm:$0xff] %v8346_v61  ;;  %v976_v4 = vadd.f32 %v6942_v15, %v682_v31  ;;  %7148 = vmatprep.mubr.msk.bf16.mxu1 %vm280_vm1, %v8063_v23  ;;  %v681_v23 = vadd.f32 %v8195_v43, %v8169_v8  ;;  %v10042_v15 = vld [vmem:[#allocation4_spill] sm:$0xff] }
 0x13d   : > { %v919_v59 = vpop.f32.mrf.mxu1  ;;  %v6977_v7 = vpop.f32.mrf.mxu0 }
 0x13e   : > { %v974_v37 = vadd.f32 %v919_v59, %v680_v40  ;;  %v8361_v25 = vadd.f32 %v6976_v22, %v976_v4  ;;  %v3151_v22 = vld [vmem:[%s7722_s13 + $0x18] sm:$0xff]  ;;  %v10044_v59 = vld [vmem:[#allocation5_spill] sm:$0xff] }
 0x13f   : > { %v6943_v26 = vpop.f32.mrf.mxu1  ;;  %v8363_v49 = vpop.f32.mrf.mxu0  ;;  %v3181_v11 = vpack.c.bf16 %v3151_v22, %v3150_v51 }
 0x140   : > { %10040 = vst [vmem:[#allocation8_spill] sm:$0xff] %v8363_v49  ;;  %v977_v5 = vadd.f32 %v6943_v26, %v683_v13  ;;  %v8367_v19 = vadd.f32 %v1213_v1, %v974_v37  ;;  %v687_v1 = vadd.f32 %v10042_v15, %v8195_v43 }
 0x141   : > { %v922_v44 = vpop.f32.mrf.mxu1  ;;  %v6980_v10 = vpop.f32.mrf.mxu0  ;;  %7183 = vmatmul.mubr.msk.bf16.gmra.mxu0 %vm280_vm1, %v2794_v60 }
 0x142   : > { %v8372_v63 = vadd.f32 %v922_v44, %v681_v23  ;;  %v8374_v20 = vadd.f32 %v6977_v7, %v977_v5  ;;  %v685_v7 = vadd.f32 %v8195_v43, %v10044_v59  ;;  %v3154_v43 = vld [vmem:[%s7722_s13 + $0x30] sm:$0xff]  ;;  %v3155_v44 = vld [vmem:[%s7722_s13 + $0x38] sm:$0xff] }
 0x143   : > { %v6946_v8 = vpop.f32.mrf.mxu1  ;;  %7149 = vmatmul.mubr.msk.bf16.gmra.mxu1 %vm280_vm1, %v2500_v54  ;;  %v1229_v24 = vpop.f32.mrf.mxu0  ;;  %v3159_v59 = vld [vmem:[%s7722_s13 + $0x58] sm:$0xff] }
 0x144   : > { %10041 = vst [vmem:[#allocation9_spill] sm:$0xff] %v8372_v63  ;;  %v980_v50 = vadd.f32 %v6946_v8, %v686_v62  ;;  %7188 = vmatprep.mubr.msk.bf16.mxu1 %vm280_vm1, %v3180_v56  ;;  %v3156_v8 = vld [vmem:[%s7722_s13 + $0x40] sm:$0xff] }
 0x145   : > { %v935_v31 = vpop.f32.mrf.mxu1  ;;  %v6981_v29 = vpop.f32.mrf.mxu0 }
 0x146   : > { %v978_v40 = vadd.f32 %v935_v31, %v684_v38  ;;  %v8386_v4 = vadd.f32 %v6980_v10, %v980_v50  ;;  %v3183_v31 = vpack.c.bf16 %v3155_v44, %v3154_v43 }
 0x147   : > { %v6947_v41 = vpop.f32.mrf.mxu1  ;;  %v8388_v35 = vpop.f32.mrf.mxu0 }
 0x148   : > { %10043 = vst [vmem:[#allocation4_spill] sm:$0xff] %v8388_v35  ;;  %v981_v60 = vadd.f32 %v6947_v41, %v687_v1  ;;  %v8392_v45 = vadd.f32 %v1229_v24, %v978_v40  ;;  %v3157_v24 = vld [vmem:[%s7722_s13 + $0x48] sm:$0xff]  ;;  %v10046_v1 = vmov 0.0  }
 0x149   : > { %v938_v13 = vpop.f32.mrf.mxu1  ;;  %v7020_v37 = vpop.f32.mrf.mxu0  ;;  %3074 = vst.msk [vmem:[#allocation3] sm:$0xff] %vm3073_vm5, %v10046_v1  ;;  %3075 = vst.msk [vmem:[#allocation3 + $0x8] sm:$0xff] %vm3073_vm5, %v10046_v1 }
 0x14a   : > { %v8394_v26 = vadd.f32 %v938_v13, %v685_v7  ;;  %v8396_v54 = vadd.f32 %v6981_v29, %v981_v60  ;;  %3079 = vst.msk [vmem:[#allocation3 + $0x198] sm:$0xff] %vm3073_vm5, %v10046_v1  ;;  %3080 = vst.msk [vmem:[#allocation3 + $0x1a0] sm:$0xff] %vm3073_vm5, %v10046_v1  ;;  %v3161_v13 = vld [vmem:[%s7722_s13 + $0x68] sm:$0xff] }
 0x14b   : > { %v6986_v23 = vpop.f32.mrf.mxu1  ;;  %v1705_v5 = vpop.f32.mrf.mxu0  ;;  %7189 = vmatmul.mubr.msk.bf16.vlgmr.msra.gmra.mxu1 %vm280_vm1, %v3181_v11  ;;  %3084 = vst.msk [vmem:[#allocation3 + $0x18] sm:$0x1] %vm3083_vm6, %v10046_v1  ;;  %3085 = vst.msk [vmem:[#allocation3 + $0x30] sm:$0x1] %vm3083_vm6, %v10046_v1  ;;  %v3158_v11 = vld [vmem:[%s7722_s13 + $0x50] sm:$0xff] }
 0x14c   : > { %10045 = vst [vmem:[#allocation5_spill] sm:$0xff] %v8394_v26  ;;  %v1540_v56 = vadd.f32 %v6986_v23, %v8210_v48  ;;  %7192 = vmatprep.mubr.msk.bf16.mxu1 %vm280_vm1, %v3182_v12  ;;  %v3184_v48 = vpack.c.bf16 %v3157_v24, %v3156_v8  ;;  %3086 = vst.msk [vmem:[#allocation3 + $0x48] sm:$0x1] %vm3083_vm6, %v10046_v1  ;;  %v3160_v12 = vld [vmem:[%s7722_s13 + $0x60] sm:$0xff]  ;;  %v3185_v43 = vpack.c.bf16 %v3159_v59, %v3158_v11 }
 0x14d   : > { %v1411_v10 = vpop.f32.mrf.mxu1  ;;  %v7021_v62 = vpop.f32.mrf.mxu0  ;;  %3087 = vst.msk [vmem:[#allocation3 + $0x60] sm:$0x1] %vm3083_vm6, %v10046_v1  ;;  %3088 = vst.msk [vmem:[#allocation3 + $0x78] sm:$0x1] %vm3083_vm6, %v10046_v1 }
 0x14e   : > { %v1538_v38 = vadd.f32 %v1411_v10, %v8213_v3  ;;  %v8406_v50 = vadd.f32 %v7020_v37, %v1540_v56  ;;  %3089 = vst.msk [vmem:[#allocation3 + $0x90] sm:$0x1] %vm3083_vm6, %v10046_v1  ;;  %3090 = vst.msk [vmem:[#allocation3 + $0xa8] sm:$0x1] %vm3083_vm6, %v10046_v1 }
 0x14f   : > { %v6987_v51 = vpop.f32.mrf.mxu1  ;;  %v8408_v22 = vpop.f32.mrf.mxu0  ;;  %3091 = vst.msk [vmem:[#allocation3 + $0xc0] sm:$0x1] %vm3083_vm6, %v10046_v1  ;;  %3092 = vst.msk [vmem:[#allocation3 + $0xd8] sm:$0x1] %vm3083_vm6, %v10046_v1 }
 0x150   : > { %v1541_v29 = vadd.f32 %v6987_v51, %v8221_v57  ;;  %v8411_v52 = vadd.f32 %v1705_v5, %v1538_v38  ;;  %3093 = vst.msk [vmem:[#allocation3 + $0xf0] sm:$0x1] %vm3083_vm6, %v10046_v1  ;;  %3094 = vst.msk [vmem:[#allocation3 + $0x108] sm:$0x1] %vm3083_vm6, %v10046_v1  ;;  %v3418_v11 = vld [vmem:[#allocation3 + $0x8] sm:$0xff] }
 0x151   : > { %v1414_v6 = vpop.f32.mrf.mxu1  ;;  %v7024_v15 = vpop.f32.mrf.mxu0  ;;  %3095 = vst.msk [vmem:[#allocation3 + $0x120] sm:$0x1] %vm3083_vm6, %v10046_v1  ;;  %3096 = vst.msk [vmem:[#allocation3 + $0x138] sm:$0x1] %vm3083_vm6, %v10046_v1 }
 0x152   : > { %v8422_v3 = vadd.f32 %v1414_v6, %v8229_v14  ;;  %v8424_v57 = vadd.f32 %v7021_v62, %v1541_v29  ;;  %3097 = vst.msk [vmem:[#allocation3 + $0x150] sm:$0x1] %vm3083_vm6, %v10046_v1  ;;  %3098 = vst.msk [vmem:[#allocation3 + $0x168] sm:$0x1] %vm3083_vm6, %v10046_v1  ;;  %v3163_v29 = vld [vmem:[%s7722_s13 + $0x78] sm:$0xff] }
 0x153   : > { %3099 = vst.msk [vmem:[#allocation3 + $0x180] sm:$0x1] %vm3083_vm6, %v10046_v1  ;;  %3100 = vst.msk [vmem:[#allocation3 + $0x29] sm:$0x1] %vm3083_vm6, %v10046_v1  ;;  %v6990_v14 = vpop.f32.mrf.mxu1  ;;  %v1721_v40 = vpop.f32.mrf.mxu0  ;;  %7193 = vmatmul.mubr.msk.bf16.gmra.mxu1 %vm280_vm1, %v3183_v31 }
 0x154   : > { %3101 = vst.msk [vmem:[#allocation3 + $0x41] sm:$0x1] %vm3083_vm6, %v10046_v1  ;;  %3102 = vst.msk [vmem:[#allocation3 + $0x59] sm:$0x1] %vm3083_vm6, %v10046_v1  ;;  %v1544_v41 = vadd.f32 %v6990_v14, %v8233_v55  ;;  %7196 = vmatprep.mubr.msk.bf16.mxu1 %vm280_vm1, %v3184_v48 }
 0x155   : > { %3103 = vst.msk [vmem:[#allocation3 + $0x71] sm:$0x1] %vm3083_vm6, %v10046_v1  ;;  %3104 = vst.msk [vmem:[#allocation3 + $0x89] sm:$0x1] %vm3083_vm6, %v10046_v1  ;;  %v1427_v7 = vpop.f32.mrf.mxu1  ;;  %v7025_v60 = vpop.f32.mrf.mxu0 }
 0x156   : > { %3105 = vst.msk [vmem:[#allocation3 + $0xa1] sm:$0x1] %vm3083_vm6, %v10046_v1  ;;  %3106 = vst.msk [vmem:[#allocation3 + $0xb9] sm:$0x1] %vm3083_vm6, %v10046_v1  ;;  %v1542_v37 = vadd.f32 %v1427_v7, %v8237_v42  ;;  %v8498_v23 = vadd.f32 %v7024_v15, %v1544_v41  ;;  %v3186_v42 = vpack.c.bf16 %v3161_v13, %v3160_v12  ;;  %v3164_v15 = vld [vmem:[%s7722_s13 + $0x80] sm:$0xff]  ;;  %v3417_v41 = vld [vmem:[#allocation3] sm:$0xff] }
 0x157   : > { %3107 = vst.msk [vmem:[#allocation3 + $0xd1] sm:$0x1] %vm3083_vm6, %v10046_v1  ;;  %3108 = vst.msk [vmem:[#allocation3 + $0xe9] sm:$0x1] %vm3083_vm6, %v10046_v1  ;;  %v6991_v5 = vpop.f32.mrf.mxu1  ;;  %v8500_v56 = vpop.f32.mrf.mxu0  ;;  %v3449_v12 = vpack.c.bf16 %v3418_v11, %v3417_v41  ;;  %v8556_v41 = vld [vmem:[%s10028_s3 + $0x8] sm:$0xf] }
 0x158   : > { %3109 = vst.msk [vmem:[#allocation3 + $0x101] sm:$0x1] %vm3083_vm6, %v10046_v1  ;;  %3110 = vst.msk [vmem:[#allocation3 + $0x119] sm:$0x1] %vm3083_vm6, %v10046_v1  ;;  %v1545_v55 = vadd.f32 %v6991_v5, %v8245_v53  ;;  %v8505_v44 = vadd.f32 %v1721_v40, %v1542_v37  ;;  %v3162_v53 = vld [vmem:[%s7722_s13 + $0x70] sm:$0xff]  ;;  %7541 = vmatprep.subr.msk.bf16.mxu0 %vm3514_vm4, %v8556_v41 }
 0x159   : > { %3111 = vst.msk [vmem:[#allocation3 + $0x131] sm:$0x1] %vm3083_vm6, %v10046_v1  ;;  %3112 = vst.msk [vmem:[#allocation3 + $0x149] sm:$0x1] %vm3083_vm6, %v10046_v1  ;;  %v1430_v10 = vpop.f32.mrf.mxu1  ;;  %v7028_v62 = vpop.f32.mrf.mxu0  ;;  %7222 = vmatprep.mubr.msk.bf16.mxu0 %vm3073_vm5, %v3449_v12 }
 0x15a   : > { %3113 = vst.msk [vmem:[#allocation3 + $0x161] sm:$0x1] %vm3083_vm6, %v10046_v1  ;;  %3114 = vst.msk [vmem:[#allocation3 + $0x179] sm:$0x1] %vm3083_vm6, %v10046_v1  ;;  %v8508_v8 = vadd.f32 %v1430_v10, %v8253_v30  ;;  %v8510_v24 = vadd.f32 %v7025_v60, %v1545_v55  ;;  %v6417_v30 = vld [vmem:[%s10028_s3 + $0x4] sm:$0xf]  ;;  %v3187_v60 = vpack.c.bf16 %v3163_v29, %v3162_v53 }
 0x15b   : > { %3115 = vst.msk [vmem:[#allocation3 + $0x191] sm:$0x1] %vm3083_vm6, %v10046_v1  ;;  %v6994_v38 = vpop.f32.mrf.mxu1  ;;  %v1737_v51 = vpop.f32.mrf.mxu0  ;;  %7197 = vmatmul.mubr.msk.bf16.gmra.mxu1 %vm280_vm1, %v3185_v43  ;;  %7540 = vmatprep.subr.msk.bf16.mxu1 %vm3514_vm4, %v6417_v30  ;;  %v3168_v29 = vld [vmem:[%s7722_s13 + $0xa0] sm:$0xff] }
 0x15c   : > { %3077 = vst.msk [vmem:[#allocation3 + $0x10] sm:$0x3] %vm3076_vm7, %v10046_v1  ;;  %3081 = vst.msk [vmem:[#allocation3 + $0x1a8] sm:$0x3] %vm3076_vm7, %v10046_v1  ;;  %v1548_v31 = vadd.f32 %v6994_v38, %v8260_v16  ;;  %7200 = vmatprep.mubr.msk.bf16.mxu1 %vm280_vm1, %v3186_v42  ;;  %v3165_v1 = vld [vmem:[%s7722_s13 + $0x88] sm:$0xff]  ;;  %v3816_v16 = vsel %vm3514_vm4, %v6417_v30, 0 }
 0x15d   : > { %v1443_v48 = vpop.f32.mrf.mxu1  ;;  %v7029_v6 = vpop.f32.mrf.mxu0  ;;  %7255 = vmatpush3.bf16.msra.mxu1 %v3816_v16  ;;  %v3166_v38 = vld [vmem:[%s7722_s13 + $0x90] sm:$0xff] }
 0x15e   : > { %v1546_v14 = vadd.f32 %v1443_v48, %v8266_v2  ;;  %v8523_v40 = vadd.f32 %v7028_v62, %v1548_v31  ;;  %v3188_v2 = vpack.c.bf16 %v3165_v1, %v3164_v15  ;;  %v3169_v48 = vld [vmem:[%s7722_s13 + $0xa8] sm:$0xff] }
 0x15f   : > { %v6995_v59 = vpop.f32.mrf.mxu1  ;;  %v8527_v7 = vpop.f32.mrf.mxu0  ;;  %v3190_v16 = vpack.c.bf16 %v3169_v48, %v3168_v29 }
 0x160   : > { %v1549_v13 = vadd.f32 %v6995_v59, %v8274_v27  ;;  %v8530_v37 = vadd.f32 %v1737_v51, %v1546_v14  ;;  %v3167_v51 = vld [vmem:[%s7722_s13 + $0x98] sm:$0xff] }
 0x161   : > { %v1446_v5 = vpop.f32.mrf.mxu1  ;;  %v7032_v43 = vpop.f32.mrf.mxu0  ;;  %v3189_v30 = vpack.c.bf16 %v3167_v51, %v3166_v38 }
 0x162   : > { %v8534_v55 = vadd.f32 %v1446_v5, %v8287_v21  ;;  %v8536_v42 = vadd.f32 %v7029_v6, %v1549_v13  ;;  %v3171_v5 = vld [vmem:[%s7722_s13 + $0xb8] sm:$0xff] }
 0x163   : > { %v6998_v10 = vpop.f32.mrf.mxu1  ;;  %v1753_v62 = vpop.f32.mrf.mxu0  ;;  %7201 = vmatmul.mubr.msk.bf16.gmra.mxu1 %vm280_vm1, %v3187_v60 }
 0x164   : > { %v1552_v27 = vadd.f32 %v6998_v10, %v8291_v17  ;;  %7204 = vmatprep.mubr.msk.bf16.mxu1 %vm280_vm1, %v3188_v2  ;;  %v3170_v2 = vld [vmem:[%s7722_s13 + $0xb0] sm:$0xff] }
 0x165   : > { %v1459_v31 = vpop.f32.mrf.mxu1  ;;  %v7033_v53 = vpop.f32.mrf.mxu0 }
 0x166   : > { %v1550_v15 = vadd.f32 %v1459_v31, %v8295_v36  ;;  %v8546_v21 = vadd.f32 %v7032_v43, %v1552_v27  ;;  %v3173_v27 = vld [vmem:[%s7722_s13 + $0xc8] sm:$0xff] }
 0x167   : > { %v6999_v6 = vpop.f32.mrf.mxu1  ;;  %v8548_v1 = vpop.f32.mrf.mxu0 }
 0x168   : > { %v1553_v17 = vadd.f32 %v6999_v6, %v8302_v0  ;;  %v8551_v14 = vadd.f32 %v1753_v62, %v1550_v15  ;;  %v3172_v62 = vld [vmem:[%s7722_s13 + $0xc0] sm:$0xff] }
 0x169   : > { %v1462_v36 = vpop.f32.mrf.mxu1  ;;  %v7036_v11 = vpop.f32.mrf.mxu0  ;;  %v3192_v48 = vpack.c.bf16 %v3173_v27, %v3172_v62 }
 0x16a   : > { %v8561_v59 = vadd.f32 %v1462_v36, %v8309_v18  ;;  %v8563_v60 = vadd.f32 %v7033_v53, %v1553_v17  ;;  %v3191_v53 = vpack.c.bf16 %v3171_v5, %v3170_v2  ;;  %v3174_v36 = vld [vmem:[%s7722_s13 + $0xd0] sm:$0xff] }
 0x16b   : > { %v7002_v0 = vpop.f32.mrf.mxu1  ;;  %v1769_v12 = vpop.f32.mrf.mxu0  ;;  %7205 = vmatmul.mubr.msk.bf16.gmra.mxu1 %vm280_vm1, %v3189_v30 }
 0x16c   : > { %v1556_v13 = vadd.f32 %v7002_v0, %v8313_v58  ;;  %7208 = vmatprep.mubr.msk.bf16.mxu1 %vm280_vm1, %v3190_v16 }
 0x16d   : > { %v1475_v43 = vpop.f32.mrf.mxu1  ;;  %v7037_v10 = vpop.f32.mrf.mxu0 }
 0x16e   : > { %v1554_v38 = vadd.f32 %v1475_v43, %v8319_v9  ;;  %v8573_v18 = vadd.f32 %v7036_v11, %v1556_v13  ;;  %v3175_v11 = vld [vmem:[%s7722_s13 + $0xd8] sm:$0xff]  ;;  %v3177_v13 = vld [vmem:[%s7722_s13 + $0xe8] sm:$0xff] }
 0x16f   : > { %v7003_v51 = vpop.f32.mrf.mxu1  ;;  %v8575_v31 = vpop.f32.mrf.mxu0  ;;  %v3193_v62 = vpack.c.bf16 %v3175_v11, %v3174_v36  ;;  %v3718_v11 = vld [vmem:[#allocation3 + $0x9] sm:$0xff] }
 0x170   : > { %10047 = vst [vmem:[#allocation10_spill] sm:$0xff] %v8573_v18  ;;  %10048 = vst [vmem:[#allocation11_spill] sm:$0xff] %v8575_v31  ;;  %v1557_v58 = vadd.f32 %v7003_v51, %v8327_v34  ;;  %v8578_v29 = vadd.f32 %v1769_v12, %v1554_v38  ;;  %v3176_v12 = vld [vmem:[%s7722_s13 + $0xe0] sm:$0xff] }
 0x171   : > { %v8580_v15 = vpop.f32.mrf.mxu1  ;;  %v7040_v6 = vpop.f32.mrf.mxu0  ;;  %v3194_v38 = vpack.c.bf16 %v3177_v13, %v3176_v12 }
 0x172   : > { %10049 = vst [vmem:[#allocation12_spill] sm:$0xff] %v8578_v29  ;;  %10050 = vst [vmem:[#allocation13_spill] sm:$0xff] %v8580_v15  ;;  %v8582_v30 = vadd.f32 %v7037_v10, %v1557_v58 }
 0x173   : > { %v7006_v9 = vpop.f32.mrf.mxu1  ;;  %v1785_v17 = vpop.f32.mrf.mxu0  ;;  %7209 = vmatmul.mubr.msk.bf16.gmra.mxu1 %vm280_vm1, %v3191_v53 }
 0x174   : > { %10051 = vst [vmem:[#allocation14_spill] sm:$0xff] %v8582_v30  ;;  %v1560_v16 = vadd.f32 %v7006_v9, %v8335_v39  ;;  %7212 = vmatprep.mubr.msk.bf16.mxu1 %vm280_vm1, %v3192_v48  ;;  %v3178_v9 = vld [vmem:[%s7722_s13 + $0xf0] sm:$0xff] }
 0x175   : > { %v1491_v34 = vpop.f32.mrf.mxu1  ;;  %v7041_v0 = vpop.f32.mrf.mxu0 }
 0x176   : > { %v1558_v2 = vadd.f32 %v1491_v34, %v8341_v47  ;;  %v8592_v5 = vadd.f32 %v7040_v6, %v1560_v16  ;;  %v3179_v16 = vld [vmem:[%s7722_s13 + $0xf8] sm:$0xff] }
 0x177   : > { %v7007_v43 = vpop.f32.mrf.mxu1  ;;  %v8594_v10 = vpop.f32.mrf.mxu0 }
 0x178   : > { %10052 = vst [vmem:[#allocation15_spill] sm:$0xff] %v8592_v5  ;;  %10053 = vst [vmem:[#allocation16_spill] sm:$0xff] %v8594_v10  ;;  %v1561_v39 = vadd.f32 %v7007_v43, %v8350_v32  ;;  %v8597_v27 = vadd.f32 %v1785_v17, %v1558_v2  ;;  %v3717_v17 = vld [vmem:[#allocation3 + $0x1] sm:$0xff]  ;;  %v3195_v2 = vpack.c.bf16 %v3179_v16, %v3178_v9 }
 0x179   : > { %v8599_v51 = vpop.f32.mrf.mxu1  ;;  %v7044_v53 = vpop.f32.mrf.mxu0 }
 0x17a   : > { %10054 = vst [vmem:[#allocation17_spill] sm:$0xff] %v8597_v27  ;;  %10055 = vst [vmem:[#allocation18_spill] sm:$0xff] %v8599_v51  ;;  %v8601_v58 = vadd.f32 %v7041_v0, %v1561_v39 }
 0x17b   : > { %v7010_v48 = vpop.f32.mrf.mxu1  ;;  %v1801_v47 = vpop.f32.mrf.mxu0  ;;  %7213 = vmatmul.mubr.msk.bf16.gmra.mxu1 %vm280_vm1, %v3193_v62 }
 0x17c   : > { %10056 = vst [vmem:[#allocation19_spill] sm:$0xff] %v8601_v58  ;;  %v1564_v6 = vadd.f32 %v7010_v48, %v8361_v25  ;;  %7216 = vmatprep.mubr.msk.bf16.mxu1 %vm280_vm1, %v3194_v38  ;;  %v3749_v25 = vpack.c.bf16 %v3718_v11, %v3717_v17 }
 0x17d   : > { %v1507_v36 = vpop.f32.mrf.mxu1  ;;  %v7045_v32 = vpop.f32.mrf.mxu0 }
 0x17e   : > { %v1562_v34 = vadd.f32 %v1507_v36, %v8367_v19  ;;  %v8609_v12 = vadd.f32 %v7044_v53, %v1564_v6 }
 0x17f   : > { %v7011_v0 = vpop.f32.mrf.mxu1  ;;  %v8611_v13 = vpop.f32.mrf.mxu0 }
 0x180   : > { %10057 = vst [vmem:[#allocation20_spill] sm:$0xff] %v8609_v12  ;;  %10058 = vst [vmem:[#allocation21_spill] sm:$0xff] %v8611_v13  ;;  %v1565_v43 = vadd.f32 %v7011_v0, %v8374_v20  ;;  %v8614_v62 = vadd.f32 %v1801_v47, %v1562_v34 }
 0x181   : > { %v8616_v39 = vpop.f32.mrf.mxu1  ;;  %v7048_v38 = vpop.f32.mrf.mxu0 }
 0x182   : > { %10059 = vst [vmem:[#allocation22_spill] sm:$0xff] %v8614_v62  ;;  %10060 = vst [vmem:[#allocation23_spill] sm:$0xff] %v8616_v39  ;;  %v8618_v48 = vadd.f32 %v7045_v32, %v1565_v43 }
 0x183   : > { %v7014_v35 = vpop.f32.mrf.mxu1  ;;  %v1817_v26 = vpop.f32.mrf.mxu0  ;;  %7217 = vmatmul.mubr.msk.bf16.gmra.mxu1 %vm280_vm1, %v3195_v2 }
 0x184   : > { %10061 = vst [vmem:[#allocation24_spill] sm:$0xff] %v8618_v48  ;;  %v1568_v19 = vadd.f32 %v7014_v35, %v8386_v4  ;;  %7256 = vmatprep.mubr.msk.bf16.mxu1 %vm3073_vm5, %v3749_v25 }
 0x185   : > { %v1523_v53 = vpop.f32.mrf.mxu1  ;;  %v7049_v6 = vpop.f32.mrf.mxu0 }
 0x186   : > { %v1566_v20 = vadd.f32 %v1523_v53, %v8392_v45  ;;  %v8624_v47 = vadd.f32 %v7048_v38, %v1568_v19 }
 0x187   : > { %v7015_v9 = vpop.f32.mrf.mxu1  ;;  %v8626_v16 = vpop.f32.mrf.mxu0 }
 0x188   : > { %10062 = vst [vmem:[#allocation25_spill] sm:$0xff] %v8624_v47  ;;  %10063 = vst [vmem:[#allocation26_spill] sm:$0xff] %v8626_v16  ;;  %v1569_v36 = vadd.f32 %v7015_v9, %v8396_v54  ;;  %v8629_v32 = vadd.f32 %v1817_v26, %v1566_v20 }
 0x189   : > { %v8631_v17 = vpop.f32.mrf.mxu1  ;;  %v8633_v11 = vpop.f32.mrf.mxu0 }
 0x18a   : > { %10064 = vst [vmem:[#allocation27_spill] sm:$0xff] %v8629_v32  ;;  %10065 = vst [vmem:[#allocation28_spill] sm:$0xff] %v8631_v17  ;;  %v8635_v4 = vadd.f32 %v7049_v6, %v1569_v36  ;;  %v8674_v32 = vld [vmem:[%s10028_s3 + $0xc] sm:$0xf] }
 0x18b   : > { %v7054_v35 = vpop.f32.mrf.mxu1  ;;  %v8637_v34 = vpop.f32.mrf.mxu0  ;;  %7542 = vmatprep.subr.msk.bf16.mxu1 %vm3514_vm4, %v8674_v32 }
 0x18c   : > { %10066 = vst [vmem:[#allocation29_spill] sm:$0xff] %v8635_v4 }
 0x18d   : > { %v8639_v0 = vpop.f32.mrf.mxu1  ;;  %v8641_v45 = vpop.f32.mrf.mxu0 }
 0x18f   : > { %v8643_v2 = vpop.f32.mrf.mxu1  ;;  %v8645_v43 = vpop.f32.mrf.mxu0 }
 0x191   : > { %v8647_v54 = vpop.f32.mrf.mxu1  ;;  %v8649_v26 = vpop.f32.mrf.mxu0 }
 0x193   : > { %v8651_v25 = vpop.f32.mrf.mxu1  ;;  %v8653_v38 = vpop.f32.mrf.mxu0 }
 0x195   : > { %v8655_v19 = vpop.f32.mrf.mxu1  ;;  %v8657_v53 = vpop.f32.mrf.mxu0 }
 0x197   : > { %v8659_v6 = vpop.f32.mrf.mxu1  ;;  %v8661_v20 = vpop.f32.mrf.mxu0 }
 0x199   : > { %v8663_v9 = vpop.f32.mrf.mxu1  ;;  %v8665_v36 = vpop.f32.mrf.mxu0 }
 0x19b   : > { %v8667_v4 = vpop.f32.mrf.mxu1  ;;  %v8669_v16 = vpop.f32.mrf.mxu0 }
 0x19d   : > { %v8676_v47 = vpop.f32.mrf.mxu1  ;;  %v8678_v17 = vpop.f32.mrf.mxu0 }
 0x19f   : > { %v8682_v48 = vpop.f32.mrf.mxu1  ;;  %v8684_v13 = vpop.f32.mrf.mxu0 }
 0x1a1   : > { %v8686_v62 = vpop.f32.mrf.mxu1  ;;  %v8688_v12 = vpop.f32.mrf.mxu0 }
 0x1a3   : > { %v8690_v39 = vpop.f32.mrf.mxu1  ;;  %v8692_v58 = vpop.f32.mrf.mxu0 }
 0x1a4   : > { %10067 = vst [vmem:[#allocation30_spill] sm:$0xff] %v8692_v58 }
 0x1a5   : > { %v8694_v10 = vpop.f32.mrf.mxu1  ;;  %v8696_v27 = vpop.f32.mrf.mxu0 }
 0x1a6   : > { %10068 = vst [vmem:[#allocation31_spill] sm:$0xff] %v8696_v27 }
 0x1a7   : > { %v8698_v49 = vpop.f32.mrf.mxu1  ;;  %v8700_v63 = vpop.f32.mrf.mxu0 }
 0x1a8   : > { %10069 = vst [vmem:[#allocation32_spill] sm:$0xff] %v8700_v63 }
 0x1a9   : > { %v8702_v5 = vpop.f32.mrf.mxu1  ;;  %v8704_v51 = vpop.f32.mrf.mxu0 }
 0x1aa   : > { %10070 = vst [vmem:[#allocation33_spill] sm:$0xff] %v8702_v5  ;;  %10071 = vst [vmem:[#allocation34_spill] sm:$0xff] %v8704_v51 }
 0x1ab   : > { %v8706_v30 = vpop.f32.mrf.mxu1  ;;  %v8708_v31 = vpop.f32.mrf.mxu0 }
 0x1ac   : > { %10072 = vst [vmem:[#allocation35_spill] sm:$0xff] %v8706_v30  ;;  %10073 = vst [vmem:[#allocation36_spill] sm:$0xff] %v8708_v31 }
 0x1ad   : > { %v8710_v29 = vpop.f32.mrf.mxu1  ;;  %v8712_v33 = vpop.f32.mrf.mxu0 }
 0x1ae   : > { %10074 = vst [vmem:[#allocation37_spill] sm:$0xff] %v8710_v29  ;;  %10075 = vst [vmem:[#allocation38_spill] sm:$0xff] %v8712_v33 }
 0x1af   : > { %v8714_v61 = vpop.f32.mrf.mxu1  ;;  %v8716_v18 = vpop.f32.mrf.mxu0 }
 0x1b0   : > { %10076 = vst [vmem:[#allocation39_spill] sm:$0xff] %v8714_v61  ;;  %10077 = vst [vmem:[#allocation40_spill] sm:$0xff] %v8716_v18 }
 0x1b1   : > { %v8718_v27 = vpop.f32.mrf.mxu1  ;;  %v8720_v58 = vpop.f32.mrf.mxu0 }
 0x1b2   : > { %10078 = vst [vmem:[#allocation41_spill] sm:$0xff] %v8718_v27  ;;  %10079 = vst [vmem:[#allocation42_spill] sm:$0xff] %v8720_v58 }
 0x1b3   : > { %v8722_v63 = vpop.f32.mrf.mxu1  ;;  %v8724_v5 = vpop.f32.mrf.mxu0 }
 0x1b4   : > { %10080 = vst [vmem:[#allocation43_spill] sm:$0xff] %v8722_v63  ;;  %10081 = vst [vmem:[#allocation44_spill] sm:$0xff] %v8724_v5 }
 0x1b5   : > { %v8726_v51 = vpop.f32.mrf.mxu1  ;;  %v8728_v30 = vpop.f32.mrf.mxu0 }
 0x1b6   : > { %10082 = vst [vmem:[#allocation45_spill] sm:$0xff] %v8726_v51  ;;  %10083 = vst [vmem:[#allocation46_spill] sm:$0xff] %v8728_v30 }
 0x1b7   : > { %v8730_v31 = vpop.f32.mrf.mxu1  ;;  %v8732_v29 = vpop.f32.mrf.mxu0 }
 0x1b8   : > { %10084 = vst [vmem:[#allocation47_spill] sm:$0xff] %v8730_v31  ;;  %10085 = vst [vmem:[#allocation48_spill] sm:$0xff] %v8732_v29 }
 0x1b9   : > { %v8734_v33 = vpop.f32.mrf.mxu1  ;;  %v8736_v61 = vpop.f32.mrf.mxu0 }
 0x1ba   : > { %10086 = vst [vmem:[#allocation49_spill] sm:$0xff] %v8734_v33  ;;  %10087 = vst [vmem:[#allocation50_spill] sm:$0xff] %v8736_v61 }
 0x1bb   : > { %v8738_v18 = vpop.f32.mrf.mxu1  ;;  %v8740_v27 = vpop.f32.mrf.mxu0 }
 0x1bc   : > { %10088 = vst [vmem:[#allocation51_spill] sm:$0xff] %v8738_v18  ;;  %10089 = vst [vmem:[#allocation52_spill] sm:$0xff] %v8740_v27  ;;  %v2128_v27 = vadd.f32 %v7054_v35, %v8406_v50 }
 0x1bd   : > { %v8742_v58 = vpop.f32.mrf.mxu1  ;;  %v8744_v63 = vpop.f32.mrf.mxu0 }
 0x1be   : > { %10090 = vst [vmem:[#allocation53_spill] sm:$0xff] %v8742_v58  ;;  %10091 = vst [vmem:[#allocation54_spill] sm:$0xff] %v8744_v63 }
 0x1bf   : > { %v8746_v5 = vpop.f32.mrf.mxu1  ;;  %v8748_v51 = vpop.f32.mrf.mxu0 }
 0x1c0   : > { %10092 = vst [vmem:[#allocation55_spill] sm:$0xff] %v8746_v5  ;;  %10093 = vst [vmem:[#allocation56_spill] sm:$0xff] %v8748_v51  ;;  %v2126_v51 = vadd.f32 %v8639_v0, %v8411_v52  ;;  %v2132_v52 = vadd.f32 %v8651_v25, %v8498_v23 }
 0x1c1   : > { %v8750_v30 = vpop.f32.mrf.mxu1  ;;  %v8752_v31 = vpop.f32.mrf.mxu0 }
 0x1c2   : > { %10094 = vst [vmem:[#allocation57_spill] sm:$0xff] %v8750_v30  ;;  %10095 = vst [vmem:[#allocation58_spill] sm:$0xff] %v8752_v31  ;;  %v1833_v31 = vadd.f32 %v8408_v22, %v8422_v3 }
 0x1c3   : > { %v8754_v29 = vpop.f32.mrf.mxu1  ;;  %v8756_v33 = vpop.f32.mrf.mxu0 }
 0x1c4   : > { %10096 = vst [vmem:[#allocation59_spill] sm:$0xff] %v8754_v29  ;;  %10097 = vst [vmem:[#allocation60_spill] sm:$0xff] %v8756_v33  ;;  %v2129_v33 = vadd.f32 %v8643_v2, %v8424_v57  ;;  %v2127_v50 = vadd.f32 %v8647_v54, %v1833_v31  ;;  %v2130_v31 = vadd.f32 %v8655_v19, %v8505_v44 }
 0x1c5   : > { %v8758_v61 = vpop.f32.mrf.mxu1  ;;  %v8760_v18 = vpop.f32.mrf.mxu0 }
 0x1c6   : > { %10098 = vst [vmem:[#allocation61_spill] sm:$0xff] %v8758_v61  ;;  %10099 = vst [vmem:[#allocation62_spill] sm:$0xff] %v8760_v18  ;;  %v2423_v18 = vadd.f32 %v8633_v11, %v2128_v27  ;;  %v2424_v5 = vadd.f32 %v8641_v45, %v2129_v33  ;;  %v2422_v27 = vadd.f32 %v8645_v43, %v2127_v50 }
 0x1c7   : > { %v8763_v58 = vpop.f32.mrf.mxu1  ;;  %v8765_v63 = vpop.f32.mrf.mxu0  ;;  %v2133_v33 = vadd.f32 %v8659_v6, %v8510_v24 }
 0x1c8   : > { %10100 = vst [vmem:[#allocation63_spill] sm:$0xff] %v8763_v58  ;;  %10101 = vst [vmem:[#allocation64_spill] sm:$0xff] %v8765_v63  ;;  %v2421_v63 = vadd.f32 %v8637_v34, %v2126_v51  ;;  %v1837_v51 = vadd.f32 %v8500_v56, %v8508_v8 }
 0x1c9   : > { %v8771_v30 = vpop.f32.mrf.mxu1  ;;  %v7156_v29 = vpop.f32.mrf.mxu0  ;;  %v2428_v6 = vadd.f32 %v8657_v53, %v2133_v33  ;;  %v2137_v53 = vadd.f32 %v8682_v48, %v8536_v42  ;;  %v2140_v42 = vadd.f32 %v8690_v39, %v8546_v21 }
 0x1ca   : > { %10102 = vst [vmem:[#allocation65_spill] sm:$0xff] %v8771_v30  ;;  %v2131_v44 = vadd.f32 %v8663_v9, %v1837_v51 }
 0x1cb   : > { %v7122_v35 = vpop.f32.mrf.mxu1  ;;  %v2882_v58 = vpop.f32.mrf.mxu0  ;;  %v2432_v33 = vadd.f32 %v8678_v17, %v2137_v53 }
 0x1cc   : > { %v2717_v61 = vadd.f32 %v7122_v35, %v2423_v18  ;;  %v2426_v35 = vadd.f32 %v8661_v20, %v2131_v44 }
 0x1cd   : > { %v2588_v0 = vpop.f32.mrf.mxu1  ;;  %v7157_v22 = vpop.f32.mrf.mxu0 }
 0x1ce   : > { %v3011_v3 = vadd.f32 %v7156_v29, %v2717_v61  ;;  %v2715_v30 = vadd.f32 %v2588_v0, %v2421_v63  ;;  %v2427_v61 = vadd.f32 %v8649_v26, %v2132_v52  ;;  %v2134_v52 = vadd.f32 %v8676_v47, %v8530_v37 }
 0x1cf   : > { %v7123_v15 = vpop.f32.mrf.mxu1  ;;  %v2885_v57 = vpop.f32.mrf.mxu0  ;;  %v1841_v0 = vadd.f32 %v8527_v7, %v8534_v55 }
 0x1d0   : > { %v3043_v11 = vmax.f32 %v3011_v3, 0.0  ;;  %v3009_v18 = vadd.f32 %v2882_v58, %v2715_v30  ;;  %v2718_v2 = vadd.f32 %v7123_v15, %v2424_v5  ;;  %v2425_v5 = vadd.f32 %v8653_v38, %v2130_v31 }
 0x1d1   : > { %v2591_v23 = vpop.f32.mrf.mxu1  ;;  %v7160_v34 = vpop.f32.mrf.mxu0  ;;  %v2136_v58 = vadd.f32 %v8667_v4, %v8523_v40  ;;  %v2135_v47 = vadd.f32 %v8686_v62, %v1841_v0  ;;  %v4110_v62 = vsel %vm3514_vm4, %v8556_v41, 0 }
 0x1d2   : > { %3118 = vst.msk [vmem:[#allocation3 + $0x31] sm:$0xff] %vm3073_vm5, %v3043_v11  ;;  %v3041_v63 = vmax.f32 %v3009_v18, 0.0  ;;  %v3012_v29 = vadd.f32 %v7157_v22, %v2718_v2  ;;  %v2716_v45 = vadd.f32 %v2591_v23, %v2422_v27  ;;  %v2429_v2 = vadd.f32 %v8669_v16, %v2134_v52 }
 0x1d3   : > { %v7126_v43 = vpop.f32.mrf.mxu1  ;;  %v2898_v30 = vpop.f32.mrf.mxu0 }
 0x1d4   : > { %3116 = vst.msk [vmem:[#allocation3 + $0x19] sm:$0xff] %vm3073_vm5, %v3041_v63  ;;  %v3044_v15 = vmax.f32 %v3012_v29, 0.0  ;;  %v3010_v56 = vadd.f32 %v2885_v57, %v2716_v45  ;;  %v2721_v8 = vadd.f32 %v7126_v43, %v2427_v61  ;;  %v2431_v57 = vadd.f32 %v8665_v36, %v2136_v58 }
 0x1d5   : > { %v2604_v24 = vpop.f32.mrf.mxu1  ;;  %v7161_v54 = vpop.f32.mrf.mxu0  ;;  %v1261_v36 = vadd.f32 %v8315_v28, %v8324_v46  ;;  %v2138_v28 = vadd.f32 %v8694_v10, %v8551_v14  ;;  %v1845_v46 = vadd.f32 %v8548_v1, %v8561_v59  ;;  %v2430_v29 = vadd.f32 %v8684_v13, %v2135_v47 }
 0x1d6   : > { %3119 = vst.msk [vmem:[#allocation3 + $0x39] sm:$0xff] %vm3073_vm5, %v3044_v15  ;;  %v3042_v26 = vmax.f32 %v3010_v56, 0.0  ;;  %v3015_v25 = vadd.f32 %v7160_v34, %v2721_v8  ;;  %v2719_v19 = vadd.f32 %v2604_v24, %v2425_v5  ;;  %v4404_v43 = vsel %vm3514_vm4, %v8674_v32, 0 }
 0x1d7   : > { %v7127_v9 = vpop.f32.mrf.mxu1  ;;  %v2901_v50 = vpop.f32.mrf.mxu0  ;;  %v2141_v1 = vadd.f32 %v8698_v49, %v8563_v60  ;;  %v2435_v5 = vadd.f32 %v8688_v12, %v2140_v42  ;;  %v8843_v49 = vld [vmem:[%s10028_s3 + $0x10] sm:$0xf]  ;;  %v10103_v60 = vld [vmem:[#allocation13_spill] sm:$0xff]  ;;  %v10111_v42 = vld [vmem:[#allocation12_spill] sm:$0xff] }
 0x1d8   : > { %3117 = vst.msk [vmem:[#allocation3 + $0x21] sm:$0xff] %vm3073_vm5, %v3042_v26  ;;  %v3047_v38 = vmax.f32 %v3015_v25, 0.0  ;;  %v3013_v40 = vadd.f32 %v2898_v30, %v2719_v19  ;;  %v2722_v4 = vadd.f32 %v7127_v9, %v2428_v6  ;;  %v1555_v12 = vadd.f32 %v10103_v60, %v1261_v36  ;;  %v10104_v19 = vld [vmem:[#allocation33_spill] sm:$0xff]  ;;  %v10118_v60 = vld [vmem:[#allocation18_spill] sm:$0xff] }
 0x1d9   : > { %v2607_v22 = vpop.f32.mrf.mxu1  ;;  %v7164_v3 = vpop.f32.mrf.mxu0  ;;  %v3421_v10 = vld [vmem:[#allocation3 + $0x30] sm:$0xff]  ;;  %v2139_v6 = vadd.f32 %v10104_v19, %v1845_v46  ;;  %v10119_v19 = vld [vmem:[#allocation41_spill] sm:$0xff] }
 0x1da   : > { %3122 = vst.msk [vmem:[#allocation3 + $0x61] sm:$0xff] %vm3073_vm5, %v3047_v38  ;;  %v3045_v20 = vmax.f32 %v3013_v40, 0.0  ;;  %v3016_v27 = vadd.f32 %v7161_v54, %v2722_v4  ;;  %v2720_v37 = vadd.f32 %v2607_v22, %v2426_v35  ;;  %v3721_v32 = vld [vmem:[#allocation3 + $0x31] sm:$0xff]  ;;  %v8852_v35 = vld [vmem:[%s10028_s3 + $0x14] sm:$0xf] }
 0x1db   : > { %v7130_v31 = vpop.f32.mrf.mxu1  ;;  %v2914_v11 = vpop.f32.mrf.mxu0  ;;  %v3419_v63 = vld [vmem:[#allocation3 + $0x18] sm:$0xff]  ;;  %v10105_v4 = vld [vmem:[#allocation30_spill] sm:$0xff] }
 0x1dc   : > { %3120 = vst.msk [vmem:[#allocation3 + $0x49] sm:$0xff] %vm3073_vm5, %v3045_v20  ;;  %v3048_v18 = vmax.f32 %v3016_v27, 0.0  ;;  %v3014_v7 = vadd.f32 %v2901_v50, %v2720_v37  ;;  %v2725_v55 = vadd.f32 %v7130_v31, %v2431_v57  ;;  %v3719_v14 = vld [vmem:[#allocation3 + $0x19] sm:$0xff]  ;;  %v2433_v0 = vadd.f32 %v10105_v4, %v2138_v28  ;;  %v10108_v31 = vld [vmem:[#allocation31_spill] sm:$0xff]  ;;  %v10120_v4 = vld [vmem:[#allocation36_spill] sm:$0xff] }
 0x1dd   : > { %v2620_v48 = vpop.f32.mrf.mxu1  ;;  %v7165_v51 = vpop.f32.mrf.mxu0  ;;  %v3422_v16 = vld [vmem:[#allocation3 + $0x38] sm:$0xff]  ;;  %v10106_v22 = vld [vmem:[#allocation10_spill] sm:$0xff] }
 0x1de   : > { %3123 = vst.msk [vmem:[#allocation3 + $0x69] sm:$0xff] %vm3073_vm5, %v3048_v18  ;;  %v3046_v23 = vmax.f32 %v3014_v7, 0.0  ;;  %v3019_v34 = vadd.f32 %v7164_v3, %v2725_v55  ;;  %v2723_v61 = vadd.f32 %v2620_v48, %v2429_v2  ;;  %v3722_v44 = vld [vmem:[#allocation3 + $0x39] sm:$0xff]  ;;  %v8833_v58 = vpack.c.bf16 %v3422_v16, %v3421_v10  ;;  %v10107_v3 = vld [vmem:[#allocation35_spill] sm:$0xff] }
 0x1df   : > { %v7131_v21 = vpop.f32.mrf.mxu1  ;;  %v2917_v39 = vpop.f32.mrf.mxu0  ;;  %v3420_v41 = vld [vmem:[#allocation3 + $0x20] sm:$0xff]  ;;  %v8838_v25 = vpack.c.bf16 %v3722_v44, %v3721_v32  ;;  %v2144_v57 = vadd.f32 %v10107_v3, %v10106_v22  ;;  %v10109_v55 = vld [vmem:[#allocation7_spill] sm:$0xff]  ;;  %v10112_v48 = vld [vmem:[#allocation37_spill] sm:$0xff] }
 0x1e0   : > { %v3720_v45 = vld [vmem:[#allocation3 + $0x21] sm:$0xff]  ;;  %3121 = vst.msk [vmem:[#allocation3 + $0x51] sm:$0xff] %vm3073_vm5, %v3046_v23  ;;  %v3051_v17 = vmax.f32 %v3019_v34, 0.0  ;;  %v3017_v30 = vadd.f32 %v2914_v11, %v2723_v61  ;;  %v2726_v15 = vadd.f32 %v7131_v21, %v2432_v33  ;;  %v8826_v56 = vpack.c.bf16 %v3420_v41, %v3419_v63  ;;  %v10114_v33 = vld [vmem:[#allocation32_spill] sm:$0xff] }
 0x1e1   : > { %v2623_v59 = vpop.f32.mrf.mxu1  ;;  %v7168_v13 = vpop.f32.mrf.mxu0  ;;  %v8830_v8 = vpack.c.bf16 %v3720_v45, %v3719_v14  ;;  %v2436_v11 = vadd.f32 %v10108_v31, %v2141_v1  ;;  %v10110_v2 = vld [vmem:[#allocation6_spill] sm:$0xff]  ;;  %v2434_v63 = vadd.f32 %v10114_v33, %v2139_v6  ;;  %v10121_v22 = vld [vmem:[#allocation15_spill] sm:$0xff]  ;;  %v10129_v33 = vld [vmem:[#allocation40_spill] sm:$0xff] }
 0x1e2   : > { %3126 = vst.msk [vmem:[#allocation3 + $0x91] sm:$0xff] %vm3073_vm5, %v3051_v17  ;;  %v3049_v24 = vmax.f32 %v3017_v30, 0.0  ;;  %v3020_v54 = vadd.f32 %v7165_v51, %v2726_v15  ;;  %v2724_v26 = vadd.f32 %v2623_v59, %v2430_v29  ;;  %7223 = vmatmul.mubr.msk.bf16.vlgmr.msra.gmra.mxu0 %vm3073_vm5, %v8826_v56  ;;  %v1265_v36 = vadd.f32 %v10110_v2, %v10109_v55  ;;  %v3425_v44 = vld [vmem:[#allocation3 + $0x60] sm:$0xff]  ;;  %v10116_v17 = vld [vmem:[#allocation39_spill] sm:$0xff]  ;;  %v10124_v55 = vld [vmem:[#allocation9_spill] sm:$0xff] }
 0x1e3   : > { %7257 = vmatmul.mubr.msk.bf16.vlgmr.msra.gmra.mxu1 %vm3073_vm5, %v8830_v8  ;;  %7289 = vmatpush3.bf16.msra.mxu0 %v4110_v62  ;;  %v7134_v9 = vpop.f32.mrf.mxu1  ;;  %v2930_v50 = vpop.f32.mrf.mxu0  ;;  %v3423_v18 = vld [vmem:[#allocation3 + $0x48] sm:$0xff]  ;;  %v2142_v51 = vadd.f32 %v10112_v48, %v10111_v42  ;;  %v10117_v1 = vld [vmem:[#allocation34_spill] sm:$0xff]  ;;  %v10125_v2 = vld [vmem:[#allocation8_spill] sm:$0xff] }
 0x1e4   : > { %3124 = vst.msk [vmem:[#allocation3 + $0x79] sm:$0xff] %vm3073_vm5, %v3049_v24  ;;  %v3052_v52 = vmax.f32 %v3020_v54, 0.0  ;;  %v3018_v38 = vadd.f32 %v2917_v39, %v2724_v26  ;;  %v2729_v40 = vadd.f32 %v7134_v9, %v2435_v5  ;;  %7226 = vmatprep.mubr.msk.bf16.mxu0 %vm3073_vm5, %v8833_v58  ;;  %7260 = vmatprep.mubr.msk.bf16.mxu1 %vm3073_vm5, %v8838_v25  ;;  %v10113_v62 = vld [vmem:[#allocation11_spill] sm:$0xff]  ;;  %v10123_v31 = vld [vmem:[#allocation38_spill] sm:$0xff]  ;;  %v10126_v42 = vld [vmem:[#allocation17_spill] sm:$0xff] }
 0x1e5   : > { %v2636_v53 = vpop.f32.mrf.mxu1  ;;  %v7169_v20 = vpop.f32.mrf.mxu0  ;;  %7323 = vmatpush3.bf16.msra.mxu1 %v4404_v43  ;;  %7543 = vmatprep.subr.msk.bf16.mxu0 %vm3514_vm4, %v8843_v49  ;;  %v3426_v7 = vld [vmem:[#allocation3 + $0x68] sm:$0xff]  ;;  %v1849_v23 = vadd.f32 %v10113_v62, %v1555_v12  ;;  %v10115_v43 = vld [vmem:[#allocation14_spill] sm:$0xff]  ;;  %v2439_v59 = vadd.f32 %v10117_v1, %v2144_v57  ;;  %v1559_v12 = vadd.f32 %v10118_v60, %v1265_v36  ;;  %v10127_v48 = vld [vmem:[#allocation45_spill] sm:$0xff] }
 0x1e6   : > { %3127 = vst.msk [vmem:[#allocation3 + $0x99] sm:$0xff] %vm3073_vm5, %v3052_v52  ;;  %v3050_v27 = vmax.f32 %v3018_v38, 0.0  ;;  %v3023_v37 = vadd.f32 %v7168_v13, %v2729_v40  ;;  %v2727_v47 = vadd.f32 %v2636_v53, %v2433_v0  ;;  %7544 = vmatprep.subr.msk.bf16.mxu1 %vm3514_vm4, %v8852_v35  ;;  %v3726_v46 = vld [vmem:[#allocation3 + $0x69] sm:$0xff]  ;;  %v2145_v30 = vadd.f32 %v10116_v17, %v10115_v43  ;;  %v3725_v5 = vld [vmem:[#allocation3 + $0x61] sm:$0xff] }
 0x1e7   : > { %v7135_v34 = vpop.f32.mrf.mxu1  ;;  %v2933_v61 = vpop.f32.mrf.mxu0  ;;  %v3424_v16 = vld [vmem:[#allocation3 + $0x50] sm:$0xff]  ;;  %v8882_v13 = vpack.c.bf16 %v3426_v7, %v3425_v44  ;;  %v8887_v26 = vpack.c.bf16 %v3726_v46, %v3725_v5  ;;  %v2143_v6 = vadd.f32 %v10119_v19, %v1849_v23  ;;  %v2437_v0 = vadd.f32 %v10120_v4, %v2142_v51  ;;  %v10122_v3 = vld [vmem:[#allocation43_spill] sm:$0xff]  ;;  %v10132_v5 = vld [vmem:[#allocation42_spill] sm:$0xff] }
 0x1e8   : > { %v3724_v28 = vld [vmem:[#allocation3 + $0x51] sm:$0xff]  ;;  %3125 = vst.msk [vmem:[#allocation3 + $0x81] sm:$0xff] %vm3073_vm5, %v3050_v27  ;;  %v3055_v21 = vmax.f32 %v3023_v37, 0.0  ;;  %v3021_v39 = vadd.f32 %v2930_v50, %v2727_v47  ;;  %v2730_v29 = vadd.f32 %v7135_v34, %v2436_v11  ;;  %v8875_v41 = vpack.c.bf16 %v3424_v16, %v3423_v18  ;;  %v3723_v45 = vld [vmem:[#allocation3 + $0x49] sm:$0xff] }
 0x1e9   : > { %v2639_v15 = vpop.f32.mrf.mxu1  ;;  %v7172_v14 = vpop.f32.mrf.mxu0  ;;  %v8879_v10 = vpack.c.bf16 %v3724_v28, %v3723_v45  ;;  %v2148_v57 = vadd.f32 %v10122_v3, %v10121_v22  ;;  %v2440_v11 = vadd.f32 %v10123_v31, %v2145_v30  ;;  %v1269_v36 = vadd.f32 %v10125_v2, %v10124_v55  ;;  %v10128_v62 = vld [vmem:[#allocation16_spill] sm:$0xff]  ;;  %v10130_v17 = vld [vmem:[#allocation19_spill] sm:$0xff]  ;;  %v10138_v55 = vld [vmem:[#allocation46_spill] sm:$0xff] }
 0x1ea   : > { %3130 = vst.msk [vmem:[#allocation3 + $0xc1] sm:$0xff] %vm3073_vm5, %v3055_v21  ;;  %v3053_v32 = vmax.f32 %v3021_v39, 0.0  ;;  %v3024_v24 = vadd.f32 %v7169_v20, %v2730_v29  ;;  %v2728_v54 = vadd.f32 %v2639_v15, %v2434_v63  ;;  %7227 = vmatmul.mubr.msk.bf16.gmra.mxu0 %vm3073_vm5, %v8875_v41  ;;  %v2146_v51 = vadd.f32 %v10127_v48, %v10126_v42  ;;  %v3429_v43 = vld [vmem:[#allocation3 + $0x90] sm:$0xff]  ;;  %v10131_v30 = vld [vmem:[#allocation47_spill] sm:$0xff]  ;;  %v10139_v48 = vld [vmem:[#allocation5_spill] sm:$0xff] }
 0x1eb   : > { %7261 = vmatmul.mubr.msk.bf16.gmra.mxu1 %vm3073_vm5, %v8879_v10  ;;  %v7138_v9 = vpop.f32.mrf.mxu1  ;;  %7230 = vmatprep.mubr.msk.bf16.mxu0 %vm3073_vm5, %v8882_v13  ;;  %v2946_v50 = vpop.f32.mrf.mxu0  ;;  %v3427_v18 = vld [vmem:[#allocation3 + $0x78] sm:$0xff]  ;;  %v1853_v23 = vadd.f32 %v10128_v62, %v1559_v12  ;;  %v2438_v63 = vadd.f32 %v10129_v33, %v2143_v6  ;;  %v2149_v15 = vadd.f32 %v10131_v30, %v10130_v17  ;;  %v10140_v62 = vld [vmem:[#allocation4_spill] sm:$0xff] }
 0x1ec   : > { %3128 = vst.msk [vmem:[#allocation3 + $0xa9] sm:$0xff] %vm3073_vm5, %v3053_v32  ;;  %v3056_v52 = vmax.f32 %v3024_v24, 0.0  ;;  %v3022_v38 = vadd.f32 %v2933_v61, %v2728_v54  ;;  %v2733_v40 = vadd.f32 %v7138_v9, %v2439_v59  ;;  %7264 = vmatprep.mubr.msk.bf16.mxu1 %vm3073_vm5, %v8887_v26  ;;  %v3727_v44 = vld [vmem:[#allocation3 + $0x79] sm:$0xff]  ;;  %v2443_v32 = vadd.f32 %v10132_v5, %v2148_v57  ;;  %v3729_v54 = vld [vmem:[#allocation3 + $0x91] sm:$0xff]  ;;  %v10133_v9 = vld [vmem:[#allocation23_spill] sm:$0xff] }
 0x1ed   : > { %v2652_v53 = vpop.f32.mrf.mxu1  ;;  %v7173_v20 = vpop.f32.mrf.mxu0  ;;  %v3430_v7 = vld [vmem:[#allocation3 + $0x98] sm:$0xff]  ;;  %v10135_v57 = vld [vmem:[#allocation44_spill] sm:$0xff]  ;;  %v2444_v2 = vadd.f32 %v10138_v55, %v2149_v15 }
 0x1ee   : > { %3131 = vst.msk [vmem:[#allocation3 + $0xc9] sm:$0xff] %vm3073_vm5, %v3056_v52  ;;  %v3054_v27 = vmax.f32 %v3022_v38, 0.0  ;;  %v3027_v37 = vadd.f32 %v7172_v14, %v2733_v40  ;;  %v2731_v47 = vadd.f32 %v2652_v53, %v2437_v0  ;;  %v3730_v46 = vld [vmem:[#allocation3 + $0x99] sm:$0xff]  ;;  %v8917_v24 = vpack.c.bf16 %v3430_v7, %v3429_v43  ;;  %v10145_v5 = vld [vmem:[#allocation24_spill] sm:$0xff] }
 0x1ef   : > { %v7139_v34 = vpop.f32.mrf.mxu1  ;;  %v2949_v61 = vpop.f32.mrf.mxu0  ;;  %v3428_v16 = vld [vmem:[#allocation3 + $0x80] sm:$0xff]  ;;  %v8922_v6 = vpack.c.bf16 %v3730_v46, %v3729_v54  ;;  %v10134_v52 = vld [vmem:[#allocation49_spill] sm:$0xff]  ;;  %v2441_v53 = vadd.f32 %v10135_v57, %v2146_v51  ;;  %v10144_v46 = vld [vmem:[#allocation48_spill] sm:$0xff] }
 0x1f0   : > { %v3728_v28 = vld [vmem:[#allocation3 + $0x81] sm:$0xff]  ;;  %3129 = vst.msk [vmem:[#allocation3 + $0xb1] sm:$0xff] %vm3073_vm5, %v3054_v27  ;;  %v3059_v21 = vmax.f32 %v3027_v37, 0.0  ;;  %v3025_v39 = vadd.f32 %v2946_v50, %v2731_v47  ;;  %v2734_v29 = vadd.f32 %v7139_v34, %v2440_v11  ;;  %v8910_v45 = vpack.c.bf16 %v3428_v16, %v3427_v18  ;;  %v10143_v33 = vld [vmem:[#allocation21_spill] sm:$0xff] }
 0x1f1   : > { %v2655_v14 = vpop.f32.mrf.mxu1  ;;  %v7176_v1 = vpop.f32.mrf.mxu0  ;;  %v8914_v59 = vpack.c.bf16 %v3728_v28, %v3727_v44  ;;  %v1563_v50 = vadd.f32 %v10133_v9, %v1269_v36  ;;  %v2147_v38 = vadd.f32 %v10134_v52, %v1853_v23  ;;  %v10137_v27 = vld [vmem:[#allocation51_spill] sm:$0xff]  ;;  %v1273_v23 = vadd.f32 %v10140_v62, %v10139_v48  ;;  %v10141_v34 = vld [vmem:[#allocation22_spill] sm:$0xff]  ;;  %v10151_v55 = vld [vmem:[#allocation25_spill] sm:$0xff] }
 0x1f2   : > { %3134 = vst.msk [vmem:[#allocation3 + $0xf1] sm:$0xff] %vm3073_vm5, %v3059_v21  ;;  %v3057_v60 = vmax.f32 %v3025_v39, 0.0  ;;  %v3028_v12 = vadd.f32 %v7173_v20, %v2734_v29  ;;  %v2732_v19 = vadd.f32 %v2655_v14, %v2438_v63  ;;  %7231 = vmatmul.mubr.msk.bf16.gmra.mxu0 %vm3073_vm5, %v8910_v45  ;;  %v10136_v20 = vld [vmem:[#allocation20_spill] sm:$0xff]  ;;  %v10147_v9 = vld [vmem:[#allocation50_spill] sm:$0xff] }
 0x1f3   : > { %7265 = vmatmul.mubr.msk.bf16.gmra.mxu1 %vm3073_vm5, %v8914_v59  ;;  %v7142_v40 = vpop.f32.mrf.mxu1  ;;  %7234 = vmatprep.mubr.msk.bf16.mxu0 %vm3073_vm5, %v8917_v24  ;;  %v2962_v4 = vpop.f32.mrf.mxu0  ;;  %v2152_v37 = vadd.f32 %v10137_v27, %v10136_v20  ;;  %v3431_v36 = vld [vmem:[#allocation3 + $0xa8] sm:$0xff]  ;;  %v1857_v63 = vadd.f32 %v10143_v33, %v1563_v50  ;;  %v2442_v21 = vadd.f32 %v10144_v46, %v2147_v38  ;;  %v10155_v46 = vld [vmem:[#allocation61_spill] sm:$0xff] }
 0x1f4   : > { %3132 = vst.msk [vmem:[#allocation3 + $0xd9] sm:$0xff] %vm3073_vm5, %v3057_v60  ;;  %v3060_v0 = vmax.f32 %v3028_v12, 0.0  ;;  %v3026_v22 = vadd.f32 %v2949_v61, %v2732_v19  ;;  %v2737_v3 = vadd.f32 %v7142_v40, %v2443_v32  ;;  %7268 = vmatprep.mubr.msk.bf16.mxu1 %vm3073_vm5, %v8922_v6  ;;  %v10142_v61 = vld [vmem:[#allocation53_spill] sm:$0xff]  ;;  %v3731_v14 = vld [vmem:[#allocation3 + $0xa9] sm:$0xff]  ;;  %v3733_v38 = vld [vmem:[#allocation3 + $0xc1] sm:$0xff] }
 0x1f5   : > { %v2668_v47 = vpop.f32.mrf.mxu1  ;;  %v7177_v31 = vpop.f32.mrf.mxu0  ;;  %v3434_v42 = vld [vmem:[#allocation3 + $0xc8] sm:$0xff]  ;;  %v2150_v51 = vadd.f32 %v10142_v61, %v10141_v34  ;;  %v2447_v50 = vadd.f32 %v10147_v9, %v2152_v37  ;;  %v10153_v61 = vld [vmem:[#allocation54_spill] sm:$0xff] }
 0x1f6   : > { %3135 = vst.msk [vmem:[#allocation3 + $0xf9] sm:$0xff] %vm3073_vm5, %v3060_v0  ;;  %v3058_v11 = vmax.f32 %v3026_v22, 0.0  ;;  %v3031_v18 = vadd.f32 %v7176_v1, %v2737_v3  ;;  %v2735_v7 = vadd.f32 %v2668_v47, %v2441_v53  ;;  %v3734_v44 = vld [vmem:[#allocation3 + $0xc9] sm:$0xff]  ;;  %v3433_v1 = vld [vmem:[#allocation3 + $0xc0] sm:$0xff]  ;;  %v10149_v53 = vld [vmem:[#allocation57_spill] sm:$0xff] }
 0x1f7   : > { %v7143_v16 = vpop.f32.mrf.mxu1  ;;  %v2965_v28 = vpop.f32.mrf.mxu0  ;;  %v3432_v39 = vld [vmem:[#allocation3 + $0xb0] sm:$0xff]  ;;  %v10146_v32 = vld [vmem:[#allocation55_spill] sm:$0xff]  ;;  %v8952_v52 = vpack.c.bf16 %v3434_v42, %v3433_v1  ;;  %v8957_v22 = vpack.c.bf16 %v3734_v44, %v3733_v38  ;;  %v2151_v20 = vadd.f32 %v10149_v53, %v1857_v63 }
 0x1f8   : > { %v3732_v29 = vld [vmem:[#allocation3 + $0xb1] sm:$0xff]  ;;  %3133 = vst.msk [vmem:[#allocation3 + $0xe1] sm:$0xff] %vm3073_vm5, %v3058_v11  ;;  %v3063_v43 = vmax.f32 %v3031_v18, 0.0  ;;  %v3029_v17 = vadd.f32 %v2962_v4, %v2735_v7  ;;  %v2738_v30 = vadd.f32 %v7143_v16, %v2444_v2  ;;  %v8945_v15 = vpack.c.bf16 %v3432_v39, %v3431_v36  ;;  %v10152_v2 = vld [vmem:[#allocation59_spill] sm:$0xff]  ;;  %v10156_v39 = vld [vmem:[#allocation26_spill] sm:$0xff] }
 0x1f9   : > { %v2153_v54 = vadd.f32 %v10146_v32, %v10145_v5  ;;  %v2671_v60 = vpop.f32.mrf.mxu1  ;;  %v7180_v12 = vpop.f32.mrf.mxu0  ;;  %v8949_v19 = vpack.c.bf16 %v3732_v29, %v3731_v14  ;;  %v10148_v3 = vld [vmem:[#allocation28_spill] sm:$0xff]  ;;  %v2156_v36 = vadd.f32 %v10152_v2, %v10151_v55  ;;  %v10159_v38 = vld [vmem:[#allocation63_spill] sm:$0xff] }
 0x1fa   : > { %3138 = vst.msk [vmem:[#allocation3 + $0x121] sm:$0xff] %vm3073_vm5, %v3063_v43  ;;  %v3061_v40 = vmax.f32 %v3029_v17, 0.0  ;;  %v3032_v4 = vadd.f32 %v7177_v31, %v2738_v30  ;;  %v2736_v0 = vadd.f32 %v2671_v60, %v2442_v21  ;;  %7235 = vmatmul.mubr.msk.bf16.gmra.mxu0 %vm3073_vm5, %v8945_v15  ;;  %v1567_v57 = vadd.f32 %v10148_v3, %v1273_v23  ;;  %v10150_v18 = vld [vmem:[#allocation52_spill] sm:$0xff] }
 0x1fb   : > { %7269 = vmatmul.mubr.msk.bf16.gmra.mxu1 %vm3073_vm5, %v8949_v19  ;;  %v7146_v27 = vpop.f32.mrf.mxu1  ;;  %7238 = vmatprep.mubr.msk.bf16.mxu0 %vm3073_vm5, %v8952_v52  ;;  %v2978_v37 = vpop.f32.mrf.mxu0  ;;  %v2445_v7 = vadd.f32 %v10150_v18, %v2150_v51  ;;  %v2448_v33 = vadd.f32 %v10153_v61, %v2153_v54  ;;  %v3435_v63 = vld [vmem:[#allocation3 + $0xd8] sm:$0xff]  ;;  %v10157_v43 = vld [vmem:[#allocation56_spill] sm:$0xff] }
 0x1fc   : > { %3136 = vst.msk [vmem:[#allocation3 + $0x109] sm:$0xff] %vm3073_vm5, %v3061_v40  ;;  %v3064_v47 = vmax.f32 %v3032_v4, 0.0  ;;  %v3030_v31 = vadd.f32 %v2965_v28, %v2736_v0  ;;  %v2741_v11 = vadd.f32 %v7146_v27, %v2447_v50  ;;  %7272 = vmatprep.mubr.msk.bf16.mxu1 %vm3073_vm5, %v8957_v22  ;;  %v10154_v28 = vld [vmem:[#allocation27_spill] sm:$0xff]  ;;  %v1861_v29 = vadd.f32 %v10156_v39, %v1567_v57  ;;  %v3437_v9 = vld [vmem:[#allocation3 + $0xf0] sm:$0xff]  ;;  %v10158_v50 = vld [vmem:[#allocation29_spill] sm:$0xff] }
 0x1fd   : > { %v2684_v42 = vpop.f32.mrf.mxu1  ;;  %v7181_v48 = vpop.f32.mrf.mxu0  ;;  %v3438_v16 = vld [vmem:[#allocation3 + $0xf8] sm:$0xff]  ;;  %v2154_v21 = vadd.f32 %v10155_v46, %v10154_v28  ;;  %v2446_v17 = vadd.f32 %v10157_v43, %v2151_v20  ;;  %v2157_v40 = vadd.f32 %v10159_v38, %v10158_v50  ;;  %v10160_v57 = vld [vmem:[#allocation58_spill] sm:$0xff]  ;;  %v10164_v43 = vld [vmem:[#allocation64_spill] sm:$0xff] }
 0x1fe   : > { %3139 = vst.msk [vmem:[#allocation3 + $0x129] sm:$0xff] %vm3073_vm5, %v3064_v47  ;;  %v3062_v62 = vmax.f32 %v3030_v31, 0.0  ;;  %v3035_v23 = vadd.f32 %v7180_v12, %v2741_v11  ;;  %v2739_v34 = vadd.f32 %v2684_v42, %v2445_v7  ;;  %v3738_v1 = vld [vmem:[#allocation3 + $0xf9] sm:$0xff]  ;;  %v2451_v53 = vadd.f32 %v10160_v57, %v2156_v36  ;;  %v3737_v27 = vld [vmem:[#allocation3 + $0xf1] sm:$0xff] }
 0x1ff   : > { %v7147_v51 = vpop.f32.mrf.mxu1  ;;  %v2981_v44 = vpop.f32.mrf.mxu0  ;;  %v3436_v30 = vld [vmem:[#allocation3 + $0xe0] sm:$0xff]  ;;  %v8985_v20 = vpack.c.bf16 %v3438_v16, %v3437_v9  ;;  %v8990_v11 = vpack.c.bf16 %v3738_v1, %v3737_v27  ;;  %v10161_v18 = vld [vmem:[#allocation65_spill] sm:$0xff] }
 0x200   : > { %v3736_v14 = vld [vmem:[#allocation3 + $0xe1] sm:$0xff]  ;;  %3137 = vst.msk [vmem:[#allocation3 + $0x111] sm:$0xff] %vm3073_vm5, %v3062_v62  ;;  %v3067_v5 = vmax.f32 %v3035_v23, 0.0  ;;  %v3033_v32 = vadd.f32 %v2978_v37, %v2739_v34  ;;  %v2742_v60 = vadd.f32 %v7147_v51, %v2448_v33  ;;  %v8978_v54 = vpack.c.bf16 %v3436_v30, %v3435_v63  ;;  %v3735_v12 = vld [vmem:[#allocation3 + $0xd9] sm:$0xff]  ;;  %v10162_v62 = vld [vmem:[#allocation60_spill] sm:$0xff] }
 0x201   : > { %v2687_v4 = vpop.f32.mrf.mxu1  ;;  %v7184_v0 = vpop.f32.mrf.mxu0  ;;  %v8982_v3 = vpack.c.bf16 %v3736_v14, %v3735_v12  ;;  %v2155_v7 = vadd.f32 %v10161_v18, %v1861_v29  ;;  %v2449_v23 = vadd.f32 %v10162_v62, %v2154_v21  ;;  %v10163_v16 = vld [vmem:[#allocation62_spill] sm:$0xff] }
 0x202   : > { %3142 = vst.msk [vmem:[#allocation3 + $0x151] sm:$0xff] %vm3073_vm5, %v3067_v5  ;;  %v3065_v37 = vmax.f32 %v3033_v32, 0.0  ;;  %v3036_v47 = vadd.f32 %v7181_v48, %v2742_v60  ;;  %v2740_v31 = vadd.f32 %v2687_v4, %v2446_v17  ;;  %7239 = vmatmul.mubr.msk.bf16.gmra.mxu0 %vm3073_vm5, %v8978_v54  ;;  %v2452_v28 = vadd.f32 %v10163_v16, %v2157_v40  ;;  %v3441_v12 = vld [vmem:[#allocation3 + $0x120] sm:$0xff]  ;;  %v4012_v16 = vld [vmem:[#allocation3 + $0xa] sm:$0xff] }
 0x203   : > { %7273 = vmatmul.mubr.msk.bf16.gmra.mxu1 %vm3073_vm5, %v8982_v3  ;;  %v7150_v55 = vpop.f32.mrf.mxu1  ;;  %7242 = vmatprep.mubr.msk.bf16.mxu0 %vm3073_vm5, %v8985_v20  ;;  %v2994_v2 = vpop.f32.mrf.mxu0  ;;  %v3439_v46 = vld [vmem:[#allocation3 + $0x108] sm:$0xff] }
 0x204   : > { %3140 = vst.msk [vmem:[#allocation3 + $0x139] sm:$0xff] %vm3073_vm5, %v3065_v37  ;;  %v3068_v36 = vmax.f32 %v3036_v47, 0.0  ;;  %v3034_v42 = vadd.f32 %v2981_v44, %v2740_v31  ;;  %v2745_v48 = vadd.f32 %v7150_v55, %v2451_v53  ;;  %7276 = vmatprep.mubr.msk.bf16.mxu1 %vm3073_vm5, %v8990_v11  ;;  %v2450_v44 = vadd.f32 %v10164_v43, %v2155_v7  ;;  %v3739_v60 = vld [vmem:[#allocation3 + $0x109] sm:$0xff]  ;;  %v3741_v40 = vld [vmem:[#allocation3 + $0x121] sm:$0xff] }
 0x205   : > { %v2700_v34 = vpop.f32.mrf.mxu1  ;;  %v3442_v39 = vld [vmem:[#allocation3 + $0x128] sm:$0xff]  ;;  %v7185_v29 = vpop.f32.mrf.mxu0 }
 0x206   : > { %3143 = vst.msk [vmem:[#allocation3 + $0x159] sm:$0xff] %vm3073_vm5, %v3068_v36  ;;  %v3066_v61 = vmax.f32 %v3034_v42, 0.0  ;;  %v3039_v33 = vadd.f32 %v7184_v0, %v2745_v48  ;;  %v2743_v63 = vadd.f32 %v2700_v34, %v2449_v23  ;;  %v3742_v14 = vld [vmem:[#allocation3 + $0x129] sm:$0xff]  ;;  %v9009_v38 = vpack.c.bf16 %v3442_v39, %v3441_v12 }
 0x207   : > { %v7151_v51 = vpop.f32.mrf.mxu1  ;;  %v3440_v17 = vld [vmem:[#allocation3 + $0x110] sm:$0xff]  ;;  %v9014_v53 = vpack.c.bf16 %v3742_v14, %v3741_v40  ;;  %v2997_v27 = vpop.f32.mrf.mxu0  ;;  %v4992_v12 = vsel %vm3514_vm4, %v8852_v35, 0 }
 0x208   : > { %v3740_v30 = vld [vmem:[#allocation3 + $0x111] sm:$0xff]  ;;  %3141 = vst.msk [vmem:[#allocation3 + $0x141] sm:$0xff] %vm3073_vm5, %v3066_v61  ;;  %v3071_v21 = vmax.f32 %v3039_v33, 0.0  ;;  %v3037_v1 = vadd.f32 %v2994_v2, %v2743_v63  ;;  %v2746_v5 = vadd.f32 %v7151_v51, %v2452_v28  ;;  %v9005_v32 = vpack.c.bf16 %v3440_v17, %v3439_v46  ;;  %v4011_v63 = vld [vmem:[#allocation3 + $0x2] sm:$0xff]  ;;  %v4013_v17 = vld [vmem:[#allocation3 + $0x1a] sm:$0xff] }
 0x209   : > { %v2703_v9 = vpop.f32.mrf.mxu1  ;;  %v9007_v50 = vpack.c.bf16 %v3740_v30, %v3739_v60  ;;  %v3445_v23 = vld [vmem:[#allocation3 + $0x150] sm:$0xff]  ;;  %v4043_v51 = vpack.c.bf16 %v4012_v16, %v4011_v63  ;;  %v4014_v30 = vld [vmem:[#allocation3 + $0x22] sm:$0xff] }
 0x20a   : > { %3146 = vst.msk [vmem:[#allocation3 + $0x181] sm:$0xff] %vm3073_vm5, %v3071_v21  ;;  %v3069_v4 = vmax.f32 %v3037_v1, 0.0  ;;  %v3040_v0 = vadd.f32 %v7185_v29, %v2746_v5  ;;  %v2744_v57 = vadd.f32 %v2703_v9, %v2450_v44  ;;  %7243 = vmatmul.mubr.msk.bf16.gmra.mxu0 %vm3073_vm5, %v9005_v32  ;;  %v3745_v61 = vld [vmem:[#allocation3 + $0x151] sm:$0xff]  ;;  %v4016_v21 = vld [vmem:[#allocation3 + $0x3a] sm:$0xff]  ;;  %v9052_v1 = vpack.c.bf16 %v4014_v30, %v4013_v17 }
 0x20b   : > { %7277 = vmatmul.mubr.msk.bf16.gmra.mxu1 %vm3073_vm5, %v9007_v50  ;;  %7246 = vmatprep.mubr.msk.bf16.mxu0 %vm3073_vm5, %v9009_v38  ;;  %v3443_v18 = vld [vmem:[#allocation3 + $0x138] sm:$0xff]  ;;  %v4698_v5 = vsel %vm3514_vm4, %v8843_v49, 0  ;;  %v9069_v9 = vpop.f32.mrf.mxu1  ;;  %v9074_v49 = vld [vmem:[%s10028_s3 + $0x1c] sm:$0xf] }
 0x20c   : > { %3144 = vst.msk [vmem:[#allocation3 + $0x169] sm:$0xff] %vm3073_vm5, %v3069_v4  ;;  %v3072_v37 = vmax.f32 %v3040_v0, 0.0  ;;  %v3038_v47 = vadd.f32 %v2997_v27, %v2744_v57  ;;  %7280 = vmatprep.mubr.msk.bf16.mxu1 %vm3073_vm5, %v9014_v53  ;;  %v3743_v7 = vld [vmem:[#allocation3 + $0x139] sm:$0xff]  ;;  %v4017_v35 = vld [vmem:[#allocation3 + $0x4a] sm:$0xff] }
 0x20d   : > { %v3446_v55 = vld [vmem:[#allocation3 + $0x158] sm:$0xff]  ;;  %v4020_v4 = vld [vmem:[#allocation3 + $0x6a] sm:$0xff]  ;;  %v9084_v0 = vpop.f32.mrf.mxu1 }
 0x20e   : > { %3147 = vst.msk [vmem:[#allocation3 + $0x189] sm:$0xff] %vm3073_vm5, %v3072_v37  ;;  %v3070_v31 = vmax.f32 %v3038_v47, 0.0  ;;  %v3746_v42 = vld [vmem:[#allocation3 + $0x159] sm:$0xff]  ;;  %v9029_v34 = vpack.c.bf16 %v3446_v55, %v3445_v23  ;;  %v4022_v47 = vld [vmem:[#allocation3 + $0x82] sm:$0xff]  ;;  %v4028_v23 = vld [vmem:[#allocation3 + $0xca] sm:$0xff] }
 0x20f   : > { %v3444_v2 = vld [vmem:[#allocation3 + $0x140] sm:$0xff]  ;;  %v9033_v33 = vpack.c.bf16 %v3746_v42, %v3745_v61  ;;  %v4015_v14 = vld [vmem:[#allocation3 + $0x32] sm:$0xff] }
 0x210   : > { %v3744_v36 = vld [vmem:[#allocation3 + $0x141] sm:$0xff]  ;;  %3145 = vst.msk [vmem:[#allocation3 + $0x171] sm:$0xff] %vm3073_vm5, %v3070_v31  ;;  %v9025_v48 = vpack.c.bf16 %v3444_v2, %v3443_v18  ;;  %v9058_v60 = vpack.c.bf16 %v4016_v21, %v4015_v14  ;;  %v4018_v40 = vld [vmem:[#allocation3 + $0x52] sm:$0xff]  ;;  %v4036_v21 = vld [vmem:[#allocation3 + $0x12a] sm:$0xff] }
 0x211   : > { %v9027_v62 = vpack.c.bf16 %v3744_v36, %v3743_v7  ;;  %v9086_v57 = vpack.c.bf16 %v4018_v40, %v4017_v35  ;;  %v4021_v37 = vld [vmem:[#allocation3 + $0x7a] sm:$0xff]  ;;  %v4023_v31 = vld [vmem:[#allocation3 + $0x92] sm:$0xff]  ;;  %v4027_v42 = vld [vmem:[#allocation3 + $0xc2] sm:$0xff] }
 0x212   : > { %7247 = vmatmul.mubr.msk.bf16.gmra.mxu0 %vm3073_vm5, %v9025_v48  ;;  %v4024_v18 = vld [vmem:[#allocation3 + $0x9a] sm:$0xff]  ;;  %v9102_v55 = vpack.c.bf16 %v4022_v47, %v4021_v37  ;;  %v4026_v36 = vld [vmem:[#allocation3 + $0xb2] sm:$0xff]  ;;  %v9120_v16 = vpack.c.bf16 %v4028_v23, %v4027_v42  ;;  %v4035_v14 = vld [vmem:[#allocation3 + $0x122] sm:$0xff] }
 0x213   : > { %7281 = vmatmul.mubr.msk.bf16.gmra.mxu1 %vm3073_vm5, %v9027_v62  ;;  %7250 = vmatprep.mubr.msk.bf16.mxu0 %vm3073_vm5, %v9029_v34  ;;  %v3447_v28 = vld [vmem:[#allocation3 + $0x168] sm:$0xff]  ;;  %v9104_v2 = vpack.c.bf16 %v4024_v18, %v4023_v31  ;;  %v4034_v30 = vld [vmem:[#allocation3 + $0x112] sm:$0xff]  ;;  %v9152_v35 = vpack.c.bf16 %v4036_v21, %v4035_v14  ;;  %v4335_v23 = vld [vmem:[#allocation3 + $0x180] sm:$0xff] }
 0x214   : > { %7284 = vmatprep.mubr.msk.bf16.mxu1 %vm3073_vm5, %v9033_v33  ;;  %v3747_v39 = vld [vmem:[#allocation3 + $0x169] sm:$0xff] }
 0x215   : > { %v4038_v40 = vld [vmem:[#allocation3 + $0x142] sm:$0xff] }
 0x216   : > { %v5190_v21 = vld [vmem:[#allocation3 + $0x48] sm:$0xff] }
 0x217   : > { %v3448_v46 = vld [vmem:[#allocation3 + $0x170] sm:$0xff] }
 0x218   : > { %v3748_v29 = vld [vmem:[#allocation3 + $0x171] sm:$0xff]  ;;  %v9041_v43 = vpack.c.bf16 %v3448_v46, %v3447_v28  ;;  %v4030_v28 = vld [vmem:[#allocation3 + $0xe2] sm:$0xff] }
 0x219   : > { %v9043_v44 = vpack.c.bf16 %v3748_v29, %v3747_v39  ;;  %v4031_v46 = vld [vmem:[#allocation3 + $0xf2] sm:$0xff]  ;;  %v4032_v39 = vld [vmem:[#allocation3 + $0xfa] sm:$0xff] }
 0x21a   : > { %7251 = vmatmul.mubr.msk.bf16.gmra.mxu0 %vm3073_vm5, %v9041_v43  ;;  %v9136_v17 = vpack.c.bf16 %v4032_v39, %v4031_v46  ;;  %v4042_v18 = vld [vmem:[#allocation3 + $0x172] sm:$0xff]  ;;  %v5581_v46 = vsel %vm3514_vm4, %v9074_v49, 0 }
 0x21b   : > { %7285 = vmatmul.mubr.msk.bf16.gmra.mxu1 %vm3073_vm5, %v9043_v44  ;;  %7290 = vmatprep.mubr.msk.bf16.mxu0 %vm3073_vm5, %v4043_v51 }
 0x21c   : > { %7324 = vmatprep.mubr.msk.bf16.mxu1 %vm3073_vm5, %v8826_v56  ;;  %v9065_v56 = vld [vmem:[%s10028_s3 + $0x18] sm:$0xf] }
 0x222   : > { %7291 = vmatmul.mubr.msk.bf16.vlgmr.msra.gmra.mxu0 %vm3073_vm5, %v9052_v1 }
 0x223   : > { %7325 = vmatmul.mubr.msk.bf16.vlgmr.msra.gmra.mxu1 %vm3073_vm5, %v8833_v58  ;;  %7357 = vmatpush3.bf16.msra.mxu0 %v4698_v5  ;;  %v4019_v58 = vld [vmem:[#allocation3 + $0x62] sm:$0xff] }
 0x224   : > { %7294 = vmatprep.mubr.msk.bf16.mxu0 %vm3073_vm5, %v9058_v60  ;;  %7328 = vmatprep.mubr.msk.bf16.mxu1 %vm3073_vm5, %v8875_v41  ;;  %v9088_v27 = vpack.c.bf16 %v4020_v4, %v4019_v58  ;;  %v9096_v41 = vpop.f32.mrf.mxu1  ;;  %v4039_v58 = vld [vmem:[#allocation3 + $0x152] sm:$0xff]  ;;  %v4040_v4 = vld [vmem:[#allocation3 + $0x15a] sm:$0xff] }
 0x225   : > { %7391 = vmatpush3.bf16.msra.mxu1 %v4992_v12  ;;  %7545 = vmatprep.subr.msk.bf16.mxu0 %vm3514_vm4, %v9065_v56  ;;  %v4057_v31 = vpack.c.bf16 %v4040_v4, %v4039_v58  ;;  %v5484_v58 = vld [vmem:[#allocation3 + $0x49] sm:$0xff] }
 0x226   : > { %7546 = vmatprep.subr.msk.bf16.mxu1 %vm3514_vm4, %v9074_v49  ;;  %v9100_v7 = vpop.f32.mrf.mxu1  ;;  %v4924_v49 = vld [vmem:[#allocation3 + $0x18a] sm:$0xff] }
 0x22a   : > { %7295 = vmatmul.mubr.msk.bf16.gmra.mxu0 %vm3073_vm5, %v9086_v57 }
 0x22b   : > { %7329 = vmatmul.mubr.msk.bf16.gmra.mxu1 %vm3073_vm5, %v8882_v13  ;;  %7298 = vmatprep.mubr.msk.bf16.mxu0 %vm3073_vm5, %v9088_v27  ;;  %v9112_v13 = vpop.f32.mrf.mxu1 }
 0x22c   : > { %7332 = vmatprep.mubr.msk.bf16.mxu1 %vm3073_vm5, %v8910_v45  ;;  %v4025_v45 = vld [vmem:[#allocation3 + $0xaa] sm:$0xff] }
 0x22d   : > { %v9116_v61 = vpop.f32.mrf.mxu1  ;;  %v9118_v63 = vpack.c.bf16 %v4026_v36, %v4025_v45  ;;  %v4336_v45 = vld [vmem:[#allocation3 + $0x188] sm:$0xff] }
 0x232   : > { %7299 = vmatmul.mubr.msk.bf16.gmra.mxu0 %vm3073_vm5, %v9102_v55 }
 0x233   : > { %7333 = vmatmul.mubr.msk.bf16.gmra.mxu1 %vm3073_vm5, %v8917_v24  ;;  %7302 = vmatprep.mubr.msk.bf16.mxu0 %vm3073_vm5, %v9104_v2  ;;  %v9128_v24 = vpop.f32.mrf.mxu1 }
 0x234   : > { %7336 = vmatprep.mubr.msk.bf16.mxu1 %vm3073_vm5, %v8945_v15  ;;  %v4029_v15 = vld [vmem:[#allocation3 + $0xda] sm:$0xff] }
 0x235   : > { %v9132_v29 = vpop.f32.mrf.mxu1  ;;  %v9134_v51 = vpack.c.bf16 %v4030_v28, %v4029_v15  ;;  %v9176_v15 = vpack.c.bf16 %v4336_v45, %v4335_v23  ;;  %v5287_v28 = vsel %vm3514_vm4, %v9065_v56, 0  ;;  %v4630_v56 = vld [vmem:[#allocation3 + $0x189] sm:$0xff] }
 0x23a   : > { %7303 = vmatmul.mubr.msk.bf16.gmra.mxu0 %vm3073_vm5, %v9118_v63 }
 0x23b   : > { %7337 = vmatmul.mubr.msk.bf16.gmra.mxu1 %vm3073_vm5, %v8952_v52  ;;  %7306 = vmatprep.mubr.msk.bf16.mxu0 %vm3073_vm5, %v9120_v16  ;;  %v9144_v52 = vpop.f32.mrf.mxu1 }
 0x23c   : > { %7340 = vmatprep.mubr.msk.bf16.mxu1 %vm3073_vm5, %v8978_v54  ;;  %v4033_v54 = vld [vmem:[#allocation3 + $0x10a] sm:$0xff] }
 0x23d   : > { %v9148_v5 = vpop.f32.mrf.mxu1  ;;  %v9150_v12 = vpack.c.bf16 %v4034_v30, %v4033_v54  ;;  %v5191_v54 = vld [vmem:[#allocation3 + $0x50] sm:$0xff] }
 0x23e   : > { %10165 = vst [vmem:[#allocation13_spill] sm:$0xff] %v9148_v5  ;;  %v5485_v30 = vld [vmem:[#allocation3 + $0x51] sm:$0xff] }
 0x242   : > { %7307 = vmatmul.mubr.msk.bf16.gmra.mxu0 %vm3073_vm5, %v9134_v51 }
 0x243   : > { %7341 = vmatmul.mubr.msk.bf16.gmra.mxu1 %vm3073_vm5, %v8985_v20  ;;  %7310 = vmatprep.mubr.msk.bf16.mxu0 %vm3073_vm5, %v9136_v17  ;;  %v9160_v20 = vpop.f32.mrf.mxu1 }
 0x244   : > { %7344 = vmatprep.mubr.msk.bf16.mxu1 %vm3073_vm5, %v9005_v32  ;;  %10166 = vst [vmem:[#allocation33_spill] sm:$0xff] %v9160_v20  ;;  %v4037_v32 = vld [vmem:[#allocation3 + $0x13a] sm:$0xff] }
 0x245   : > { %v9164_v37 = vpop.f32.mrf.mxu1  ;;  %v4056_v47 = vpack.c.bf16 %v4038_v40, %v4037_v32  ;;  %v9298_v32 = vld [vmem:[%s10029_s4] ss:$0 sm:$0xff]  ;;  %v5221_v40 = vpack.c.bf16 %v5191_v54, %v5190_v21  ;;  %v5491_v54 = vld [vmem:[#allocation3 + $0x99] sm:$0xff] }
 0x246   : > { %10167 = vst [vmem:[#allocation30_spill] sm:$0xff] %v9164_v37 }
 0x24a   : > { %7311 = vmatmul.mubr.msk.bf16.gmra.mxu0 %vm3073_vm5, %v9150_v12 }
 0x24b   : > { %7345 = vmatmul.mubr.msk.bf16.gmra.mxu1 %vm3073_vm5, %v9009_v38  ;;  %7314 = vmatprep.mubr.msk.bf16.mxu0 %vm3073_vm5, %v9152_v35  ;;  %v9170_v38 = vpop.f32.mrf.mxu1 }
 0x24c   : > { %7348 = vmatprep.mubr.msk.bf16.mxu1 %vm3073_vm5, %v9025_v48  ;;  %10168 = vst [vmem:[#allocation10_spill] sm:$0xff] %v9170_v38  ;;  %v4041_v48 = vld [vmem:[#allocation3 + $0x16a] sm:$0xff] }
 0x24d   : > { %v9174_v36 = vpop.f32.mrf.mxu1  ;;  %v4058_v42 = vpack.c.bf16 %v4042_v18, %v4041_v48  ;;  %v5486_v48 = vld [vmem:[#allocation3 + $0x61] sm:$0xff] }
 0x24e   : > { %10169 = vst [vmem:[#allocation35_spill] sm:$0xff] %v9174_v36 }
 0x252   : > { %7315 = vmatmul.mubr.msk.bf16.gmra.mxu0 %vm3073_vm5, %v4056_v47 }
 0x253   : > { %7349 = vmatmul.mubr.msk.bf16.gmra.mxu1 %vm3073_vm5, %v9029_v34  ;;  %7318 = vmatprep.mubr.msk.bf16.mxu0 %vm3073_vm5, %v4057_v31  ;;  %v9183_v34 = vpop.f32.mrf.mxu1 }
 0x254   : > { %7352 = vmatprep.mubr.msk.bf16.mxu1 %vm3073_vm5, %v9041_v43  ;;  %10170 = vst [vmem:[#allocation31_spill] sm:$0xff] %v9183_v34 }
 0x255   : > { %v9187_v43 = vpop.f32.mrf.mxu1 }
 0x256   : > { %10171 = vst [vmem:[#allocation7_spill] sm:$0xff] %v9187_v43 }
 0x25a   : > { %7319 = vmatmul.mubr.msk.bf16.gmra.mxu0 %vm3073_vm5, %v4058_v42 }
 0x25b   : > { %7353 = vmatmul.mubr.msk.bf16.gmra.mxu1 %vm3073_vm5, %v9176_v15  ;;  %7358 = vmatprep.mubr.msk.bf16.mxu0 %vm3073_vm5, %v8830_v8  ;;  %v9198_v8 = vld [vmem:[%s10028_s3 + $0x20] sm:$0xf] }
 0x25c   : > { %7392 = vmatprep.mubr.msk.bf16.mxu1 %vm3073_vm5, %v9052_v1  ;;  %v9202_v1 = vpop.f32.mrf.mxu1  ;;  %v5875_v4 = vsel %vm3514_vm4, %v9198_v8, 0 }
 0x25d   : > { %10172 = vst [vmem:[#allocation6_spill] sm:$0xff] %v9202_v1 }
 0x262   : > { %7359 = vmatmul.mubr.msk.bf16.vlgmr.msra.gmra.mxu0 %vm3073_vm5, %v8838_v25  ;;  %v9210_v25 = vpop.f32.mrf.mxu1 }
 0x263   : > { %7393 = vmatmul.mubr.msk.bf16.vlgmr.msra.gmra.mxu1 %vm3073_vm5, %v9058_v60  ;;  %7425 = vmatpush3.bf16.msra.mxu0 %v5287_v28  ;;  %10173 = vst [vmem:[#allocation12_spill] sm:$0xff] %v9210_v25 }
 0x264   : > { %7362 = vmatprep.mubr.msk.bf16.mxu0 %vm3073_vm5, %v8879_v10  ;;  %7396 = vmatprep.mubr.msk.bf16.mxu1 %vm3073_vm5, %v9086_v57  ;;  %v9218_v60 = vpop.f32.mrf.mxu1  ;;  %v5189_v57 = vld [vmem:[#allocation3 + $0x38] sm:$0xff] }
 0x265   : > { %7459 = vmatpush3.bf16.msra.mxu1 %v5581_v46  ;;  %7547 = vmatprep.subr.msk.bf16.mxu0 %vm3514_vm4, %v9198_v8  ;;  %10174 = vst [vmem:[#allocation37_spill] sm:$0xff] %v9218_v60 }
 0x266   : > { %v9222_v10 = vpop.f32.mrf.mxu1 }
 0x267   : > { %10175 = vst [vmem:[#allocation11_spill] sm:$0xff] %v9222_v10 }
 0x26a   : > { %7363 = vmatmul.mubr.msk.bf16.gmra.mxu0 %vm3073_vm5, %v8887_v26  ;;  %v9230_v26 = vpop.f32.mrf.mxu1 }
 0x26b   : > { %7397 = vmatmul.mubr.msk.bf16.gmra.mxu1 %vm3073_vm5, %v9088_v27  ;;  %7366 = vmatprep.mubr.msk.bf16.mxu0 %vm3073_vm5, %v8914_v59  ;;  %10176 = vst [vmem:[#allocation32_spill] sm:$0xff] %v9230_v26  ;;  %v4629_v27 = vld [vmem:[#allocation3 + $0x181] sm:$0xff] }
 0x26c   : > { %7400 = vmatprep.mubr.msk.bf16.mxu1 %vm3073_vm5, %v9102_v55  ;;  %v9234_v59 = vpop.f32.mrf.mxu1  ;;  %v5483_v55 = vld [vmem:[#allocation3 + $0x39] sm:$0xff] }
 0x26d   : > { %10177 = vst [vmem:[#allocation14_spill] sm:$0xff] %v9234_v59 }
 0x272   : > { %7367 = vmatmul.mubr.msk.bf16.gmra.mxu0 %vm3073_vm5, %v8922_v6  ;;  %v9242_v6 = vpop.f32.mrf.mxu1 }
 0x273   : > { %7401 = vmatmul.mubr.msk.bf16.gmra.mxu1 %vm3073_vm5, %v9104_v2  ;;  %7370 = vmatprep.mubr.msk.bf16.mxu0 %vm3073_vm5, %v8949_v19  ;;  %10178 = vst [vmem:[#allocation39_spill] sm:$0xff] %v9242_v6  ;;  %v5506_v6 = vld [vmem:[#allocation3 + $0x151] sm:$0xff] }
 0x274   : > { %7404 = vmatprep.mubr.msk.bf16.mxu1 %vm3073_vm5, %v9118_v63  ;;  %v9246_v19 = vpop.f32.mrf.mxu1  ;;  %v9281_v63 = vpack.c.bf16 %v4630_v56, %v4629_v27  ;;  %v5489_v27 = vld [vmem:[#allocation3 + $0x81] sm:$0xff] }
 0x275   : > { %10179 = vst [vmem:[#allocation34_spill] sm:$0xff] %v9246_v19 }
 0x27a   : > { %7371 = vmatmul.mubr.msk.bf16.gmra.mxu0 %vm3073_vm5, %v8957_v22  ;;  %v9254_v22 = vpop.f32.mrf.mxu1 }
 0x27b   : > { %7405 = vmatmul.mubr.msk.bf16.gmra.mxu1 %vm3073_vm5, %v9120_v16  ;;  %7374 = vmatprep.mubr.msk.bf16.mxu0 %vm3073_vm5, %v8982_v3  ;;  %10180 = vst [vmem:[#allocation18_spill] sm:$0xff] %v9254_v22 }
 0x27c   : > { %7408 = vmatprep.mubr.msk.bf16.mxu1 %vm3073_vm5, %v9134_v51  ;;  %v9258_v3 = vpop.f32.mrf.mxu1  ;;  %v5482_v51 = vld [vmem:[#allocation3 + $0x31] sm:$0xff] }
 0x27d   : > { %10181 = vst [vmem:[#allocation41_spill] sm:$0xff] %v9258_v3 }
 0x282   : > { %7375 = vmatmul.mubr.msk.bf16.gmra.mxu0 %vm3073_vm5, %v8990_v11  ;;  %v9266_v11 = vpop.f32.mrf.mxu1 }
 0x283   : > { %7409 = vmatmul.mubr.msk.bf16.gmra.mxu1 %vm3073_vm5, %v9136_v17  ;;  %7378 = vmatprep.mubr.msk.bf16.mxu0 %vm3073_vm5, %v9007_v50  ;;  %10182 = vst [vmem:[#allocation36_spill] sm:$0xff] %v9266_v11  ;;  %v5502_v11 = vld [vmem:[#allocation3 + $0x121] sm:$0xff] }
 0x284   : > { %7412 = vmatprep.mubr.msk.bf16.mxu1 %vm3073_vm5, %v9150_v12  ;;  %v9269_v50 = vpop.f32.mrf.mxu1  ;;  %v5193_v12 = vld [vmem:[#allocation3 + $0x68] sm:$0xff] }
 0x285   : > { %10183 = vst [vmem:[#allocation15_spill] sm:$0xff] %v9269_v50 }
 0x28a   : > { %7379 = vmatmul.mubr.msk.bf16.gmra.mxu0 %vm3073_vm5, %v9014_v53  ;;  %v9276_v53 = vpop.f32.mrf.mxu1 }
 0x28b   : > { %7413 = vmatmul.mubr.msk.bf16.gmra.mxu1 %vm3073_vm5, %v9152_v35  ;;  %7382 = vmatprep.mubr.msk.bf16.mxu0 %vm3073_vm5, %v9027_v62  ;;  %10184 = vst [vmem:[#allocation43_spill] sm:$0xff] %v9276_v53  ;;  %v4923_v62 = vld [vmem:[#allocation3 + $0x182] sm:$0xff] }
 0x28c   : > { %7416 = vmatprep.mubr.msk.bf16.mxu1 %vm3073_vm5, %v4056_v47  ;;  %v9279_v2 = vpop.f32.mrf.mxu1  ;;  %v9283_v16 = vpack.c.bf16 %v4924_v49, %v4923_v62  ;;  %v5487_v35 = vld [vmem:[#allocation3 + $0x69] sm:$0xff]  ;;  %v5515_v47 = vpack.c.bf16 %v5485_v30, %v5484_v58  ;;  %v5195_v49 = vld [vmem:[#allocation3 + $0x80] sm:$0xff] }
 0x28d   : > { %10185 = vst [vmem:[#allocation38_spill] sm:$0xff] %v9279_v2 }
 0x28e   : > { %v9290_v17 = vpop.f32.mrf.mxu1 }
 0x28f   : > { %10186 = vst [vmem:[#allocation9_spill] sm:$0xff] %v9290_v17  ;;  %v5498_v17 = vld [vmem:[#allocation3 + $0xf1] sm:$0xff] }
 0x290   : > { %v9293_v14 = vpop.f32.mrf.mxu1 }
 0x291   : > { %10187 = vst [vmem:[#allocation8_spill] sm:$0xff] %v9293_v14 }
 0x292   : > { %7383 = vmatmul.mubr.msk.bf16.gmra.mxu0 %vm3073_vm5, %v9033_v33  ;;  %v5188_v33 = vld [vmem:[#allocation3 + $0x30] sm:$0xff] }
 0x293   : > { %7417 = vmatmul.mubr.msk.bf16.gmra.mxu1 %vm3073_vm5, %v4057_v31  ;;  %7386 = vmatprep.mubr.msk.bf16.mxu0 %vm3073_vm5, %v9043_v44  ;;  %v5220_v39 = vpack.c.bf16 %v5189_v57, %v5188_v33  ;;  %v5514_v44 = vpack.c.bf16 %v5483_v55, %v5482_v51  ;;  %v5192_v31 = vld [vmem:[#allocation3 + $0x60] sm:$0xff]  ;;  %v5197_v55 = vld [vmem:[#allocation3 + $0x98] sm:$0xff] }
 0x294   : > { %7420 = vmatprep.mubr.msk.bf16.mxu1 %vm3073_vm5, %v4058_v42  ;;  %v5222_v45 = vpack.c.bf16 %v5193_v12, %v5192_v31  ;;  %v5516_v42 = vpack.c.bf16 %v5487_v35, %v5486_v48  ;;  %v5488_v12 = vld [vmem:[#allocation3 + $0x79] sm:$0xff]  ;;  %v5196_v35 = vld [vmem:[#allocation3 + $0x90] sm:$0xff] }
 0x295   : > { %v5224_v31 = vpack.c.bf16 %v5197_v55, %v5196_v35  ;;  %v5490_v48 = vld [vmem:[#allocation3 + $0x91] sm:$0xff] }
 0x296   : > { %v5493_v55 = vld [vmem:[#allocation3 + $0xb1] sm:$0xff] }
 0x29a   : > { %7387 = vmatmul.mubr.msk.bf16.gmra.mxu0 %vm3073_vm5, %v9281_v63 }
 0x29b   : > { %7421 = vmatmul.mubr.msk.bf16.gmra.mxu1 %vm3073_vm5, %v9283_v16  ;;  %7426 = vmatprep.mubr.msk.bf16.mxu0 %vm3073_vm5, %v5220_v39 }
 0x29c   : > { %7460 = vmatprep.mubr.msk.bf16.mxu1 %vm3073_vm5, %v5514_v44  ;;  %v5194_v44 = vld [vmem:[#allocation3 + $0x78] sm:$0xff] }
 0x29d   : > { %v5223_v21 = vpack.c.bf16 %v5195_v49, %v5194_v44 }
 0x2a2   : > { %v7224_v18 = vpop.f32.mrf.mxu0  ;;  %7427 = vmatmul.mubr.msk.bf16.vlgmr.msra.gmra.mxu0 %vm3073_vm5, %v5221_v40 }
 0x2a3   : > { %v3687_v23 = vadd.f32 %v7224_v18, %v9298_v32  ;;  %v7258_v28 = vpop.f32.mrf.mxu1  ;;  %7461 = vmatmul.mubr.msk.bf16.vlgmr.msra.gmra.mxu1 %vm3073_vm5, %v5515_v47  ;;  %7493 = vmatpush3.bf16.msra.mxu0 %v5875_v4  ;;  %v5517_v47 = vpack.c.bf16 %v5489_v27, %v5488_v12 }
 0x2a4   : > { %7430 = vmatprep.mubr.msk.bf16.mxu0 %vm3073_vm5, %v5222_v45  ;;  %7464 = vmatprep.mubr.msk.bf16.mxu1 %vm3073_vm5, %v5516_v42  ;;  %v3552_v46 = vpop.f32.mrf.mxu0  ;;  %v5518_v45 = vpack.c.bf16 %v5491_v54, %v5490_v48 }
 0x2a5   : > { %v9307_v8 = vadd.f32 %v7258_v28, %v3687_v23  ;;  %v3685_v56 = vadd.f32 %v9298_v32, %v3552_v46  ;;  %v3852_v62 = vpop.f32.mrf.mxu1 }
 0x2a6   : > { %v7225_v57 = vpop.f32.mrf.mxu0 }
 0x2a7   : > { %v9310_v33 = vadd.f32 %v3852_v62, %v3685_v56  ;;  %v3688_v39 = vadd.f32 %v7225_v57, %v9298_v32  ;;  %v7259_v51 = vpop.f32.mrf.mxu1  ;;  %v5199_v57 = vld [vmem:[#allocation3 + $0xb0] sm:$0xff] }
 0x2a8   : > { %v3555_v30 = vpop.f32.mrf.mxu0 }
 0x2a9   : > { %v9313_v40 = vadd.f32 %v7259_v51, %v3688_v39  ;;  %v3686_v58 = vadd.f32 %v9298_v32, %v3555_v30  ;;  %v3855_v4 = vpop.f32.mrf.mxu1  ;;  %v5201_v39 = vld [vmem:[#allocation3 + $0xc8] sm:$0xff] }
 0x2aa   : > { %v7228_v18 = vpop.f32.mrf.mxu0  ;;  %7431 = vmatmul.mubr.msk.bf16.gmra.mxu0 %vm3073_vm5, %v5223_v21  ;;  %v5198_v30 = vld [vmem:[#allocation3 + $0xa8] sm:$0xff] }
 0x2ab   : > { %v9317_v42 = vadd.f32 %v3855_v4, %v3686_v58  ;;  %v3691_v23 = vadd.f32 %v7228_v18, %v9298_v32  ;;  %v7262_v28 = vpop.f32.mrf.mxu1  ;;  %7465 = vmatmul.mubr.msk.bf16.gmra.mxu1 %vm3073_vm5, %v5517_v47  ;;  %7434 = vmatprep.mubr.msk.bf16.mxu0 %vm3073_vm5, %v5224_v31  ;;  %v5495_v21 = vld [vmem:[#allocation3 + $0xc9] sm:$0xff]  ;;  %v5225_v35 = vpack.c.bf16 %v5199_v57, %v5198_v30  ;;  %v5200_v4 = vld [vmem:[#allocation3 + $0xc0] sm:$0xff] }
 0x2ac   : > { %7468 = vmatprep.mubr.msk.bf16.mxu1 %vm3073_vm5, %v5518_v45  ;;  %v3568_v46 = vpop.f32.mrf.mxu0  ;;  %v5492_v58 = vld [vmem:[#allocation3 + $0xa9] sm:$0xff]  ;;  %v5226_v45 = vpack.c.bf16 %v5201_v39, %v5200_v4 }
 0x2ad   : > { %v9323_v56 = vadd.f32 %v7262_v28, %v3691_v23  ;;  %v3689_v62 = vadd.f32 %v9298_v32, %v3568_v46  ;;  %v3868_v49 = vpop.f32.mrf.mxu1  ;;  %v5519_v18 = vpack.c.bf16 %v5493_v55, %v5492_v58  ;;  %v5494_v23 = vld [vmem:[#allocation3 + $0xc1] sm:$0xff] }
 0x2ae   : > { %v7229_v27 = vpop.f32.mrf.mxu0  ;;  %v5520_v46 = vpack.c.bf16 %v5495_v21, %v5494_v23  ;;  %v5497_v21 = vld [vmem:[#allocation3 + $0xe1] sm:$0xff]  ;;  %v5496_v23 = vld [vmem:[#allocation3 + $0xd9] sm:$0xff] }
 0x2af   : > { %v9326_v51 = vadd.f32 %v3868_v49, %v3689_v62  ;;  %v3692_v44 = vadd.f32 %v7229_v27, %v9298_v32  ;;  %v7263_v54 = vpop.f32.mrf.mxu1 }
 0x2b0   : > { %v3571_v12 = vpop.f32.mrf.mxu0 }
 0x2b1   : > { %v9329_v47 = vadd.f32 %v7263_v54, %v3692_v44  ;;  %v3690_v31 = vadd.f32 %v9298_v32, %v3571_v12  ;;  %v3871_v48 = vpop.f32.mrf.mxu1  ;;  %v5203_v54 = vld [vmem:[#allocation3 + $0xe0] sm:$0xff]  ;;  %v5205_v12 = vld [vmem:[#allocation3 + $0xf8] sm:$0xff] }
 0x2b2   : > { %v7232_v28 = vpop.f32.mrf.mxu0  ;;  %7435 = vmatmul.mubr.msk.bf16.gmra.mxu0 %vm3073_vm5, %v5225_v35 }
 0x2b3   : > { %v9333_v62 = vadd.f32 %v3871_v48, %v3690_v31  ;;  %v3695_v49 = vadd.f32 %v7232_v28, %v9298_v32  ;;  %v7266_v27 = vpop.f32.mrf.mxu1  ;;  %7469 = vmatmul.mubr.msk.bf16.gmra.mxu1 %vm3073_vm5, %v5519_v18  ;;  %7438 = vmatprep.mubr.msk.bf16.mxu0 %vm3073_vm5, %v5226_v45  ;;  %v5202_v31 = vld [vmem:[#allocation3 + $0xd8] sm:$0xff]  ;;  %v5204_v28 = vld [vmem:[#allocation3 + $0xf0] sm:$0xff] }
 0x2b4   : > { %7472 = vmatprep.mubr.msk.bf16.mxu1 %vm3073_vm5, %v5520_v46  ;;  %v3584_v57 = vpop.f32.mrf.mxu0  ;;  %v5499_v48 = vld [vmem:[#allocation3 + $0xf9] sm:$0xff]  ;;  %v5227_v45 = vpack.c.bf16 %v5203_v54, %v5202_v31  ;;  %v5228_v14 = vpack.c.bf16 %v5205_v12, %v5204_v28  ;;  %v5503_v28 = vld [vmem:[#allocation3 + $0x129] sm:$0xff] }
 0x2b5   : > { %v9339_v44 = vadd.f32 %v7266_v27, %v3695_v49  ;;  %v3693_v55 = vadd.f32 %v9298_v32, %v3584_v57  ;;  %v3884_v39 = vpop.f32.mrf.mxu1  ;;  %v5521_v57 = vpack.c.bf16 %v5497_v21, %v5496_v23  ;;  %v5206_v23 = vld [vmem:[#allocation3 + $0x108] sm:$0xff] }
 0x2b6   : > { %v7233_v30 = vpop.f32.mrf.mxu0 }
 0x2b7   : > { %v9342_v35 = vadd.f32 %v3884_v39, %v3693_v55  ;;  %v3696_v58 = vadd.f32 %v7233_v30, %v9298_v32  ;;  %v7267_v4 = vpop.f32.mrf.mxu1  ;;  %v5522_v55 = vpack.c.bf16 %v5499_v48, %v5498_v17  ;;  %v5501_v17 = vld [vmem:[#allocation3 + $0x111] sm:$0xff]  ;;  %v5209_v48 = vld [vmem:[#allocation3 + $0x128] sm:$0xff] }
 0x2b8   : > { %v3587_v18 = vpop.f32.mrf.mxu0 }
 0x2b9   : > { %v9345_v46 = vadd.f32 %v7267_v4, %v3696_v58  ;;  %v3694_v49 = vadd.f32 %v9298_v32, %v3587_v18  ;;  %v3887_v27 = vpop.f32.mrf.mxu1  ;;  %v5207_v4 = vld [vmem:[#allocation3 + $0x110] sm:$0xff] }
 0x2ba   : > { %v7236_v2 = vpop.f32.mrf.mxu0  ;;  %7439 = vmatmul.mubr.msk.bf16.gmra.mxu0 %vm3073_vm5, %v5227_v45 }
 0x2bb   : > { %v9349_v39 = vadd.f32 %v3887_v27, %v3694_v49  ;;  %v3699_v30 = vadd.f32 %v7236_v2, %v9298_v32  ;;  %v7270_v53 = vpop.f32.mrf.mxu1  ;;  %7473 = vmatmul.mubr.msk.bf16.gmra.mxu1 %vm3073_vm5, %v5521_v57  ;;  %7442 = vmatprep.mubr.msk.bf16.mxu0 %vm3073_vm5, %v5228_v14  ;;  %v5229_v49 = vpack.c.bf16 %v5207_v4, %v5206_v23  ;;  %v5500_v27 = vld [vmem:[#allocation3 + $0x109] sm:$0xff]  ;;  %v5208_v57 = vld [vmem:[#allocation3 + $0x120] sm:$0xff] }
 0x2bc   : > { %7476 = vmatprep.mubr.msk.bf16.mxu1 %vm3073_vm5, %v5522_v55  ;;  %v3600_v54 = vpop.f32.mrf.mxu0  ;;  %v5230_v50 = vpack.c.bf16 %v5209_v48, %v5208_v57  ;;  %v5507_v57 = vld [vmem:[#allocation3 + $0x159] sm:$0xff] }
 0x2bd   : > { %v9355_v58 = vadd.f32 %v7270_v53, %v3699_v30  ;;  %v3697_v21 = vadd.f32 %v9298_v32, %v3600_v54  ;;  %v3900_v12 = vpop.f32.mrf.mxu1  ;;  %v5523_v54 = vpack.c.bf16 %v5501_v17, %v5500_v27  ;;  %v5210_v27 = vld [vmem:[#allocation3 + $0x138] sm:$0xff] }
 0x2be   : > { %v7237_v31 = vpop.f32.mrf.mxu0 }
 0x2bf   : > { %v9358_v18 = vadd.f32 %v3900_v12, %v3697_v21  ;;  %v3700_v2 = vadd.f32 %v7237_v31, %v9298_v32  ;;  %v7271_v45 = vpop.f32.mrf.mxu1  ;;  %v5524_v21 = vpack.c.bf16 %v5503_v28, %v5502_v11  ;;  %v5505_v11 = vld [vmem:[#allocation3 + $0x141] sm:$0xff]  ;;  %v5213_v28 = vld [vmem:[#allocation3 + $0x158] sm:$0xff] }
 0x2c0   : > { %v3603_v14 = vpop.f32.mrf.mxu0 }
 0x2c1   : > { %v9361_v53 = vadd.f32 %v7271_v45, %v3700_v2  ;;  %v3698_v55 = vadd.f32 %v9298_v32, %v3603_v14  ;;  %v3903_v30 = vpop.f32.mrf.mxu1  ;;  %v5211_v45 = vld [vmem:[#allocation3 + $0x140] sm:$0xff] }
 0x2c2   : > { %v7240_v3 = vpop.f32.mrf.mxu0  ;;  %7443 = vmatmul.mubr.msk.bf16.gmra.mxu0 %vm3073_vm5, %v5229_v49 }
 0x2c3   : > { %v9365_v12 = vadd.f32 %v3903_v30, %v3698_v55  ;;  %v3703_v31 = vadd.f32 %v7240_v3, %v9298_v32  ;;  %v7274_v22 = vpop.f32.mrf.mxu1  ;;  %7477 = vmatmul.mubr.msk.bf16.gmra.mxu1 %vm3073_vm5, %v5523_v54  ;;  %7446 = vmatprep.mubr.msk.bf16.mxu0 %vm3073_vm5, %v5230_v50  ;;  %v5231_v55 = vpack.c.bf16 %v5211_v45, %v5210_v27  ;;  %v5504_v30 = vld [vmem:[#allocation3 + $0x139] sm:$0xff]  ;;  %v5212_v54 = vld [vmem:[#allocation3 + $0x150] sm:$0xff] }
 0x2c4   : > { %7480 = vmatprep.mubr.msk.bf16.mxu1 %vm3073_vm5, %v5524_v21  ;;  %v3616_v4 = vpop.f32.mrf.mxu0  ;;  %v5232_v19 = vpack.c.bf16 %v5213_v28, %v5212_v54 }
 0x2c5   : > { %v9371_v2 = vadd.f32 %v7274_v22, %v3703_v31  ;;  %v3701_v17 = vadd.f32 %v9298_v32, %v3616_v4  ;;  %v3916_v48 = vpop.f32.mrf.mxu1  ;;  %v5525_v4 = vpack.c.bf16 %v5505_v11, %v5504_v30 }
 0x2c6   : > { %v7241_v23 = vpop.f32.mrf.mxu0 }
 0x2c7   : > { %v9374_v14 = vadd.f32 %v3916_v48, %v3701_v17  ;;  %v3704_v3 = vadd.f32 %v7241_v23, %v9298_v32  ;;  %v7275_v49 = vpop.f32.mrf.mxu1  ;;  %v5526_v17 = vpack.c.bf16 %v5507_v57, %v5506_v6  ;;  %v5509_v6 = vld [vmem:[#allocation3 + $0x171] sm:$0xff] }
 0x2c8   : > { %v3619_v50 = vpop.f32.mrf.mxu0 }
 0x2c9   : > { %v9377_v22 = vadd.f32 %v7275_v49, %v3704_v3  ;;  %v3702_v21 = vadd.f32 %v9298_v32, %v3619_v50  ;;  %v3919_v31 = vpop.f32.mrf.mxu1  ;;  %v5215_v49 = vld [vmem:[#allocation3 + $0x170] sm:$0xff] }
 0x2ca   : > { %v7244_v59 = vpop.f32.mrf.mxu0  ;;  %7447 = vmatmul.mubr.msk.bf16.gmra.mxu0 %vm3073_vm5, %v5231_v55  ;;  %v5214_v55 = vld [vmem:[#allocation3 + $0x168] sm:$0xff] }
 0x2cb   : > { %v9381_v48 = vadd.f32 %v3919_v31, %v3702_v21  ;;  %v3707_v23 = vadd.f32 %v7244_v59, %v9298_v32  ;;  %v7278_v26 = vpop.f32.mrf.mxu1  ;;  %7481 = vmatmul.mubr.msk.bf16.gmra.mxu1 %vm3073_vm5, %v5525_v4  ;;  %7450 = vmatprep.mubr.msk.bf16.mxu0 %vm3073_vm5, %v5232_v19  ;;  %v5233_v54 = vpack.c.bf16 %v5215_v49, %v5214_v55  ;;  %v5508_v19 = vld [vmem:[#allocation3 + $0x169] sm:$0xff]  ;;  %v5219_v49 = vld [vmem:[#allocation3 + $0x1a0] sm:$0xff] }
 0x2cc   : > { %7484 = vmatprep.mubr.msk.bf16.mxu1 %vm3073_vm5, %v5526_v17  ;;  %v3632_v45 = vpop.f32.mrf.mxu0  ;;  %v5527_v4 = vpack.c.bf16 %v5509_v6, %v5508_v19  ;;  %v5512_v6 = vld [vmem:[#allocation3 + $0x199] sm:$0xff] }
 0x2cd   : > { %v9387_v3 = vadd.f32 %v7278_v26, %v3707_v23  ;;  %v3705_v11 = vadd.f32 %v9298_v32, %v3632_v45  ;;  %v3932_v28 = vpop.f32.mrf.mxu1 }
 0x2ce   : > { %v7245_v27 = vpop.f32.mrf.mxu0 }
 0x2cf   : > { %v9390_v57 = vadd.f32 %v3932_v28, %v3705_v11  ;;  %v3708_v59 = vadd.f32 %v7245_v27, %v9298_v32  ;;  %v7279_v50 = vpop.f32.mrf.mxu1  ;;  %v5218_v28 = vld [vmem:[#allocation3 + $0x198] sm:$0xff] }
 0x2d0   : > { %v3635_v30 = vpop.f32.mrf.mxu0  ;;  %v5235_v19 = vpack.c.bf16 %v5219_v49, %v5218_v28 }
 0x2d1   : > { %v9393_v21 = vadd.f32 %v7279_v50, %v3708_v59  ;;  %v3706_v26 = vadd.f32 %v9298_v32, %v3635_v30  ;;  %v3935_v31 = vpop.f32.mrf.mxu1  ;;  %v5513_v59 = vld [vmem:[#allocation3 + $0x1a1] sm:$0xff] }
 0x2d2   : > { %v7248_v17 = vpop.f32.mrf.mxu0  ;;  %7451 = vmatmul.mubr.msk.bf16.gmra.mxu0 %vm3073_vm5, %v5233_v54  ;;  %v5529_v10 = vpack.c.bf16 %v5513_v59, %v5512_v6 }
 0x2d3   : > { %v9397_v23 = vadd.f32 %v3935_v31, %v3706_v26  ;;  %v3711_v45 = vadd.f32 %v7248_v17, %v9298_v32  ;;  %v7282_v11 = vpop.f32.mrf.mxu1  ;;  %7485 = vmatmul.mubr.msk.bf16.gmra.mxu1 %vm3073_vm5, %v5527_v4  ;;  %7454 = vmatprep.mubr.msk.bf16.mxu0 %vm3073_vm5, %v9176_v15  ;;  %v5776_v26 = vld [vmem:[#allocation3 + $0x32] sm:$0xff]  ;;  %v5777_v31 = vld [vmem:[#allocation3 + $0x3a] sm:$0xff] }
 0x2d4   : > { %7488 = vmatprep.mubr.msk.bf16.mxu1 %vm3073_vm5, %v9281_v63  ;;  %v3648_v27 = vpop.f32.mrf.mxu0 }
 0x2d5   : > { %v9405_v50 = vadd.f32 %v7282_v11, %v3711_v45  ;;  %v3709_v55 = vadd.f32 %v9298_v32, %v3648_v27  ;;  %v3948_v30 = vpop.f32.mrf.mxu1  ;;  %v5808_v11 = vpack.c.bf16 %v5777_v31, %v5776_v26  ;;  %v5780_v31 = vld [vmem:[#allocation3 + $0x62] sm:$0xff] }
 0x2d6   : > { %v7249_v54 = vpop.f32.mrf.mxu0 }
 0x2d7   : > { %v9408_v4 = vadd.f32 %v3948_v30, %v3709_v55  ;;  %v3712_v15 = vadd.f32 %v7249_v54, %v9298_v32  ;;  %v7283_v17 = vpop.f32.mrf.mxu1  ;;  %v5778_v30 = vld [vmem:[#allocation3 + $0x4a] sm:$0xff]  ;;  %v5779_v54 = vld [vmem:[#allocation3 + $0x52] sm:$0xff] }
 0x2d8   : > { %v3651_v60 = vpop.f32.mrf.mxu0 }
 0x2d9   : > { %v9411_v63 = vadd.f32 %v7283_v17, %v3712_v15  ;;  %v3710_v25 = vadd.f32 %v9298_v32, %v3651_v60  ;;  %v3951_v45 = vpop.f32.mrf.mxu1 }
 0x2da   : > { %v7252_v1 = vpop.f32.mrf.mxu0  ;;  %7455 = vmatmul.mubr.msk.bf16.gmra.mxu0 %vm3073_vm5, %v5235_v19  ;;  %v5781_v19 = vld [vmem:[#allocation3 + $0x6a] sm:$0xff] }
 0x2db   : > { %v9415_v27 = vadd.f32 %v3951_v45, %v3710_v25  ;;  %v3715_v28 = vadd.f32 %v7252_v1, %v9298_v32  ;;  %v7286_v49 = vpop.f32.mrf.mxu1  ;;  %7494 = vmatprep.mubr.msk.bf16.mxu0 %vm3073_vm5, %v5808_v11  ;;  %7489 = vmatmul.mubr.msk.bf16.gmra.mxu1 %vm3073_vm5, %v5529_v10  ;;  %v5809_v45 = vpack.c.bf16 %v5779_v54, %v5778_v30 }
 0x2dc   : > { %v3664_v6 = vpop.f32.mrf.mxu0 }
 0x2dd   : > { %v9420_v59 = vadd.f32 %v7286_v49, %v3715_v28  ;;  %v3713_v55 = vadd.f32 %v9298_v32, %v3664_v6  ;;  %v3964_v60 = vpop.f32.mrf.mxu1  ;;  %v5810_v49 = vpack.c.bf16 %v5781_v19, %v5780_v31  ;;  %v5784_v31 = vld [vmem:[#allocation3 + $0x92] sm:$0xff]  ;;  %v5785_v19 = vld [vmem:[#allocation3 + $0x9a] sm:$0xff] }
 0x2de   : > { %v7253_v26 = vpop.f32.mrf.mxu0 }
 0x2df   : > { %v9423_v25 = vadd.f32 %v3964_v60, %v3713_v55  ;;  %v3716_v1 = vadd.f32 %v7253_v26, %v9298_v32  ;;  %v7287_v15 = vpop.f32.mrf.mxu1 }
 0x2e0   : > { %v3667_v17 = vpop.f32.mrf.mxu0 }
 0x2e1   : > { %v9426_v11 = vadd.f32 %v7287_v15, %v3716_v1  ;;  %v3714_v10 = vadd.f32 %v9298_v32, %v3667_v17  ;;  %v3967_v28 = vpop.f32.mrf.mxu1  ;;  %v5782_v1 = vld [vmem:[#allocation3 + $0x7a] sm:$0xff]  ;;  %v5783_v32 = vld [vmem:[#allocation3 + $0x82] sm:$0xff] }
 0x2e2   : > { %v7292_v6 = vpop.f32.mrf.mxu0  ;;  %7495 = vmatmul.mubr.msk.bf16.vlgmr.msra.gmra.mxu0 %vm3073_vm5, %v5809_v45 }
 0x2e3   : > { %v9430_v43 = vadd.f32 %v3967_v28, %v3714_v10  ;;  %v4275_v34 = vadd.f32 %v7292_v6, %v9307_v8  ;;  %v7326_v55 = vpop.f32.mrf.mxu1  ;;  %7498 = vmatprep.mubr.msk.bf16.mxu0 %vm3073_vm5, %v5810_v49  ;;  %v5811_v28 = vpack.c.bf16 %v5783_v32, %v5782_v1 }
 0x2e4   : > { %v4146_v60 = vpop.f32.mrf.mxu0 }
 0x2e5   : > { %v9434_v26 = vadd.f32 %v7326_v55, %v4275_v34  ;;  %v4273_v30 = vadd.f32 %v4146_v60, %v9310_v33  ;;  %v4440_v54 = vpop.f32.mrf.mxu1  ;;  %v5812_v55 = vpack.c.bf16 %v5785_v19, %v5784_v31  ;;  %v5788_v31 = vld [vmem:[#allocation3 + $0xc2] sm:$0xff]  ;;  %v5789_v19 = vld [vmem:[#allocation3 + $0xca] sm:$0xff] }
 0x2e6   : > { %v7293_v15 = vpop.f32.mrf.mxu0 }
 0x2e7   : > { %v9437_v17 = vadd.f32 %v4440_v54, %v4273_v30  ;;  %v4276_v45 = vadd.f32 %v7293_v15, %v9313_v40  ;;  %v7327_v10 = vpop.f32.mrf.mxu1  ;;  %v5786_v15 = vld [vmem:[#allocation3 + $0xaa] sm:$0xff] }
 0x2e8   : > { %v4149_v8 = vpop.f32.mrf.mxu0 }
 0x2e9   : > { %v9440_v6 = vadd.f32 %v7327_v10, %v4276_v45  ;;  %v4274_v34 = vadd.f32 %v4149_v8, %v9317_v42  ;;  %v4443_v49 = vpop.f32.mrf.mxu1  ;;  %v5787_v42 = vld [vmem:[#allocation3 + $0xb2] sm:$0xff] }
 0x2ea   : > { %v7296_v33 = vpop.f32.mrf.mxu0  ;;  %7499 = vmatmul.mubr.msk.bf16.gmra.mxu0 %vm3073_vm5, %v5811_v28 }
 0x2eb   : > { %v9444_v60 = vadd.f32 %v4443_v49, %v4274_v34  ;;  %v4279_v36 = vadd.f32 %v7296_v33, %v9323_v56  ;;  %v7330_v30 = vpop.f32.mrf.mxu1  ;;  %7502 = vmatprep.mubr.msk.bf16.mxu0 %vm3073_vm5, %v5812_v55  ;;  %v5813_v34 = vpack.c.bf16 %v5787_v42, %v5786_v15  ;;  %v5814_v33 = vpack.c.bf16 %v5789_v19, %v5788_v31  ;;  %v5792_v31 = vld [vmem:[#allocation3 + $0xf2] sm:$0xff]  ;;  %v5793_v19 = vld [vmem:[#allocation3 + $0xfa] sm:$0xff] }
 0x2ec   : > { %v4162_v40 = vpop.f32.mrf.mxu0 }
 0x2ed   : > { %v9448_v54 = vadd.f32 %v7330_v30, %v4279_v36  ;;  %v4277_v1 = vadd.f32 %v4162_v40, %v9326_v51  ;;  %v4456_v32 = vpop.f32.mrf.mxu1 }
 0x2ee   : > { %v7297_v45 = vpop.f32.mrf.mxu0 }
 0x2ef   : > { %v9451_v10 = vadd.f32 %v4456_v32, %v4277_v1  ;;  %v4280_v8 = vadd.f32 %v7297_v45, %v9329_v47  ;;  %v7331_v28 = vpop.f32.mrf.mxu1  ;;  %v5790_v45 = vld [vmem:[#allocation3 + $0xda] sm:$0xff] }
 0x2f0   : > { %v4165_v56 = vpop.f32.mrf.mxu0 }
 0x2f1   : > { %v9454_v49 = vadd.f32 %v7331_v28, %v4280_v8  ;;  %v4278_v36 = vadd.f32 %v4165_v56, %v9333_v62  ;;  %v4459_v55 = vpop.f32.mrf.mxu1  ;;  %v5791_v62 = vld [vmem:[#allocation3 + $0xe2] sm:$0xff] }
 0x2f2   : > { %v7300_v51 = vpop.f32.mrf.mxu0  ;;  %7503 = vmatmul.mubr.msk.bf16.gmra.mxu0 %vm3073_vm5, %v5813_v34 }
 0x2f3   : > { %v9458_v30 = vadd.f32 %v4459_v55, %v4278_v36  ;;  %v4283_v40 = vadd.f32 %v7300_v51, %v9339_v44  ;;  %v7334_v1 = vpop.f32.mrf.mxu1  ;;  %7506 = vmatprep.mubr.msk.bf16.mxu0 %vm3073_vm5, %v5814_v33  ;;  %v5815_v36 = vpack.c.bf16 %v5791_v62, %v5790_v45 }
 0x2f4   : > { %v4178_v47 = vpop.f32.mrf.mxu0 }
 0x2f5   : > { %v9462_v32 = vadd.f32 %v7334_v1, %v4283_v40  ;;  %v4281_v15 = vadd.f32 %v4178_v47, %v9342_v35  ;;  %v4472_v42 = vpop.f32.mrf.mxu1  ;;  %v5816_v40 = vpack.c.bf16 %v5793_v19, %v5792_v31  ;;  %v5796_v31 = vld [vmem:[#allocation3 + $0x122] sm:$0xff]  ;;  %v5797_v19 = vld [vmem:[#allocation3 + $0x12a] sm:$0xff] }
 0x2f6   : > { %v7301_v8 = vpop.f32.mrf.mxu0 }
 0x2f7   : > { %v9465_v28 = vadd.f32 %v4472_v42, %v4281_v15  ;;  %v4284_v56 = vadd.f32 %v7301_v8, %v9345_v46  ;;  %v7335_v34 = vpop.f32.mrf.mxu1  ;;  %v5794_v8 = vld [vmem:[#allocation3 + $0x10a] sm:$0xff] }
 0x2f8   : > { %v4181_v44 = vpop.f32.mrf.mxu0 }
 0x2f9   : > { %v9468_v55 = vadd.f32 %v7335_v34, %v4284_v56  ;;  %v4282_v33 = vadd.f32 %v4181_v44, %v9349_v39  ;;  %v4475_v51 = vpop.f32.mrf.mxu1  ;;  %v5795_v39 = vld [vmem:[#allocation3 + $0x112] sm:$0xff] }
 0x2fa   : > { %v7304_v35 = vpop.f32.mrf.mxu0  ;;  %7507 = vmatmul.mubr.msk.bf16.gmra.mxu0 %vm3073_vm5, %v5815_v36 }
 0x2fb   : > { %v9472_v1 = vadd.f32 %v4475_v51, %v4282_v33  ;;  %v4287_v47 = vadd.f32 %v7304_v35, %v9355_v58  ;;  %v7338_v15 = vpop.f32.mrf.mxu1  ;;  %7510 = vmatprep.mubr.msk.bf16.mxu0 %vm3073_vm5, %v5816_v40  ;;  %v5817_v33 = vpack.c.bf16 %v5795_v39, %v5794_v8 }
 0x2fc   : > { %v4194_v46 = vpop.f32.mrf.mxu0 }
 0x2fd   : > { %v9476_v42 = vadd.f32 %v7338_v15, %v4287_v47  ;;  %v4285_v45 = vadd.f32 %v4194_v46, %v9358_v18  ;;  %v4488_v62 = vpop.f32.mrf.mxu1  ;;  %v5818_v47 = vpack.c.bf16 %v5797_v19, %v5796_v31  ;;  %v5800_v31 = vld [vmem:[#allocation3 + $0x152] sm:$0xff]  ;;  %v5801_v19 = vld [vmem:[#allocation3 + $0x15a] sm:$0xff] }
 0x2fe   : > { %v7305_v56 = vpop.f32.mrf.mxu0 }
 0x2ff   : > { %v9479_v34 = vadd.f32 %v4488_v62, %v4285_v45  ;;  %v4288_v44 = vadd.f32 %v7305_v56, %v9361_v53  ;;  %v7339_v36 = vpop.f32.mrf.mxu1  ;;  %v5798_v56 = vld [vmem:[#allocation3 + $0x13a] sm:$0xff] }
 0x300   : > { %v4197_v58 = vpop.f32.mrf.mxu0 }
 0x301   : > { %v9482_v51 = vadd.f32 %v7339_v36, %v4288_v44  ;;  %v4286_v40 = vadd.f32 %v4197_v58, %v9365_v12  ;;  %v4491_v35 = vpop.f32.mrf.mxu1  ;;  %v5799_v12 = vld [vmem:[#allocation3 + $0x142] sm:$0xff] }
 0x302   : > { %v7308_v18 = vpop.f32.mrf.mxu0  ;;  %7511 = vmatmul.mubr.msk.bf16.gmra.mxu0 %vm3073_vm5, %v5817_v33 }
 0x303   : > { %v9486_v15 = vadd.f32 %v4491_v35, %v4286_v40  ;;  %v4291_v46 = vadd.f32 %v7308_v18, %v9371_v2  ;;  %v7342_v45 = vpop.f32.mrf.mxu1  ;;  %7514 = vmatprep.mubr.msk.bf16.mxu0 %vm3073_vm5, %v5818_v47  ;;  %v5819_v40 = vpack.c.bf16 %v5799_v12, %v5798_v56 }
 0x304   : > { %v4210_v53 = vpop.f32.mrf.mxu0 }
 0x305   : > { %v9490_v62 = vadd.f32 %v7342_v45, %v4291_v46  ;;  %v4289_v8 = vadd.f32 %v4210_v53, %v9374_v14  ;;  %v4504_v39 = vpop.f32.mrf.mxu1  ;;  %v5820_v46 = vpack.c.bf16 %v5801_v19, %v5800_v31 }
 0x306   : > { %v7309_v44 = vpop.f32.mrf.mxu0 }
 0x307   : > { %v9493_v36 = vadd.f32 %v4504_v39, %v4289_v8  ;;  %v4292_v58 = vadd.f32 %v7309_v44, %v9377_v22  ;;  %v7343_v33 = vpop.f32.mrf.mxu1  ;;  %v5802_v44 = vld [vmem:[#allocation3 + $0x16a] sm:$0xff] }
 0x308   : > { %v4213_v2 = vpop.f32.mrf.mxu0 }
 0x309   : > { %v9496_v35 = vadd.f32 %v7343_v33, %v4292_v58  ;;  %v4290_v47 = vadd.f32 %v4213_v2, %v9381_v48  ;;  %v4507_v18 = vpop.f32.mrf.mxu1  ;;  %v5803_v48 = vld [vmem:[#allocation3 + $0x172] sm:$0xff] }
 0x30a   : > { %v7312_v14 = vpop.f32.mrf.mxu0  ;;  %7515 = vmatmul.mubr.msk.bf16.gmra.mxu0 %vm3073_vm5, %v5819_v40  ;;  %v5821_v40 = vpack.c.bf16 %v5803_v48, %v5802_v44 }
 0x30b   : > { %v9500_v45 = vadd.f32 %v4507_v18, %v4290_v47  ;;  %v4295_v53 = vadd.f32 %v7312_v14, %v9387_v3  ;;  %v7346_v8 = vpop.f32.mrf.mxu1  ;;  %7518 = vmatprep.mubr.msk.bf16.mxu0 %vm3073_vm5, %v5820_v46 }
 0x30c   : > { %v4226_v22 = vpop.f32.mrf.mxu0 }
 0x30d   : > { %v9504_v39 = vadd.f32 %v7346_v8, %v4295_v53  ;;  %v4293_v56 = vadd.f32 %v4226_v22, %v9390_v57  ;;  %v4520_v12 = vpop.f32.mrf.mxu1  ;;  %v5807_v8 = vld [vmem:[#allocation3 + $0x1a2] sm:$0xff] }
 0x30e   : > { %v7313_v58 = vpop.f32.mrf.mxu0 }
 0x30f   : > { %v9507_v31 = vadd.f32 %v4520_v12, %v4293_v56  ;;  %v4296_v19 = vadd.f32 %v7313_v58, %v9393_v21  ;;  %v7347_v33 = vpop.f32.mrf.mxu1  ;;  %v5806_v21 = vld [vmem:[#allocation3 + $0x19a] sm:$0xff] }
 0x310   : > { %v4229_v2 = vpop.f32.mrf.mxu0  ;;  %v5823_v48 = vpack.c.bf16 %v5807_v8, %v5806_v21 }
 0x311   : > { %v9510_v3 = vadd.f32 %v7347_v33, %v4296_v19  ;;  %v4294_v47 = vadd.f32 %v4229_v2, %v9397_v23  ;;  %v4523_v18 = vpop.f32.mrf.mxu1 }
 0x312   : > { %v7316_v46 = vpop.f32.mrf.mxu0  ;;  %7519 = vmatmul.mubr.msk.bf16.gmra.mxu0 %vm3073_vm5, %v5821_v40 }
 0x313   : > { %v9514_v57 = vadd.f32 %v4523_v18, %v4294_v47  ;;  %v4299_v14 = vadd.f32 %v7316_v46, %v9405_v50  ;;  %v7350_v53 = vpop.f32.mrf.mxu1  ;;  %7522 = vmatprep.mubr.msk.bf16.mxu0 %vm3073_vm5, %v9283_v16 }
 0x314   : > { %v4242_v22 = vpop.f32.mrf.mxu0 }
 0x315   : > { %v9519_v56 = vadd.f32 %v7350_v53, %v4299_v14  ;;  %v4297_v12 = vadd.f32 %v4242_v22, %v9408_v4  ;;  %v4536_v23 = vpop.f32.mrf.mxu1 }
 0x316   : > { %v7317_v44 = vpop.f32.mrf.mxu0 }
 0x317   : > { %v9522_v58 = vadd.f32 %v4536_v23, %v4297_v12  ;;  %v4300_v19 = vadd.f32 %v7317_v44, %v9411_v63  ;;  %v7351_v33 = vpop.f32.mrf.mxu1 }
 0x318   : > { %v4245_v50 = vpop.f32.mrf.mxu0 }
 0x319   : > { %v9525_v2 = vadd.f32 %v7351_v33, %v4300_v19  ;;  %v4298_v16 = vadd.f32 %v4245_v50, %v9415_v27  ;;  %v4539_v40 = vpop.f32.mrf.mxu1 }
 0x31a   : > { %v7320_v47 = vpop.f32.mrf.mxu0  ;;  %7523 = vmatmul.mubr.msk.bf16.gmra.mxu0 %vm3073_vm5, %v5823_v48 }
 0x31b   : > { %v9529_v18 = vadd.f32 %v4539_v40, %v4298_v16  ;;  %v4303_v4 = vadd.f32 %v7320_v47, %v9420_v59  ;;  %v7354_v46 = vpop.f32.mrf.mxu1 }
 0x31c   : > { %v4258_v14 = vpop.f32.mrf.mxu0 }
 0x31d   : > { %v9532_v53 = vadd.f32 %v7354_v46, %v4303_v4  ;;  %v4301_v63 = vadd.f32 %v4258_v14, %v9423_v25  ;;  %v4552_v21 = vpop.f32.mrf.mxu1 }
 0x31e   : > { %v7321_v8 = vpop.f32.mrf.mxu0 }
 0x31f   : > { %v9535_v22 = vadd.f32 %v4552_v21, %v4301_v63  ;;  %v4304_v27 = vadd.f32 %v7321_v8, %v9426_v11  ;;  %v7355_v12 = vpop.f32.mrf.mxu1 }
 0x320   : > { %v4261_v23 = vpop.f32.mrf.mxu0 }
 0x321   : > { %v9538_v44 = vadd.f32 %v7355_v12, %v4304_v27  ;;  %v4302_v48 = vadd.f32 %v4261_v23, %v9430_v43  ;;  %v4555_v19 = vpop.f32.mrf.mxu1 }
 0x322   : > { %v7360_v59 = vpop.f32.mrf.mxu0 }
 0x323   : > { %v9541_v33 = vadd.f32 %v4555_v19, %v4302_v48  ;;  %v9544_v50 = vadd.f32 %v7360_v59, %v9434_v26  ;;  %v9546_v25 = vpop.f32.mrf.mxu1 }
 0x324   : > { %v4734_v16 = vpop.f32.mrf.mxu0 }
 0x325   : > { %v9549_v40 = vadd.f32 %v4734_v16, %v9437_v17  ;;  %v9551_v11 = vpop.f32.mrf.mxu1 }
 0x326   : > { %v7361_v47 = vpop.f32.mrf.mxu0 }
 0x327   : > { %v9554_v4 = vadd.f32 %v7361_v47, %v9440_v6  ;;  %v9556_v43 = vpop.f32.mrf.mxu1 }
 0x328   : > { %v4737_v46 = vpop.f32.mrf.mxu0 }
 0x329   : > { %v9559_v14 = vadd.f32 %v4737_v46, %v9444_v60  ;;  %v9561_v26 = vpop.f32.mrf.mxu1 }
 0x32a   : > { %v7364_v63 = vpop.f32.mrf.mxu0 }
 0x32b   : > { %v9564_v21 = vadd.f32 %v7364_v63, %v9448_v54  ;;  %v9566_v17 = vpop.f32.mrf.mxu1 }
 0x32c   : > { %v4750_v8 = vpop.f32.mrf.mxu0 }
 0x32d   : > { %v9569_v27 = vadd.f32 %v4750_v8, %v9451_v10  ;;  %v9571_v6 = vpop.f32.mrf.mxu1 }
 0x32e   : > { %v7365_v12 = vpop.f32.mrf.mxu0 }
 0x32f   : > { %v9574_v23 = vadd.f32 %v7365_v12, %v9454_v49  ;;  %v9576_v60 = vpop.f32.mrf.mxu1 }
 0x330   : > { %v4753_v48 = vpop.f32.mrf.mxu0 }
 0x331   : > { %v9579_v19 = vadd.f32 %v4753_v48, %v9458_v30  ;;  %v9581_v54 = vpop.f32.mrf.mxu1 }
 0x332   : > { %v7368_v59 = vpop.f32.mrf.mxu0 }
 0x333   : > { %v9584_v16 = vadd.f32 %v7368_v59, %v9462_v32  ;;  %v9586_v10 = vpop.f32.mrf.mxu1 }
 0x334   : > { %v4766_v47 = vpop.f32.mrf.mxu0 }
 0x335   : > { %v9589_v46 = vadd.f32 %v4766_v47, %v9465_v28  ;;  %v9591_v49 = vpop.f32.mrf.mxu1 }
 0x336   : > { %v7369_v63 = vpop.f32.mrf.mxu0 }
 0x337   : > { %v9594_v8 = vadd.f32 %v7369_v63, %v9468_v55  ;;  %v9596_v30 = vpop.f32.mrf.mxu1 }
 0x338   : > { %v4769_v12 = vpop.f32.mrf.mxu0 }
 0x339   : > { %v9599_v48 = vadd.f32 %v4769_v12, %v9472_v1  ;;  %v9601_v32 = vpop.f32.mrf.mxu1 }
 0x33a   : > { %v7372_v59 = vpop.f32.mrf.mxu0 }
 0x33b   : > { %v9604_v38 = vadd.f32 %v7372_v59, %v9476_v42  ;;  %v9606_v28 = vpop.f32.mrf.mxu1 }
 0x33c   : > { %10189 = vst [vmem:[#allocation45_spill] sm:$0xff] %v9606_v28  ;;  %v4782_v47 = vpop.f32.mrf.mxu0 }
 0x33d   : > { %10188 = vst [vmem:[#allocation17_spill] sm:$0xff] %v9604_v38  ;;  %v9609_v37 = vadd.f32 %v4782_v47, %v9479_v34  ;;  %v9611_v55 = vpop.f32.mrf.mxu1 }
 0x33e   : > { %10191 = vst [vmem:[#allocation40_spill] sm:$0xff] %v9611_v55  ;;  %v7373_v63 = vpop.f32.mrf.mxu0 }
 0x33f   : > { %10190 = vst [vmem:[#allocation16_spill] sm:$0xff] %v9609_v37  ;;  %v9614_v20 = vadd.f32 %v7373_v63, %v9482_v51  ;;  %v9616_v1 = vpop.f32.mrf.mxu1 }
 0x340   : > { %10193 = vst [vmem:[#allocation47_spill] sm:$0xff] %v9616_v1  ;;  %v4785_v12 = vpop.f32.mrf.mxu0 }
 0x341   : > { %10192 = vst [vmem:[#allocation19_spill] sm:$0xff] %v9614_v20  ;;  %v9619_v5 = vadd.f32 %v4785_v12, %v9486_v15  ;;  %v9621_v42 = vpop.f32.mrf.mxu1 }
 0x342   : > { %10195 = vst [vmem:[#allocation23_spill] sm:$0xff] %v9621_v42  ;;  %v7376_v59 = vpop.f32.mrf.mxu0 }
 0x343   : > { %10194 = vst [vmem:[#allocation42_spill] sm:$0xff] %v9619_v5  ;;  %v9624_v28 = vadd.f32 %v7376_v59, %v9490_v62  ;;  %v9626_v34 = vpop.f32.mrf.mxu1 }
 0x344   : > { %10197 = vst [vmem:[#allocation44_spill] sm:$0xff] %v9626_v34  ;;  %v4798_v47 = vpop.f32.mrf.mxu0 }
 0x345   : > { %10196 = vst [vmem:[#allocation49_spill] sm:$0xff] %v9624_v28  ;;  %v9629_v55 = vadd.f32 %v4798_v47, %v9493_v36  ;;  %v9631_v51 = vpop.f32.mrf.mxu1 }
 0x346   : > { %10199 = vst [vmem:[#allocation51_spill] sm:$0xff] %v9631_v51  ;;  %v7377_v63 = vpop.f32.mrf.mxu0 }
 0x347   : > { %10198 = vst [vmem:[#allocation20_spill] sm:$0xff] %v9629_v55  ;;  %v9634_v1 = vadd.f32 %v7377_v63, %v9496_v35  ;;  %v9636_v15 = vpop.f32.mrf.mxu1 }
 0x348   : > { %10201 = vst [vmem:[#allocation5_spill] sm:$0xff] %v9636_v15  ;;  %v4801_v12 = vpop.f32.mrf.mxu0 }
 0x349   : > { %10200 = vst [vmem:[#allocation46_spill] sm:$0xff] %v9634_v1  ;;  %v9639_v42 = vadd.f32 %v4801_v12, %v9500_v45  ;;  %v9641_v62 = vpop.f32.mrf.mxu1 }
 0x34a   : > { %10203 = vst [vmem:[#allocation22_spill] sm:$0xff] %v9641_v62  ;;  %v7380_v59 = vpop.f32.mrf.mxu0 }
 0x34b   : > { %10202 = vst [vmem:[#allocation4_spill] sm:$0xff] %v9639_v42  ;;  %v9644_v34 = vadd.f32 %v7380_v59, %v9504_v39  ;;  %v9646_v36 = vpop.f32.mrf.mxu1 }
 0x34c   : > { %10205 = vst [vmem:[#allocation21_spill] sm:$0xff] %v9646_v36  ;;  %v4814_v47 = vpop.f32.mrf.mxu0 }
 0x34d   : > { %10204 = vst [vmem:[#allocation53_spill] sm:$0xff] %v9644_v34  ;;  %v9649_v51 = vadd.f32 %v4814_v47, %v9507_v31  ;;  %v9651_v35 = vpop.f32.mrf.mxu1 }
 0x34e   : > { %10207 = vst [vmem:[#allocation24_spill] sm:$0xff] %v9651_v35  ;;  %v7381_v63 = vpop.f32.mrf.mxu0 }
 0x34f   : > { %10206 = vst [vmem:[#allocation48_spill] sm:$0xff] %v9649_v51  ;;  %v9654_v15 = vadd.f32 %v7381_v63, %v9510_v3  ;;  %v9656_v45 = vpop.f32.mrf.mxu1 }
 0x350   : > { %10209 = vst [vmem:[#allocation50_spill] sm:$0xff] %v9656_v45  ;;  %v4817_v12 = vpop.f32.mrf.mxu0 }
 0x351   : > { %10208 = vst [vmem:[#allocation55_spill] sm:$0xff] %v9654_v15  ;;  %v9659_v62 = vadd.f32 %v4817_v12, %v9514_v57  ;;  %v9661_v39 = vpop.f32.mrf.mxu1 }
 0x352   : > { %10211 = vst [vmem:[#allocation57_spill] sm:$0xff] %v9661_v39  ;;  %v7384_v59 = vpop.f32.mrf.mxu0 }
 0x353   : > { %10210 = vst [vmem:[#allocation28_spill] sm:$0xff] %v9659_v62  ;;  %v9664_v36 = vadd.f32 %v7384_v59, %v9519_v56  ;;  %v9666_v31 = vpop.f32.mrf.mxu1 }
 0x354   : > { %10213 = vst [vmem:[#allocation25_spill] sm:$0xff] %v9666_v31  ;;  %v4830_v47 = vpop.f32.mrf.mxu0 }
 0x355   : > { %10212 = vst [vmem:[#allocation52_spill] sm:$0xff] %v9664_v36  ;;  %v9669_v35 = vadd.f32 %v4830_v47, %v9522_v58  ;;  %v9671_v3 = vpop.f32.mrf.mxu1 }
 0x356   : > { %10215 = vst [vmem:[#allocation54_spill] sm:$0xff] %v9671_v3  ;;  %v7385_v63 = vpop.f32.mrf.mxu0 }
 0x357   : > { %10214 = vst [vmem:[#allocation59_spill] sm:$0xff] %v9669_v35  ;;  %v9674_v45 = vadd.f32 %v7385_v63, %v9525_v2  ;;  %v9676_v57 = vpop.f32.mrf.mxu1 }
 0x358   : > { %10217 = vst [vmem:[#allocation61_spill] sm:$0xff] %v9676_v57  ;;  %v4833_v12 = vpop.f32.mrf.mxu0 }
 0x359   : > { %10216 = vst [vmem:[#allocation27_spill] sm:$0xff] %v9674_v45  ;;  %v9679_v39 = vadd.f32 %v4833_v12, %v9529_v18  ;;  %v9681_v56 = vpop.f32.mrf.mxu1 }
 0x35a   : > { %10219 = vst [vmem:[#allocation56_spill] sm:$0xff] %v9681_v56  ;;  %v7388_v59 = vpop.f32.mrf.mxu0 }
 0x35b   : > { %10218 = vst [vmem:[#allocation26_spill] sm:$0xff] %v9679_v39  ;;  %v9684_v31 = vadd.f32 %v7388_v59, %v9532_v53  ;;  %v9686_v58 = vpop.f32.mrf.mxu1 }
 0x35c   : > { %10221 = vst [vmem:[#allocation63_spill] sm:$0xff] %v9686_v58  ;;  %v4846_v47 = vpop.f32.mrf.mxu0 }
 0x35d   : > { %10220 = vst [vmem:[#allocation29_spill] sm:$0xff] %v9684_v31  ;;  %v9689_v3 = vadd.f32 %v4846_v47, %v9535_v22  ;;  %v9691_v2 = vpop.f32.mrf.mxu1 }
 0x35e   : > { %10223 = vst [vmem:[#allocation65_spill] sm:$0xff] %v9691_v2  ;;  %v7389_v63 = vpop.f32.mrf.mxu0 }
 0x35f   : > { %10222 = vst [vmem:[#allocation58_spill] sm:$0xff] %v9689_v3  ;;  %v9694_v57 = vadd.f32 %v7389_v63, %v9538_v44  ;;  %v9696_v18 = vpop.f32.mrf.mxu1 }
 0x360   : > { %10225 = vst [vmem:[#allocation62_spill] sm:$0xff] %v9696_v18  ;;  %v4849_v12 = vpop.f32.mrf.mxu0 }
 0x361   : > { %10224 = vst [vmem:[#allocation60_spill] sm:$0xff] %v9694_v57  ;;  %v9699_v56 = vadd.f32 %v4849_v12, %v9541_v33  ;;  %v9701_v53 = vpop.f32.mrf.mxu1 }
 0x362   : > { %10227 = vst [vmem:[#allocation66_spill] sm:$0xff] %v9701_v53  ;;  %v7428_v59 = vpop.f32.mrf.mxu0 }
 0x363   : > { %10226 = vst [vmem:[#allocation64_spill] sm:$0xff] %v9699_v56  ;;  %v7462_v58 = vpop.f32.mrf.mxu1 }
 0x364   : > { %v5323_v31 = vpop.f32.mrf.mxu0 }
 0x365   : > { %v5617_v39 = vpop.f32.mrf.mxu1 }
 0x366   : > { %v7429_v22 = vpop.f32.mrf.mxu0 }
 0x367   : > { %v7463_v3 = vpop.f32.mrf.mxu1 }
 0x368   : > { %v5326_v47 = vpop.f32.mrf.mxu0 }
 0x369   : > { %v9705_v44 = vpop.f32.mrf.mxu1 }
 0x36a   : > { %v7432_v2 = vpop.f32.mrf.mxu0 }
 0x36b   : > { %v9711_v33 = vpop.f32.mrf.mxu1 }
 0x36c   : > { %v9703_v45 = vpop.f32.mrf.mxu0 }
 0x36d   : > { %v9717_v56 = vpop.f32.mrf.mxu1 }
 0x36e   : > { %v9707_v63 = vpop.f32.mrf.mxu0 }
 0x36f   : > { %v9723_v36 = vpop.f32.mrf.mxu1 }
 0x370   : > { %v9709_v18 = vpop.f32.mrf.mxu0 }
 0x371   : > { %v9729_v51 = vpop.f32.mrf.mxu1 }
 0x372   : > { %v9713_v12 = vpop.f32.mrf.mxu0 }
 0x373   : > { %v9735_v1 = vpop.f32.mrf.mxu1 }
 0x374   : > { %v9715_v53 = vpop.f32.mrf.mxu0 }
 0x375   : > { %v9741_v5 = vpop.f32.mrf.mxu1 }
 0x376   : > { %v9719_v57 = vpop.f32.mrf.mxu0  ;;  %10235 = vst [vmem:[#allocation74_spill] sm:$0xff] %v9741_v5 }
 0x378   : > { %v9721_v35 = vpop.f32.mrf.mxu0 }
 0x379   : > { %10228 = vst [vmem:[#allocation67_spill] sm:$0xff] %v9721_v35 }
 0x37a   : > { %v9725_v62 = vpop.f32.mrf.mxu0 }
 0x37b   : > { %10229 = vst [vmem:[#allocation68_spill] sm:$0xff] %v9725_v62  ;;  %v9747_v62 = vpop.f32.mrf.mxu1 }
 0x37c   : > { %v9727_v15 = vpop.f32.mrf.mxu0  ;;  %10238 = vst [vmem:[#allocation77_spill] sm:$0xff] %v9747_v62 }
 0x37d   : > { %10230 = vst [vmem:[#allocation69_spill] sm:$0xff] %v9727_v15 }
 0x37e   : > { %v9731_v34 = vpop.f32.mrf.mxu0 }
 0x37f   : > { %10231 = vst [vmem:[#allocation70_spill] sm:$0xff] %v9731_v34  ;;  %v9753_v34 = vpop.f32.mrf.mxu1 }
 0x380   : > { %v9733_v42 = vpop.f32.mrf.mxu0 }
 0x381   : > { %10232 = vst [vmem:[#allocation71_spill] sm:$0xff] %v9733_v42 }
 0x382   : > { %v9737_v55 = vpop.f32.mrf.mxu0 }
 0x383   : > { %10233 = vst [vmem:[#allocation72_spill] sm:$0xff] %v9737_v55  ;;  %v9759_v55 = vpop.f32.mrf.mxu1 }
 0x384   : > { %v9739_v28 = vpop.f32.mrf.mxu0  ;;  %10243 = vst [vmem:[#allocation82_spill] sm:$0xff] %v9759_v55 }
 0x385   : > { %10234 = vst [vmem:[#allocation73_spill] sm:$0xff] %v9739_v28 }
 0x386   : > { %v9743_v20 = vpop.f32.mrf.mxu0 }
 0x387   : > { %10236 = vst [vmem:[#allocation75_spill] sm:$0xff] %v9743_v20  ;;  %v9765_v20 = vpop.f32.mrf.mxu1 }
 0x388   : > { %v9745_v37 = vpop.f32.mrf.mxu0  ;;  %10246 = vst [vmem:[#allocation85_spill] sm:$0xff] %v9765_v20 }
 0x389   : > { %10237 = vst [vmem:[#allocation76_spill] sm:$0xff] %v9745_v37 }
 0x38a   : > { %v9749_v15 = vpop.f32.mrf.mxu0 }
 0x38b   : > { %10239 = vst [vmem:[#allocation78_spill] sm:$0xff] %v9749_v15  ;;  %v9771_v15 = vpop.f32.mrf.mxu1 }
 0x38c   : > { %v9751_v35 = vpop.f32.mrf.mxu0 }
 0x38d   : > { %10240 = vst [vmem:[#allocation79_spill] sm:$0xff] %v9751_v35 }
 0x38e   : > { %v9755_v42 = vpop.f32.mrf.mxu0 }
 0x38f   : > { %10241 = vst [vmem:[#allocation80_spill] sm:$0xff] %v9755_v42  ;;  %v5157_v42 = vadd.f32 %v9546_v25, %v9544_v50  ;;  %v5156_v25 = vadd.f32 %v9561_v26, %v9559_v14 }
 0x390   : > { %v9757_v38 = vpop.f32.mrf.mxu0 }
 0x391   : > { %10242 = vst [vmem:[#allocation81_spill] sm:$0xff] %v9757_v38  ;;  %v5452_v55 = vadd.f32 %v7428_v59, %v5157_v42  ;;  %v5161_v42 = vadd.f32 %v9566_v17, %v9564_v21 }
 0x392   : > { %v9761_v28 = vpop.f32.mrf.mxu0 }
 0x393   : > { %10244 = vst [vmem:[#allocation83_spill] sm:$0xff] %v9761_v28  ;;  %v5155_v28 = vadd.f32 %v9551_v11, %v9549_v40  ;;  %v5746_v40 = vadd.f32 %v7462_v58, %v5452_v55 }
 0x394   : > { %v9763_v5 = vpop.f32.mrf.mxu0 }
 0x395   : > { %10245 = vst [vmem:[#allocation84_spill] sm:$0xff] %v9763_v5  ;;  %v9781_v5 = vpop.f32.mrf.mxu1 }
 0x396   : > { %v9767_v37 = vpop.f32.mrf.mxu0 }
 0x397   : > { %10247 = vst [vmem:[#allocation86_spill] sm:$0xff] %v9767_v37  ;;  %v5450_v37 = vadd.f32 %v5323_v31, %v5155_v28  ;;  %v9798_v59 = vpop.f32.mrf.mxu1  ;;  %v5451_v28 = vadd.f32 %v5326_v47, %v5156_v25 }
 0x398   : > { %v9769_v62 = vpop.f32.mrf.mxu0 }
 0x399   : > { %10248 = vst [vmem:[#allocation87_spill] sm:$0xff] %v9769_v62  ;;  %v5158_v62 = vadd.f32 %v9556_v43, %v9554_v4  ;;  %v5744_v43 = vadd.f32 %v5617_v39, %v5450_v37 }
 0x39a   : > { %v9773_v35 = vpop.f32.mrf.mxu0 }
 0x39b   : > { %10249 = vst [vmem:[#allocation88_spill] sm:$0xff] %v9773_v35  ;;  %v9790_v35 = vld [vmem:[%s10031_s6] ss:$0 sm:$0xff]  ;;  %v5453_v11 = vadd.f32 %v7429_v22, %v5158_v62 }
 0x39c   : > { %v9777_v38 = vpop.f32.mrf.mxu0  ;;  %v3298_v4 = vadd.f32 %v9069_v9, %v9790_v35  ;;  %v3290_v26 = vadd.f32 %v9790_v35, %v9084_v0  ;;  %v3301_v62 = vadd.f32 %v9096_v41, %v9790_v35  ;;  %v5162_v9 = vadd.f32 %v9576_v60, %v9574_v23 }
 0x39d   : > { %10250 = vst [vmem:[#allocation89_spill] sm:$0xff] %v9777_v38  ;;  %v5456_v38 = vadd.f32 %v7432_v2, %v5161_v42  ;;  %v5747_v55 = vadd.f32 %v7463_v3, %v5453_v11  ;;  %v3293_v23 = vadd.f32 %v9790_v35, %v9100_v7  ;;  %v5160_v60 = vadd.f32 %v9581_v54, %v9579_v19 }
 0x39e   : > { %v9783_v20 = vpop.f32.mrf.mxu0  ;;  %v5457_v58 = vadd.f32 %v9707_v63, %v5162_v9 }
 0x39f   : > { %10251 = vst [vmem:[#allocation90_spill] sm:$0xff] %v9783_v20 }
 0x3a0   : > { %v9792_v50 = vpop.f32.mrf.mxu0 }
 0x3a1   : > { %10252 = vst [vmem:[#allocation91_spill] sm:$0xff] %v9792_v50  ;;  %v5159_v50 = vadd.f32 %v9571_v6, %v9569_v27  ;;  %v5745_v27 = vadd.f32 %v9705_v44, %v5451_v28  ;;  %v3314_v44 = vadd.f32 %v9112_v13, %v9790_v35  ;;  %v5163_v13 = vadd.f32 %v9591_v49, %v9589_v46 }
 0x3a2   : > { %v7496_v20 = vpop.f32.mrf.mxu0 }
 0x3a3   : > { %v6040_v31 = vadd.f32 %v7496_v20, %v5746_v40  ;;  %v5454_v37 = vadd.f32 %v9703_v45, %v5159_v50  ;;  %v9811_v20 = vpop.f32.mrf.mxu1  ;;  %v5750_v45 = vadd.f32 %v9711_v33, %v5456_v38  ;;  %v5165_v50 = vadd.f32 %v9586_v10, %v9584_v16 }
 0x3a4   : > { %v5911_v14 = vpop.f32.mrf.mxu0  ;;  %v5455_v38 = vadd.f32 %v9709_v18, %v5160_v60  ;;  %v3306_v40 = vadd.f32 %v9790_v35, %v9116_v61  ;;  %v5458_v61 = vadd.f32 %v9715_v53, %v5163_v13 }
 0x3a5   : > { %v6072_v21 = vadd.f32 %v6040_v31, %v3298_v4  ;;  %v6038_v17 = vadd.f32 %v5911_v14, %v5744_v43  ;;  %v5748_v7 = vadd.f32 %v9717_v56, %v5454_v37  ;;  %v9833_v25 = vpop.f32.mrf.mxu1  ;;  %v5460_v16 = vadd.f32 %v9713_v12, %v5165_v50 }
 0x3a6   : > { %v7497_v0 = vpop.f32.mrf.mxu0  ;;  %v5751_v56 = vadd.f32 %v9723_v36, %v5457_v58  ;;  %v3317_v4 = vadd.f32 %v9128_v24, %v9790_v35  ;;  %v5166_v43 = vadd.f32 %v9596_v30, %v9594_v8  ;;  %v5749_v49 = vadd.f32 %v9729_v51, %v5455_v38  ;;  %v10263_v38 = vld [vmem:[#allocation19_spill] sm:$0xff] }
 0x3a7   : > { %v6104_v6 = vmax.f32 %v6072_v21, 0.0  ;;  %v6070_v39 = vadd.f32 %v6038_v17, %v3290_v26  ;;  %v6041_v41 = vadd.f32 %v7497_v0, %v5747_v55  ;;  %v9849_v28 = vpop.f32.mrf.mxu1  ;;  %v3309_v14 = vadd.f32 %v9790_v35, %v9132_v29  ;;  %v10253_v17 = vld [vmem:[#allocation17_spill] sm:$0xff]  ;;  %v10255_v29 = vld [vmem:[#allocation74_spill] sm:$0xff] }
 0x3a8   : > { %v5914_v3 = vpop.f32.mrf.mxu0  ;;  %v5164_v24 = vadd.f32 %v9601_v32, %v9599_v48  ;;  %v5754_v8 = vadd.f32 %v9735_v1, %v5460_v16  ;;  %v5461_v53 = vadd.f32 %v9719_v57, %v5166_v43  ;;  %v3330_v21 = vadd.f32 %v9144_v52, %v9790_v35  ;;  %v10256_v32 = vld [vmem:[#allocation67_spill] sm:$0xff]  ;;  %v10259_v52 = vld [vmem:[#allocation40_spill] sm:$0xff]  ;;  %v10267_v43 = vld [vmem:[#allocation42_spill] sm:$0xff] }
 0x3a9   : > { %6136 = vst [vmem:[%s9818_s15 + $0x10] sm:$0xff] %v6104_v6  ;;  %v6102_v2 = vmax.f32 %v6070_v39, 0.0  ;;  %v6073_v22 = vadd.f32 %v6041_v41, %v3301_v62  ;;  %v6039_v47 = vadd.f32 %v5914_v3, %v5745_v27  ;;  %v10254_v62 = vld [vmem:[#allocation45_spill] sm:$0xff]  ;;  %v5752_v37 = vadd.f32 %v10255_v29, %v5458_v61  ;;  %v9865_v0 = vpop.f32.mrf.mxu1  ;;  %v10268_v61 = vld [vmem:[#allocation23_spill] sm:$0xff] }
 0x3aa   : > { %v7500_v19 = vpop.f32.mrf.mxu0  ;;  %v5169_v9 = vadd.f32 %v10254_v62, %v10253_v17  ;;  %v5459_v1 = vadd.f32 %v10256_v32, %v5164_v24  ;;  %v10257_v39 = vld [vmem:[#allocation13_spill] sm:$0xff]  ;;  %v10275_v29 = vld [vmem:[#allocation71_spill] sm:$0xff] }
 0x3ab   : > { %6134 = vst [vmem:[%s9818_s15] sm:$0xff] %v6102_v2  ;;  %v6105_v54 = vmax.f32 %v6073_v22, 0.0  ;;  %v6071_v63 = vadd.f32 %v6039_v47, %v3293_v23  ;;  %v6044_v33 = vadd.f32 %v7500_v19, %v5750_v45  ;;  %v3322_v41 = vadd.f32 %v9790_v35, %v10257_v39  ;;  %v10258_v23 = vld [vmem:[#allocation16_spill] sm:$0xff]  ;;  %v10261_v2 = vld [vmem:[#allocation77_spill] sm:$0xff]  ;;  %v9881_v13 = vpop.f32.mrf.mxu1  ;;  %v10278_v39 = vld [vmem:[#allocation51_spill] sm:$0xff] }
 0x3ac   : > { %v5927_v10 = vpop.f32.mrf.mxu0  ;;  %v5167_v60 = vadd.f32 %v10259_v52, %v10258_v23  ;;  %v10260_v45 = vld [vmem:[#allocation68_spill] sm:$0xff]  ;;  %v5755_v22 = vadd.f32 %v10261_v2, %v5461_v53 }
 0x3ad   : > { %6137 = vst [vmem:[%s9818_s15 + $0x18] sm:$0xff] %v6105_v54  ;;  %v6103_v11 = vmax.f32 %v6071_v63, 0.0  ;;  %v6076_v42 = vadd.f32 %v6044_v33, %v3314_v44  ;;  %v6042_v18 = vadd.f32 %v5927_v10, %v5748_v7  ;;  %v5464_v3 = vadd.f32 %v10260_v45, %v5169_v9  ;;  %v10262_v7 = vld [vmem:[#allocation33_spill] sm:$0xff]  ;;  %v10264_v54 = vld [vmem:[#allocation47_spill] sm:$0xff]  ;;  %v9897_v62 = vpop.f32.mrf.mxu1  ;;  %v10279_v23 = vld [vmem:[#allocation72_spill] sm:$0xff] }
 0x3ae   : > { %v7501_v46 = vpop.f32.mrf.mxu0  ;;  %v3333_v19 = vadd.f32 %v10262_v7, %v9790_v35  ;;  %v5170_v63 = vadd.f32 %v10264_v54, %v10263_v38  ;;  %v10265_v33 = vld [vmem:[#allocation69_spill] sm:$0xff]  ;;  %v5753_v10 = vadd.f32 %v9753_v34, %v5459_v1 }
 0x3af   : > { %6135 = vst [vmem:[%s9818_s15 + $0x8] sm:$0xff] %v6103_v11  ;;  %v6108_v36 = vmax.f32 %v6076_v42, 0.0  ;;  %v6074_v12 = vadd.f32 %v6042_v18, %v3306_v40  ;;  %v6045_v31 = vadd.f32 %v7501_v46, %v5751_v56  ;;  %v5462_v40 = vadd.f32 %v10265_v33, %v5167_v60  ;;  %v10266_v18 = vld [vmem:[#allocation30_spill] sm:$0xff]  ;;  %v9913_v54 = vpop.f32.mrf.mxu1 }
 0x3b0   : > { %v5930_v30 = vpop.f32.mrf.mxu0  ;;  %v5168_v46 = vadd.f32 %v10268_v61, %v10267_v43  ;;  %v10287_v61 = vld [vmem:[#allocation75_spill] sm:$0xff] }
 0x3b1   : > { %6140 = vst [vmem:[%s9818_s15 + $0x30] sm:$0xff] %v6108_v36  ;;  %v6106_v26 = vmax.f32 %v6074_v12, 0.0  ;;  %v6077_v55 = vadd.f32 %v6045_v31, %v3317_v4  ;;  %v6043_v51 = vadd.f32 %v5930_v30, %v5749_v49  ;;  %v3325_v4 = vadd.f32 %v9790_v35, %v10266_v18  ;;  %v10269_v49 = vld [vmem:[#allocation82_spill] sm:$0xff] }
 0x3b2   : > { %v7504_v48 = vpop.f32.mrf.mxu0  ;;  %v5758_v36 = vadd.f32 %v10269_v49, %v5464_v3  ;;  %v10270_v31 = vld [vmem:[#allocation70_spill] sm:$0xff] }
 0x3b3   : > { %6138 = vst [vmem:[%s9818_s15 + $0x20] sm:$0xff] %v6106_v26  ;;  %v6109_v57 = vmax.f32 %v6077_v55, 0.0  ;;  %v6075_v27 = vadd.f32 %v6043_v51, %v3309_v14  ;;  %v6048_v6 = vadd.f32 %v7504_v48, %v5754_v8  ;;  %v5465_v14 = vadd.f32 %v10270_v31, %v5170_v63  ;;  %v10271_v30 = vld [vmem:[#allocation10_spill] sm:$0xff]  ;;  %v10272_v26 = vld [vmem:[#allocation49_spill] sm:$0xff]  ;;  %v10273_v55 = vld [vmem:[#allocation44_spill] sm:$0xff] }
 0x3b4   : > { %v5943_v58 = vpop.f32.mrf.mxu0  ;;  %v3346_v53 = vadd.f32 %v10271_v30, %v9790_v35  ;;  %v5173_v51 = vadd.f32 %v10273_v55, %v10272_v26  ;;  %v9929_v30 = vpop.f32.mrf.mxu1 }
 0x3b5   : > { %6141 = vst [vmem:[%s9818_s15 + $0x38] sm:$0xff] %v6109_v57  ;;  %v6107_v47 = vmax.f32 %v6075_v27, 0.0  ;;  %v6080_v44 = vadd.f32 %v6048_v6, %v3330_v21  ;;  %v6046_v50 = vadd.f32 %v5943_v58, %v5752_v37  ;;  %v10274_v21 = vld [vmem:[#allocation85_spill] sm:$0xff]  ;;  %v5463_v37 = vadd.f32 %v10275_v29, %v5168_v46  ;;  %v10276_v57 = vld [vmem:[#allocation35_spill] sm:$0xff]  ;;  %v10277_v6 = vld [vmem:[#allocation20_spill] sm:$0xff] }
 0x3b6   : > { %v7505_v16 = vpop.f32.mrf.mxu0  ;;  %v5756_v17 = vadd.f32 %v10274_v21, %v5462_v40  ;;  %v3338_v27 = vadd.f32 %v9790_v35, %v10276_v57  ;;  %v5468_v52 = vadd.f32 %v10279_v23, %v5173_v51  ;;  %v5759_v45 = vadd.f32 %v9771_v15, %v5465_v14  ;;  %v10289_v14 = vld [vmem:[#allocation53_spill] sm:$0xff]  ;;  %v10293_v29 = vld [vmem:[#allocation48_spill] sm:$0xff] }
 0x3b7   : > { %6139 = vst [vmem:[%s9818_s15 + $0x28] sm:$0xff] %v6107_v47  ;;  %v6112_v56 = vmax.f32 %v6080_v44, 0.0  ;;  %v6078_v11 = vadd.f32 %v6046_v50, %v3322_v41  ;;  %v6049_v42 = vadd.f32 %v7505_v16, %v5755_v22  ;;  %v5171_v41 = vadd.f32 %v10278_v39, %v10277_v6  ;;  %v10280_v22 = vld [vmem:[#allocation31_spill] sm:$0xff]  ;;  %v10281_v44 = vld [vmem:[#allocation46_spill] sm:$0xff]  ;;  %v10282_v50 = vld [vmem:[#allocation5_spill] sm:$0xff] }
 0x3b8   : > { %v5946_v12 = vpop.f32.mrf.mxu0  ;;  %v3349_v47 = vadd.f32 %v10280_v22, %v9790_v35  ;;  %v5174_v7 = vadd.f32 %v10282_v50, %v10281_v44  ;;  %v5757_v33 = vadd.f32 %v9781_v5, %v5463_v37  ;;  %v10294_v37 = vld [vmem:[#allocation24_spill] sm:$0xff] }
 0x3b9   : > { %6144 = vst [vmem:[%s9818_s15 + $0x50] sm:$0xff] %v6112_v56  ;;  %v6110_v24 = vmax.f32 %v6078_v11, 0.0  ;;  %v6081_v8 = vadd.f32 %v6049_v42, %v3333_v19  ;;  %v6047_v34 = vadd.f32 %v5946_v12, %v5753_v10  ;;  %v10283_v19 = vld [vmem:[#allocation73_spill] sm:$0xff]  ;;  %v10284_v10 = vld [vmem:[#allocation7_spill] sm:$0xff]  ;;  %v10285_v11 = vld [vmem:[#allocation4_spill] sm:$0xff] }
 0x3ba   : > { %v7508_v9 = vpop.f32.mrf.mxu0  ;;  %v5466_v38 = vadd.f32 %v10283_v19, %v5171_v41  ;;  %v3341_v56 = vadd.f32 %v9790_v35, %v10284_v10  ;;  %v10286_v42 = vld [vmem:[#allocation22_spill] sm:$0xff]  ;;  %v5469_v46 = vadd.f32 %v10287_v61, %v5174_v7  ;;  %v10296_v41 = vld [vmem:[#allocation37_spill] sm:$0xff]  ;;  %v10300_v7 = vld [vmem:[#allocation11_spill] sm:$0xff] }
 0x3bb   : > { %6142 = vst [vmem:[%s9818_s15 + $0x40] sm:$0xff] %v6110_v24  ;;  %v6113_v48 = vmax.f32 %v6081_v8, 0.0  ;;  %v6079_v32 = vadd.f32 %v6047_v34, %v3325_v4  ;;  %v6052_v1 = vadd.f32 %v7508_v9, %v5758_v36  ;;  %v5172_v18 = vadd.f32 %v10286_v42, %v10285_v11  ;;  %v10288_v12 = vld [vmem:[#allocation6_spill] sm:$0xff]  ;;  %v10290_v24 = vld [vmem:[#allocation21_spill] sm:$0xff]  ;;  %v10304_v42 = vld [vmem:[#allocation32_spill] sm:$0xff] }
 0x3bc   : > { %v5959_v60 = vpop.f32.mrf.mxu0  ;;  %v5762_v4 = vadd.f32 %v9798_v59, %v5468_v52  ;;  %v3362_v31 = vadd.f32 %v10288_v12, %v9790_v35  ;;  %v5177_v8 = vadd.f32 %v10290_v24, %v10289_v14  ;;  %v5760_v34 = vadd.f32 %v9811_v20, %v5466_v38  ;;  %v10291_v59 = vld [vmem:[#allocation76_spill] sm:$0xff]  ;;  %v10297_v52 = vld [vmem:[#allocation55_spill] sm:$0xff]  ;;  %v10308_v24 = vld [vmem:[#allocation14_spill] sm:$0xff] }
 0x3bd   : > { %6145 = vst [vmem:[%s9818_s15 + $0x58] sm:$0xff] %v6113_v48  ;;  %v6111_v3 = vmax.f32 %v6079_v32, 0.0  ;;  %v6084_v58 = vadd.f32 %v6052_v1, %v3346_v53  ;;  %v6050_v2 = vadd.f32 %v5959_v60, %v5756_v17  ;;  %v5467_v26 = vadd.f32 %v10291_v59, %v5172_v18  ;;  %v10292_v17 = vld [vmem:[#allocation12_spill] sm:$0xff]  ;;  %v10295_v32 = vld [vmem:[#allocation78_spill] sm:$0xff] }
 0x3be   : > { %v7509_v63 = vpop.f32.mrf.mxu0  ;;  %v3354_v9 = vadd.f32 %v9790_v35, %v10292_v17  ;;  %v5175_v48 = vadd.f32 %v10294_v37, %v10293_v29  ;;  %v5472_v1 = vadd.f32 %v10295_v32, %v5177_v8  ;;  %v5763_v20 = vadd.f32 %v9833_v25, %v5469_v46  ;;  %v10298_v60 = vld [vmem:[#allocation50_spill] sm:$0xff]  ;;  %v10301_v38 = vld [vmem:[#allocation28_spill] sm:$0xff]  ;;  %v10312_v29 = vld [vmem:[#allocation39_spill] sm:$0xff] }
 0x3bf   : > { %6143 = vst [vmem:[%s9818_s15 + $0x48] sm:$0xff] %v6111_v3  ;;  %v6116_v15 = vmax.f32 %v6084_v58, 0.0  ;;  %v6082_v40 = vadd.f32 %v6050_v2, %v3338_v27  ;;  %v6053_v16 = vadd.f32 %v7509_v63, %v5759_v45  ;;  %v3365_v23 = vadd.f32 %v10296_v41, %v9790_v35  ;;  %v10299_v3 = vld [vmem:[#allocation79_spill] sm:$0xff]  ;;  %v5713_v2 = vpop.f32.mrf.mxu1  ;;  %v10302_v63 = vld [vmem:[#allocation57_spill] sm:$0xff] }
 0x3c0   : > { %v5962_v43 = vpop.f32.mrf.mxu0  ;;  %v5178_v45 = vadd.f32 %v10298_v60, %v10297_v52  ;;  %v5470_v58 = vadd.f32 %v10299_v3, %v5175_v48  ;;  %v3357_v19 = vadd.f32 %v9790_v35, %v10300_v7  ;;  %v3378_v18 = vadd.f32 %v10304_v42, %v9790_v35  ;;  %v10313_v48 = vld [vmem:[#allocation27_spill] sm:$0xff]  ;;  %v10314_v32 = vld [vmem:[#allocation61_spill] sm:$0xff]  ;;  %v10316_v52 = vld [vmem:[#allocation34_spill] sm:$0xff] }
 0x3c1   : > { %6148 = vst [vmem:[%s9818_s15 + $0x70] sm:$0xff] %v6116_v15  ;;  %v6114_v49 = vmax.f32 %v6082_v40, 0.0  ;;  %v6085_v36 = vadd.f32 %v6053_v16, %v3349_v47  ;;  %v6051_v5 = vadd.f32 %v5962_v43, %v5757_v33  ;;  %v5761_v47 = vadd.f32 %v9849_v28, %v5467_v26  ;;  %v10303_v16 = vld [vmem:[#allocation80_spill] sm:$0xff]  ;;  %v10306_v43 = vld [vmem:[#allocation25_spill] sm:$0xff]  ;;  %v10311_v26 = vld [vmem:[#allocation83_spill] sm:$0xff] }
 0x3c2   : > { %v7512_v53 = vpop.f32.mrf.mxu0  ;;  %v5176_v33 = vadd.f32 %v10302_v63, %v10301_v38  ;;  %v5766_v15 = vadd.f32 %v9865_v0, %v5472_v1  ;;  %v5473_v10 = vadd.f32 %v10303_v16, %v5178_v45  ;;  %v5764_v46 = vadd.f32 %v9881_v13, %v5470_v58  ;;  %v10317_v45 = vld [vmem:[#allocation26_spill] sm:$0xff]  ;;  %v10318_v3 = vld [vmem:[#allocation56_spill] sm:$0xff] }
 0x3c3   : > { %6146 = vst [vmem:[%s9818_s15 + $0x60] sm:$0xff] %v6114_v49  ;;  %v6117_v55 = vmax.f32 %v6085_v36, 0.0  ;;  %v6083_v51 = vadd.f32 %v6051_v5, %v3341_v56  ;;  %v6056_v21 = vadd.f32 %v7512_v53, %v5762_v4  ;;  %v10305_v4 = vld [vmem:[#allocation52_spill] sm:$0xff]  ;;  %v7487_v49 = vpop.f32.mrf.mxu1  ;;  %v10307_v5 = vld [vmem:[#allocation81_spill] sm:$0xff]  ;;  %v3370_v8 = vadd.f32 %v9790_v35, %v10308_v24  ;;  %v10310_v53 = vld [vmem:[#allocation54_spill] sm:$0xff] }
 0x3c4   : > { %v5975_v57 = vpop.f32.mrf.mxu0  ;;  %v5181_v61 = vadd.f32 %v10306_v43, %v10305_v4  ;;  %v5471_v0 = vadd.f32 %v10307_v5, %v5176_v33  ;;  %v5767_v13 = vadd.f32 %v9897_v62, %v5473_v10  ;;  %v3381_v37 = vadd.f32 %v10312_v29, %v9790_v35  ;;  %v10320_v38 = vld [vmem:[#allocation18_spill] sm:$0xff]  ;;  %v10321_v33 = vld [vmem:[#allocation29_spill] sm:$0xff]  ;;  %v10332_v29 = vld [vmem:[#allocation15_spill] sm:$0xff] }
 0x3c5   : > { %6149 = vst [vmem:[%s9818_s15 + $0x78] sm:$0xff] %v6117_v55  ;;  %v6115_v27 = vmax.f32 %v6083_v51, 0.0  ;;  %v6088_v6 = vadd.f32 %v6056_v21, %v3362_v31  ;;  %v6054_v39 = vadd.f32 %v5975_v57, %v5760_v34  ;;  %v10309_v34 = vld [vmem:[#allocation59_spill] sm:$0xff]  ;;  %v5182_v1 = vadd.f32 %v10314_v32, %v10313_v48  ;;  %v10315_v57 = vld [vmem:[#allocation84_spill] sm:$0xff]  ;;  %v10325_v43 = vld [vmem:[#allocation58_spill] sm:$0xff] }
 0x3c6   : > { %v7513_v22 = vpop.f32.mrf.mxu0  ;;  %v5179_v59 = vadd.f32 %v10310_v53, %v10309_v34  ;;  %v5476_v55 = vadd.f32 %v10311_v26, %v5181_v61  ;;  %v3373_v60 = vadd.f32 %v9790_v35, %v10316_v52  ;;  %v5180_v58 = vadd.f32 %v10318_v3, %v10317_v45  ;;  %v10326_v61 = vld [vmem:[#allocation65_spill] sm:$0xff]  ;;  %v10329_v53 = vld [vmem:[#allocation60_spill] sm:$0xff]  ;;  %v10334_v32 = vld [vmem:[#allocation66_spill] sm:$0xff] }
 0x3c7   : > { %6147 = vst [vmem:[%s9818_s15 + $0x68] sm:$0xff] %v6115_v27  ;;  %v6120_v44 = vmax.f32 %v6088_v6, 0.0  ;;  %v6086_v25 = vadd.f32 %v6054_v39, %v3354_v9  ;;  %v6057_v50 = vadd.f32 %v7513_v22, %v5763_v20  ;;  %v5716_v27 = vpop.f32.mrf.mxu1  ;;  %v5765_v39 = vadd.f32 %v9913_v54, %v5471_v0  ;;  %v10333_v48 = vld [vmem:[#allocation64_spill] sm:$0xff]  ;;  %v10336_v52 = vld [vmem:[#allocation43_spill] sm:$0xff] }
 0x3c8   : > { %v5978_v40 = vpop.f32.mrf.mxu0  ;;  %v5474_v20 = vadd.f32 %v10315_v57, %v5179_v59  ;;  %v5770_v22 = vadd.f32 %v9929_v30, %v5476_v55  ;;  %v3394_v63 = vadd.f32 %v10320_v38, %v9790_v35  ;;  %v10330_v59 = vld [vmem:[#allocation62_spill] sm:$0xff]  ;;  %v10331_v55 = vld [vmem:[#allocation89_spill] sm:$0xff] }
 0x3c9   : > { %6152 = vst [vmem:[%s9818_s15 + $0x90] sm:$0xff] %v6120_v44  ;;  %v6118_v56 = vmax.f32 %v6086_v25, 0.0  ;;  %v6089_v11 = vadd.f32 %v6057_v50, %v3365_v23  ;;  %v6055_v28 = vadd.f32 %v5978_v40, %v5761_v47  ;;  %v7490_v47 = vpop.f32.mrf.mxu1  ;;  %v10319_v25 = vld [vmem:[#allocation86_spill] sm:$0xff]  ;;  %v5186_v26 = vadd.f32 %v10330_v59, %v10329_v53 }
 0x3ca   : > { %v7516_v36 = vpop.f32.mrf.mxu0  ;;  %v5477_v50 = vadd.f32 %v10319_v25, %v5182_v1  ;;  %v5768_v16 = vadd.f32 %v5713_v2, %v5474_v20  ;;  %v5184_v1 = vadd.f32 %v10334_v32, %v10333_v48 }
 0x3cb   : > { %6150 = vst [vmem:[%s9818_s15 + $0x80] sm:$0xff] %v6118_v56  ;;  %v6121_v12 = vmax.f32 %v6089_v11, 0.0  ;;  %v6087_v31 = vadd.f32 %v6055_v28, %v3357_v19  ;;  %v6060_v14 = vadd.f32 %v7516_v36, %v5766_v15  ;;  %v10322_v15 = vld [vmem:[#allocation63_spill] sm:$0xff]  ;;  %v10327_v36 = vld [vmem:[#allocation88_spill] sm:$0xff]  ;;  %v5729_v0 = vpop.f32.mrf.mxu1 }
 0x3cc   : > { %v5991_v51 = vpop.f32.mrf.mxu0  ;;  %v5185_v40 = vadd.f32 %v10322_v15, %v10321_v33  ;;  %v10323_v56 = vld [vmem:[#allocation87_spill] sm:$0xff] }
 0x3cd   : > { %6153 = vst [vmem:[%s9818_s15 + $0x98] sm:$0xff] %v6121_v12  ;;  %v6119_v21 = vmax.f32 %v6087_v31, 0.0  ;;  %v6092_v17 = vadd.f32 %v6060_v14, %v3378_v18  ;;  %v6058_v9 = vadd.f32 %v5991_v51, %v5764_v46  ;;  %v5475_v11 = vadd.f32 %v10323_v56, %v5180_v58  ;;  %v10324_v18 = vld [vmem:[#allocation41_spill] sm:$0xff]  ;;  %v7491_v20 = vpop.f32.mrf.mxu1  ;;  %v10337_v58 = vld [vmem:[#allocation91_spill] sm:$0xff] }
 0x3ce   : > { %v7517_v6 = vpop.f32.mrf.mxu0  ;;  %v3386_v4 = vadd.f32 %v9790_v35, %v10324_v18  ;;  %v5183_v46 = vadd.f32 %v10326_v61, %v10325_v43  ;;  %v5480_v5 = vadd.f32 %v10327_v36, %v5185_v40  ;;  %v5771_v31 = vadd.f32 %v7487_v49, %v5477_v50  ;;  %v10338_v50 = vld [vmem:[#allocation38_spill] sm:$0xff]  ;;  %v10339_v40 = vld [vmem:[#allocation9_spill] sm:$0xff]  ;;  %v10340_v18 = vld [vmem:[#allocation8_spill] sm:$0xff] }
 0x3cf   : > { %6151 = vst [vmem:[%s9818_s15 + $0x88] sm:$0xff] %v6119_v21  ;;  %v6124_v41 = vmax.f32 %v6092_v17, 0.0  ;;  %v6090_v62 = vadd.f32 %v6058_v9, %v3370_v8  ;;  %v6061_v23 = vadd.f32 %v7517_v6, %v5767_v13  ;;  %v10328_v8 = vld [vmem:[#allocation36_spill] sm:$0xff]  ;;  %v5769_v21 = vadd.f32 %v5716_v27, %v5475_v11 }
 0x3d0   : > { %v5994_v44 = vpop.f32.mrf.mxu0  ;;  %v3397_v34 = vadd.f32 %v10328_v8, %v9790_v35  ;;  %v5478_v51 = vadd.f32 %v10331_v55, %v5183_v46  ;;  %v5774_v57 = vadd.f32 %v7490_v47, %v5480_v5 }
 0x3d1   : > { %6156 = vst [vmem:[%s9818_s15 + $0xb0] sm:$0xff] %v6124_v41  ;;  %v6122_v7 = vmax.f32 %v6090_v62, 0.0  ;;  %v6093_v54 = vadd.f32 %v6061_v23, %v3381_v37  ;;  %v6059_v19 = vadd.f32 %v5994_v44, %v5765_v39  ;;  %v3389_v37 = vadd.f32 %v9790_v35, %v10332_v29  ;;  %v10335_v39 = vld [vmem:[#allocation90_spill] sm:$0xff] }
 0x3d2   : > { %v7520_v10 = vpop.f32.mrf.mxu0  ;;  %v5481_v41 = vadd.f32 %v10335_v39, %v5186_v26  ;;  %v5772_v45 = vadd.f32 %v5729_v0, %v5478_v51 }
 0x3d3   : > { %6154 = vst [vmem:[%s9818_s15 + $0xa0] sm:$0xff] %v6122_v7  ;;  %v6125_v30 = vmax.f32 %v6093_v54, 0.0  ;;  %v6091_v28 = vadd.f32 %v6059_v19, %v3373_v60  ;;  %v6064_v42 = vadd.f32 %v7520_v10, %v5770_v22  ;;  %v3410_v60 = vadd.f32 %v10336_v52, %v9790_v35  ;;  %v5732_v54 = vpop.f32.mrf.mxu1 }
 0x3d4   : > { %v6007_v12 = vpop.f32.mrf.mxu0  ;;  %v5479_v22 = vadd.f32 %v10337_v58, %v5184_v1  ;;  %v3402_v7 = vadd.f32 %v9790_v35, %v10338_v50  ;;  %v5775_v38 = vadd.f32 %v7491_v20, %v5481_v41 }
 0x3d5   : > { %6157 = vst [vmem:[%s9818_s15 + $0xb8] sm:$0xff] %v6125_v30  ;;  %v6123_v2 = vmax.f32 %v6091_v28, 0.0  ;;  %v6096_v14 = vadd.f32 %v6064_v42, %v3394_v63  ;;  %v6062_v24 = vadd.f32 %v6007_v12, %v5768_v16  ;;  %v3413_v16 = vadd.f32 %v10339_v40, %v9790_v35 }
 0x3d6   : > { %v7521_v13 = vpop.f32.mrf.mxu0  ;;  %v5773_v56 = vadd.f32 %v5732_v54, %v5479_v22 }
 0x3d7   : > { %6155 = vst [vmem:[%s9818_s15 + $0xa8] sm:$0xff] %v6123_v2  ;;  %v6128_v17 = vmax.f32 %v6096_v14, 0.0  ;;  %v6094_v9 = vadd.f32 %v6062_v24, %v3386_v4  ;;  %v6065_v49 = vadd.f32 %v7521_v13, %v5771_v31  ;;  %v3405_v4 = vadd.f32 %v9790_v35, %v10340_v18 }
 0x3d8   : > { %v6010_v6 = vpop.f32.mrf.mxu0 }
 0x3d9   : > { %6160 = vst [vmem:[%s9818_s15 + $0xd0] sm:$0xff] %v6128_v17  ;;  %v6126_v62 = vmax.f32 %v6094_v9, 0.0  ;;  %v6097_v27 = vadd.f32 %v6065_v49, %v3397_v34  ;;  %v6063_v23 = vadd.f32 %v6010_v6, %v5769_v21 }
 0x3da   : > { %v7524_v3 = vpop.f32.mrf.mxu0 }
 0x3db   : > { %6158 = vst [vmem:[%s9818_s15 + $0xc0] sm:$0xff] %v6126_v62  ;;  %v6129_v44 = vmax.f32 %v6097_v27, 0.0  ;;  %v6095_v47 = vadd.f32 %v6063_v23, %v3389_v37  ;;  %v6068_v25 = vadd.f32 %v7524_v3, %v5774_v57 }
 0x3dc   : > { %v6023_v19 = vpop.f32.mrf.mxu0 }
 0x3dd   : > { %6161 = vst [vmem:[%s9818_s15 + $0xd8] sm:$0xff] %v6129_v44  ;;  %v6127_v63 = vmax.f32 %v6095_v47, 0.0  ;;  %v6100_v33 = vadd.f32 %v6068_v25, %v3410_v60  ;;  %v6066_v15 = vadd.f32 %v6023_v19, %v5772_v45 }
 0x3de   : > { %v7525_v10 = vpop.f32.mrf.mxu0 }
 0x3df   : > { %6159 = vst [vmem:[%s9818_s15 + $0xc8] sm:$0xff] %v6127_v63  ;;  %v6132_v11 = vmax.f32 %v6100_v33, 0.0  ;;  %v6098_v30 = vadd.f32 %v6066_v15, %v3402_v7  ;;  %v6069_v28 = vadd.f32 %v7525_v10, %v5775_v38 }
 0x3e0   : > { %v6026_v42 = vpop.f32.mrf.mxu0 }
 0x3e1   : > { %6164 = vst [vmem:[%s9818_s15 + $0xf0] sm:$0xff] %v6132_v11  ;;  %v6130_v43 = vmax.f32 %v6098_v30, 0.0  ;;  %v6101_v61 = vadd.f32 %v6069_v28, %v3413_v16  ;;  %v6067_v46 = vadd.f32 %v6026_v42, %v5773_v56 }
 0x3e3   : > { %6162 = vst [vmem:[%s9818_s15 + $0xe0] sm:$0xff] %v6130_v43  ;;  %v6133_v36 = vmax.f32 %v6101_v61, 0.0  ;;  %v6099_v5 = vadd.f32 %v6067_v46, %v3405_v4 }
 0x3e5   : > { %6165 = vst [vmem:[%s9818_s15 + $0xf8] sm:$0xff] %v6133_v36  ;;  %v6131_v0 = vmax.f32 %v6099_v5, 0.0 }
 0x3e7   : > { %6163 = vst [vmem:[%s9818_s15 + $0xe8] sm:$0xff] %v6131_v0 }
 0x3e8 PF: > { %s17_s24 = sadd.s32 1, %s7563_s24  }
 0x3e9   : > { %p14_p4 = scmp.ge.s32.totalorder %s17_s24, 4  }
 0x3eb   :  { %16 = sbr.rel (!%p14_p4) target bundleno = 1 (0x1), region = 100 }

</bundles_post_ra>
